<compile_context>
chip_gen: v7x
topology: tpu7x:2x2x1
jax: 0.10.0
libtpu: 0.0.40
codegen_flags: <defaults>
</compile_context>

<pallas_src>
import jax
import jax.numpy as jnp
from jax.experimental import pallas as pl
from jax.experimental.pallas import tpu as pltpu


# ----------------------------------------------------------------------------
# Pallas kernel: fused  relu(W1_eff^T @ x + b1_eff)  ->  W2^T @ h + b2
# ----------------------------------------------------------------------------
def _seghead_kernel(x_ref, w1t_ref, b1_ref, w2t_ref, b2_ref, o_ref):
    # x_ref:   (in_c, ts)    f32/bf16  activation tile (channels x spatial)
    # w1t_ref: (RD, in_c)    bf16      BN-folded reduce-conv weight (transposed)
    # b1_ref:  (RD, 1)       f32       BN-folded bias (column vector)
    # w2t_ref: (NP_pad, RD)  bf16      part-conv weight (transposed, 16-padded)
    # b2_ref:  (NP_pad, 1)   f32
    # o_ref:   (NP_pad, ts)  f32
    x = x_ref[...].astype(jnp.bfloat16)              # no-op if producer is bf16
    h = jnp.dot(w1t_ref[...], x, preferred_element_type=jnp.float32)
    h = jnp.maximum(h + b1_ref[...], 0.0)            # folded conv-bias + BN, ReLU
    # Dropout is identity at inference.
    # TODO(synk): training-mode dropout (p=0.5) not modeled.
    # TODO(synk): on v5e, check bundle dump for the M=16 second dot; if Mosaic
    #             makes h the stationary operand, drive it with
    #             pltpu.matmul_push_rhs (W2 stationary). <1% of FLOPs, skip
    #             unless v5e-compute-bound.
    o = jnp.dot(w2t_ref[...], h.astype(jnp.bfloat16),
                preferred_element_type=jnp.float32)
    o_ref[...] = o + b2_ref[...]


# ----------------------------------------------------------------------------
# Per-generation config and spatial-tile choice
# ----------------------------------------------------------------------------
def _hw_config():
    """TPU-generation-dependent tile cap and VMEM limit."""
    vmem_bytes = None
    try:
        info = pltpu.get_tpu_info()
        vmem_bytes = getattr(info, "vmem_capacity_bytes", None)
    except Exception:
        vmem_bytes = None
    if vmem_bytes is None:
        vmem_bytes = 64 * 1024 * 1024          # conservative: assume 64 MiB (v7x)
    if vmem_bytes >= 100 * 1024 * 1024:        # v5e / v6e: 128 MiB physical VMEM
        return {"ts_cap": 4096, "vmem_limit": 96 * 1024 * 1024}
    else:                                      # v7x: 64 MiB physical VMEM
        return {"ts_cap": 2048, "vmem_limit": 48 * 1024 * 1024}


def _choose_spatial_tile(n, hw, ts_target, ts_cap):
    """Pick a lane-dense spatial tile (multiple of 128, or the full extent)."""
    if hw <= 128:
        # Single full-extent block (block dim == full array dim is allowed).
        return hw
    ts = min(ts_target, ts_cap)
    ts = max(128, (ts // 128) * 128)                 # force multiple of 128
    hw128 = pl.cdiv(hw, 128) * 128
    ts = min(ts, hw128)
    # v7x shards parallel grid axes across 2 TensorCores: with a small, odd
    # program count one core idles; split tiles until the total is even.
    n_prog = n * pl.cdiv(hw, ts)
    if n_prog % 2 == 1 and n_prog < 8:
        t = ts
        while t > 128:
            t = max(128, ((t // 2) // 128) * 128)
            if (n * pl.cdiv(hw, t)) % 2 == 0:
                ts = t
                break
    return ts


# ----------------------------------------------------------------------------
# Wrapper
# ----------------------------------------------------------------------------
def seghead_fc_forward(x_nchw, params, *, ts_target=2048):
    """SegHeadFC forward.

    x_nchw: (N, in_c, H, W) float32 or bfloat16 -> (N, num_parts, H, W) float32.
    """
    n, in_c, h, w = x_nchw.shape
    w1t = params["w1t"]            # (RD, in_c)   bf16, BN folded
    b1c = params["b1_col"]         # (RD, 1)      f32
    w2t = params["w2t_padded"]     # (NP_pad, RD) bf16
    b2c = params["b2_col_padded"]  # (NP_pad, 1)  f32
    num_parts = params["num_parts"]
    rd = w1t.shape[0]
    np_pad = w2t.shape[0]

    hw = h * w
    cfg = _hw_config()
    ts = _choose_spatial_tile(n, hw, ts_target, cfg["ts_cap"])

    # NCHW -> (N, in_c, H*W): trailing-dim merge, no data movement, no padding.
    x3 = x_nchw.reshape(n, in_c, hw)

    grid = (n, pl.cdiv(hw, ts))

    flops = 2 * n * hw * (in_c * rd + rd * np_pad)
    bytes_accessed = (n * in_c * hw * x3.dtype.itemsize   # x read
                      + n * np_pad * hw * 4               # out write (f32)
                      + w1t.size * 2 + w2t.size * 2       # bf16 weights
                      + b1c.size * 4 + b2c.size * 4)

    out = pl.pallas_call(
        _seghead_kernel,
        out_shape=jax.ShapeDtypeStruct((n, np_pad, hw), jnp.float32),
        grid_spec=pltpu.PrefetchScalarGridSpec(
            num_scalar_prefetch=0,
            grid=grid,
            in_specs=[
                pl.BlockSpec((None, in_c, ts), lambda b, j: (b, 0, j)),  # x slab
                pl.BlockSpec((rd, in_c), lambda b, j: (0, 0)),           # W1^T (resident)
                pl.BlockSpec((rd, 1), lambda b, j: (0, 0)),              # b1 (folded)
                pl.BlockSpec((np_pad, rd), lambda b, j: (0, 0)),         # W2^T (resident)
                pl.BlockSpec((np_pad, 1), lambda b, j: (0, 0)),          # b2
            ],
            out_specs=pl.BlockSpec((None, np_pad, ts), lambda b, j: (b, 0, j)),
        ),
        compiler_params=pltpu.CompilerParams(
            dimension_semantics=("parallel", "parallel"),
            vmem_limit_bytes=cfg["vmem_limit"],
        ),
        cost_estimate=pl.CostEstimate(
            flops=flops, transcendentals=0, bytes_accessed=bytes_accessed),
    )(x3, w1t, b1c, w2t, b2c)

    # Strip sublane padding; output is already channels-first.
    return out[:, :num_parts, :].reshape(n, num_parts, h, w)


# ----------------------------------------------------------------------------
# Deterministic parameter construction (matches module __init__ shapes/init)
# ----------------------------------------------------------------------------
def make_params(key, in_c=1024, reduce_dim=512, num_parts=3, sublane_pad=16):
    k1, k2 = jax.random.split(key, 2)

    # reduce_conv: Conv2d(in_c, reduce_dim, k=1), kaiming_normal_(fan_out)
    #   weight (reduce_dim, in_c, 1, 1); fan_out = reduce_dim
    std1 = (2.0 / reduce_dim) ** 0.5
    w1 = std1 * jax.random.normal(k1, (reduce_dim, in_c), jnp.float32)  # (out, in)
    b1 = jnp.zeros((reduce_dim,), jnp.float32)

    # BatchNorm2d(reduce_dim): gamma=1, beta=0, running_mean=0, running_var=1
    bn_eps = 1e-5
    gamma = jnp.ones((reduce_dim,), jnp.float32)
    beta = jnp.zeros((reduce_dim,), jnp.float32)
    run_mean = jnp.zeros((reduce_dim,), jnp.float32)
    run_var = jnp.ones((reduce_dim,), jnp.float32)
    scale = gamma / jnp.sqrt(run_var + bn_eps)
    shift = beta - run_mean * scale

    # Fold conv bias + eval-mode BN:  scale*(W x + b) + shift
    w1_eff = w1 * scale[:, None]          # (RD, in_c)
    b1_eff = b1 * scale + shift           # (RD,)

    # part_conv: Conv2d(reduce_dim, num_parts, k=1), kaiming_normal_(fan_out)
    std2 = (2.0 / num_parts) ** 0.5
    w2 = std2 * jax.random.normal(k2, (num_parts, reduce_dim), jnp.float32)
    b2 = jnp.zeros((num_parts,), jnp.float32)

    # Pad the tiny part axis up to one bf16 sublane tile (16).
    np_pad = ((num_parts + sublane_pad - 1) // sublane_pad) * sublane_pad
    w2t = jnp.zeros((np_pad, reduce_dim), jnp.float32).at[:num_parts].set(w2)
    b2p = jnp.zeros((np_pad,), jnp.float32).at[:num_parts].set(b2)

    return {
        "w1t": w1_eff.astype(jnp.bfloat16),        # bf16 MXU operand
        "b1_col": b1_eff.reshape(reduce_dim, 1),   # f32 epilogue
        "w2t_padded": w2t.astype(jnp.bfloat16),    # bf16 MXU operand
        "b2_col_padded": b2p.reshape(np_pad, 1),   # f32 epilogue
        # Full-precision copies for the pure-JAX reference.
        "w1t_f32": w1_eff,
        "w2t_f32": w2t,
        "num_parts": num_parts,
    }


# ----------------------------------------------------------------------------
# Pure-JAX (f32) reference for a sanity check
# ----------------------------------------------------------------------------
def seghead_fc_ref(x_nchw, params):
    n, in_c, h, w = x_nchw.shape
    x3 = x_nchw.astype(jnp.float32).reshape(n, in_c, h * w)
    hid = jnp.einsum("rc,ncs->nrs", params["w1t_f32"], x3) + params["b1_col"]
    hid = jnp.maximum(hid, 0.0)
    o = jnp.einsum("pr,nrs->nps", params["w2t_f32"], hid) + params["b2_col_padded"]
    return o[:, :params["num_parts"], :].reshape(n, params["num_parts"], h, w)


def _max_rel_err(a, b):
    return float(jnp.max(jnp.abs(a - b)) / (jnp.max(jnp.abs(b)) + 1e-6))


if __name__ == "__main__":
    key = jax.random.PRNGKey(0)
    kx, kx2, kp = jax.random.split(key, 3)

    params = make_params(kp, in_c=1024, reduce_dim=512, num_parts=3)

    # 1) Main small test: f32 activations, H*W exactly one 128-lane tile.
    N, IN_C, H, W = 2, 1024, 8, 16
    x = jax.random.normal(kx, (N, IN_C, H, W), jnp.float32)
    out = jax.block_until_ready(seghead_fc_forward(x, params))
    assert out.shape == (N, 3, H, W), out.shape
    ref = seghead_fc_ref(x, params)
    err = _max_rel_err(out, ref)
    assert err < 2e-2, err   # bf16 MXU operands with f32 accumulation

    # 2) Ragged spatial extent (H*W not a multiple of the tile): exercises the
    #    edge-block path that replaced the wrapper-side jnp.pad.
    N2, H2, W2 = 1, 10, 20
    xr = jax.random.normal(kx2, (N2, IN_C, H2, W2), jnp.float32)
    out_r = jax.block_until_ready(seghead_fc_forward(xr, params))
    assert out_r.shape == (N2, 3, H2, W2), out_r.shape
    err_r = _max_rel_err(out_r, seghead_fc_ref(xr, params))
    assert err_r < 2e-2, err_r

    # 3) bf16 producer path: no wrapper-side cast, kernel consumes bf16 directly.
    x_bf16 = x.astype(jnp.bfloat16)
    out_b = jax.block_until_ready(seghead_fc_forward(x_bf16, params))
    err_b = _max_rel_err(out_b, seghead_fc_ref(x_bf16, params))
    assert err_b < 2e-2, err_b

    print("KERNEL_OK")
</pallas_src>

<mosaic_0001>
module attributes {stable_mosaic.version = 11 : i64} {
  func.func @_seghead_kernel(%arg0: i32, %arg1: i32, %arg2: memref<1x1024x128xf32, #tpu.memory_space<vmem>>, %arg3: memref<512x1024xbf16, #tpu.memory_space<vmem>>, %arg4: memref<512x1xf32, #tpu.memory_space<vmem>>, %arg5: memref<16x512xbf16, #tpu.memory_space<vmem>>, %arg6: memref<16x1xf32, #tpu.memory_space<vmem>>, %arg7: memref<1x16x128xf32, #tpu.memory_space<vmem>>) attributes {dimension_semantics = [#tpu.dimension_semantics<parallel>, #tpu.dimension_semantics<parallel>], iteration_bounds = array<i64: 2, 1>, scalar_prefetch = 0 : i64, scratch_operands = 0 : i64, tpu.core_type = #tpu.core_type<tc>, window_params = [{transform_indices = @transform_0, window_bounds = array<i64: 1, 1024, 128>}, {pipeline_mode = #tpu.pipeline_mode<synchronous>, transform_indices = @transform_1, window_bounds = array<i64: 512, 1024>}, {pipeline_mode = #tpu.pipeline_mode<synchronous>, transform_indices = @transform_2, window_bounds = array<i64: 512, 1>}, {pipeline_mode = #tpu.pipeline_mode<synchronous>, transform_indices = @transform_3, window_bounds = array<i64: 16, 512>}, {pipeline_mode = #tpu.pipeline_mode<synchronous>, transform_indices = @transform_4, window_bounds = array<i64: 16, 1>}, {transform_indices = @transform_5, window_bounds = array<i64: 1, 16, 128>}]} {
    %c0 = arith.constant 0 : index
    %c0_0 = arith.constant 0 : index
    %c0_1 = arith.constant 0 : index
    %0 = vector.load %arg2[%c0, %c0_0, %c0_1] : memref<1x1024x128xf32, #tpu.memory_space<vmem>>, vector<1x1024x128xf32>
    %1 = vector.shape_cast %0 : vector<1x1024x128xf32> to vector<1024x128xf32>
    %2 = arith.truncf %1 : vector<1024x128xf32> to vector<1024x128xbf16>
    %c0_2 = arith.constant 0 : index
    %c0_3 = arith.constant 0 : index
    %3 = vector.load %arg3[%c0_2, %c0_3] : memref<512x1024xbf16, #tpu.memory_space<vmem>>, vector<512x1024xbf16>
    %cst = arith.constant dense<0.000000e+00> : vector<512x128xf32>
    %4 = tpu.matmul %3, %2, %cst {dimension_numbers = #tpu.dot_dimension_numbers<[1], [0], [0], [1], [0, 0, 1, 1], [], []>} : vector<512x1024xbf16>, vector<1024x128xbf16>, vector<512x128xf32> -> vector<512x128xf32>
    %c0_4 = arith.constant 0 : index
    %c0_5 = arith.constant 0 : index
    %5 = vector.load %arg4[%c0_4, %c0_5] : memref<512x1xf32, #tpu.memory_space<vmem>>, vector<512x1xf32>
    %6 = vector.broadcast %5 : vector<512x1xf32> to vector<512x128xf32>
    %7 = arith.addf %4, %6 : vector<512x128xf32>
    %cst_6 = arith.constant 0.000000e+00 : f32
    %8 = vector.broadcast %cst_6 : f32 to vector<512x128xf32>
    %9 = arith.maximumf %7, %8 : vector<512x128xf32>
    %c0_7 = arith.constant 0 : index
    %c0_8 = arith.constant 0 : index
    %10 = vector.load %arg5[%c0_7, %c0_8] : memref<16x512xbf16, #tpu.memory_space<vmem>>, vector<16x512xbf16>
    %11 = arith.truncf %9 : vector<512x128xf32> to vector<512x128xbf16>
    %cst_9 = arith.constant dense<0.000000e+00> : vector<16x128xf32>
    %12 = tpu.matmul %10, %11, %cst_9 {dimension_numbers = #tpu.dot_dimension_numbers<[1], [0], [0], [1], [0, 0, 1, 1], [], []>} : vector<16x512xbf16>, vector<512x128xbf16>, vector<16x128xf32> -> vector<16x128xf32>
    %c0_10 = arith.constant 0 : index
    %c0_11 = arith.constant 0 : index
    %13 = vector.load %arg6[%c0_10, %c0_11] : memref<16x1xf32, #tpu.memory_space<vmem>>, vector<16x1xf32>
    %14 = vector.broadcast %13 : vector<16x1xf32> to vector<16x128xf32>
    %15 = arith.addf %12, %14 : vector<16x128xf32>
    %c0_12 = arith.constant 0 : index
    %c0_13 = arith.constant 0 : index
    %c0_14 = arith.constant 0 : index
    %16 = vector.load %arg7[%c0_12, %c0_13, %c0_14] : memref<1x16x128xf32, #tpu.memory_space<vmem>>, vector<1x16x128xf32>
    %17 = vector.shape_cast %16 : vector<1x16x128xf32> to vector<16x128xf32>
    %18 = vector.shape_cast %15 : vector<16x128xf32> to vector<1x16x128xf32>
    tpu.vector_store %arg7[%c0_12, %c0_13, %c0_14], %18 {strides = array<i32>} : memref<1x16x128xf32, #tpu.memory_space<vmem>>, vector<1x16x128xf32>,
    return
  }
  func.func @transform_0(%arg0: i32, %arg1: i32) -> (i32, i32, i32) {
    %c0_i32 = arith.constant 0 : i32
    %c0_i32_0 = arith.constant 0 : i32
    return %arg0, %c0_i32, %arg1 : i32, i32, i32
  }
  func.func @transform_1(%arg0: i32, %arg1: i32) -> (i32, i32) {
    %c0_i32 = arith.constant 0 : i32
    %c0_i32_0 = arith.constant 0 : i32
    %c0_i32_1 = arith.constant 0 : i32
    return %c0_i32, %c0_i32_0 : i32, i32
  }
  func.func @transform_2(%arg0: i32, %arg1: i32) -> (i32, i32) {
    %c0_i32 = arith.constant 0 : i32
    %c0_i32_0 = arith.constant 0 : i32
    %c0_i32_1 = arith.constant 0 : i32
    return %c0_i32, %c0_i32_0 : i32, i32
  }
  func.func @transform_3(%arg0: i32, %arg1: i32) -> (i32, i32) {
    %c0_i32 = arith.constant 0 : i32
    %c0_i32_0 = arith.constant 0 : i32
    %c0_i32_1 = arith.constant 0 : i32
    return %c0_i32, %c0_i32_0 : i32, i32
  }
  func.func @transform_4(%arg0: i32, %arg1: i32) -> (i32, i32) {
    %c0_i32 = arith.constant 0 : i32
    %c0_i32_0 = arith.constant 0 : i32
    %c0_i32_1 = arith.constant 0 : i32
    return %c0_i32, %c0_i32_0 : i32, i32
  }
  func.func @transform_5(%arg0: i32, %arg1: i32) -> (i32, i32, i32) {
    %c0_i32 = arith.constant 0 : i32
    %c0_i32_0 = arith.constant 0 : i32
    return %arg0, %c0_i32, %arg1 : i32, i32, i32
  }
}

</mosaic_0001>

<bundles_post_ra>
// kernel: tpu_custom_call.1
= control target key start
LH: loop header
LB: loop body
LE: loop exit
PB: predicated region body
PF: predicated region fallthrough
CT: control target
= control target key end

     0   :  { %10 = vsyncpa [#allocation3], 0  ;;  %s6028_s0 = inlined_call_operand.hbm [shape: f32[2,1024,128], index: 0, kind: input, shape index: {}]   ;;  %s6029_s1 = inlined_call_operand.hbm [shape: bf16[512,1024], index: 1, kind: input, shape index: {}]   ;;  %s6030_s2 = inlined_call_operand.vmem [shape: f32[512,1], index: 2, kind: input, shape index: {}]   ;;  %s6031_s3 = inlined_call_operand.vmem [shape: bf16[16,512], index: 3, kind: input, shape index: {}]   ;;  %s6032_s4 = inlined_call_operand.vmem [shape: f32[16,1], index: 4, kind: input, shape index: {}]   ;;  %s6033_s5 = inlined_call_operand.hbm [shape: f32[2,16,128], index: 5, kind: output, shape index: {}]  }
   0x1   :  { %12 = vsyncpa [#allocation3 + $0x1], 0 }
   0x2   :  { %13 = vsyncpa [#allocation6], 0 }
   0x3   :  { %14 = vsyncpa [#allocation4], 0 }
   0x4   :  { %16 = vsyncpa [#allocation4 + $0x1], 0  ;;  %s4825_s18 = smov 0   ;;  %s4827_s19 = smov 0  }
   0x5   :  { %s4829_s20 = smov 0   ;;  %s4831_s21 = smov 0  }
   0x6   :  { %s4833_s22 = smov 0   ;;  %s4835_s23 = smov 0  }
   0x7 LB: > { %s3870_s24 = sadd.s32 4294967295, %s4783_s23   ;;  %s3871_s25 = sadd.s32 4294967294, %s4783_s23   ;;  %s4783_s23 = sphi %s4835_s23, %s22_s23   ;;  %s4779_s22 = sphi %s4833_s22, %s6153_s22   ;;  %s4775_s21 = sphi %s4831_s21, %s6152_s21   ;;  %s4771_s20 = sphi %s4829_s20, %s6151_s20   ;;  %s4767_s19 = sphi %s4827_s19, %s6150_s19   ;;  %s4763_s18 = sphi %s4825_s18, %s6149_s18  }
   0x8   : > { %p56_p0 = scmp.ne.s32.totalorder %s4767_s19, %s4763_s18  ;;  %p4859_p1 = scmp.eq.s32.totalorder %s3870_s24, 0 }
   0x9   : > { %p4863_p2 = scmp.eq.s32.totalorder %s3870_s24, 1  ;;  %p172_p3 = scmp.eq.s32.totalorder %s3871_s25, 1 }
   0xa   : > { %s6038_s26 = scalar_select %p4859_p1, 1, 0 }
   0xb   : > { %s6039_s27 = scalar_select %p4863_p2, 1, 0 }
   0xc   : > { %p4869_p4 = por %p4859_p1, %p56_p0  ;;  %p3872_p5 = scmp.ge.s32.totalorder %s4783_s23, 1 }
   0xd   : > { %p4874_p6 = por %p172_p3, %p56_p0  ;;  %p179_p7 = scmp.lt.s32.totalorder %s4783_s23, 3 }
   0xe   : > { %s6040_s28 = scalar_select %p4869_p4, 1, 0 }
   0xf   : > { %s6041_s29 = scalar_select %p4874_p6, 1, 0 }
  0x10   : > { %p4879_p8 = pnand %p3872_p5, %p179_p7  ;;  %s4785_s6 = smov [#allocation5]  }
  0x11   : > { %s191_s7 = sshll.u32 %s4785_s6, 4  ;;  %s34_s9 = sadd.s32 1, %s4779_s22  ;;  %s192_s7 = int_to_ptr.vmem [resolvable:$true] %s191_s7 }
  0x12   : > { %s6042_s30 = scalar_select %p4879_p8, 1, 0 }
  0x13   : > { %p4559_p9 = pneg %p4879_p8  ;;  %s4639_s12 = scalar_lea.hbm %s6029_s1, 32768 }
  0x14   : > { %p4640_p12 = scmp.ne.s32.totalorder %s6029_s1, %s4639_s12  ;;  %p4646_p5 = scmp.lt.u32.totalorder %s4639_s12, %s6029_s1 }
  0x15   : > { %p4888_p11 = pnand %p4559_p9, %p4859_p1 }
  0x17   : > { %p4641_p13 = pneg %p4888_p11 }
  0x19   : > { %p4642_p0 = pnand %p4641_p13, %p4640_p12 }
  0x1b   : > { %p4643_p3 = pneg %p4642_p0 }
  0x1d   : > { %p4648_p7 = pnand %p4646_p5, %p4643_p3 }
  0x1f   : > { %4651 = shalt.err (!%p4648_p7)
}
  0x20   : > { %s4652_s17 = scalar_lea.vmem %s192_s7, 32768  ;;  %p4660_p1 = scmp.lt.s32.totalorder %s192_s7, %s192_s7 }
  0x21   : > { %p4653_p9 = scmp.ne.s32.totalorder %s192_s7, %s4652_s17  ;;  %p4661_p4 = scmp.lt.s32.totalorder %s4652_s17, %s4652_s17 }
  0x23   : > { %p4655_p10 = pnand %p4653_p9, %p4641_p13  ;;  %p4662_p8 = por %p4661_p4, %p4660_p1 }
  0x25   : > { %p4656_p6 = pneg %p4655_p10 }
  0x27   : > { %p4663_p2 = pnand %p4662_p8, %p4656_p6 }
  0x29   : > { %4666 = shalt.err (!%p4663_p2)
}
  0x2a   : > { %s4786_s24 = smov 512   ;;  %s4787_s25 = smov 32  }
  0x2b   : > { %4562 = dma.hbm_to_vmem [thread:$0]  (!%p4888_p11), %s6029_s1, 32768, %s192_s7, [#allocation6], %s4786_s24, %s4786_s24, %s4787_s25  }
  0x2c   : > { %p36_p1 = scmp.ge.s32.totalorder %s34_s9, 2  ;;  %s43_s11 = sadd.s32 1, %s4771_s20 }
  0x2d   : > { %p50_p2 = scmp.ne.s32.totalorder %s4771_s20, %s4767_s19  ;;  %p51_p4 = scmp.eq.s32.totalorder %s4783_s23, 0 }
  0x2e   : > { %s6155_s9 = smov (%p36_p1, %s34_s9), 0  ;;  %p6045_p8 = scmp.ne.s32.totalorder %s6039_s27, 0 }
  0x2f   : > { %p4915_p6 = por %p51_p4, %p50_p2  ;;  %s38_s8 = ssub.s32 %s4779_s22, %s6155_s9 }
  0x30   : > { %p4921_p10 = por %p6045_p8, %p50_p2  ;;  %p4572_p12 = scmp.lt.s32.totalorder %s4783_s23, 2 }
  0x31   : > { %p41_p11 = scmp.eq.s32.totalorder %s38_s8, 0  ;;  %s214_s7 = sand.u32 1, %s4771_s20  }
  0x32   : > { %s3875_s14 = sshll.u32 %s214_s7, 10  ;;  %s4147_s16 = sshll.u32 %s4779_s22, 14 }
  0x33   : > { %s4930_s15 = scalar_select %p41_p11, %s4771_s20, %s43_s11  }
  0x34   : > { %s4936_s25 = scalar_lea.hbm %s6028_s0, %s4147_s16  ;;  %s218_s27 = scalar_lea.vmem [#allocation2], %s3875_s14 }
  0x35   : > { %s226_s6 = sshll.u32 %s218_s27, 4  ;;  %p4942_p13 = pnand %p4572_p12, %p4915_p6  ;;  %s4938_s6 = int_to_ptr.vmem [resolvable:$true] %s226_s6 }
  0x36   : > { %s4946_s11 = scalar_lea.sflag [#allocation3], %s214_s7  ;;  %s4667_s8 = scalar_lea.hbm %s4936_s25, 16384 }
  0x37   : > { %p4668_p0 = scmp.ne.s32.totalorder %s4936_s25, %s4667_s8  ;;  %p4669_p3 = pneg %p4942_p13 }
  0x38   : > { %s4672_s12 = scalar_lea.hbm %s6028_s0, 32768  ;;  %p4673_p9 = scmp.lt.u32.totalorder %s4936_s25, %s6028_s0 }
  0x39   : > { %p4670_p5 = pnand %p4669_p3, %p4668_p0  ;;  %p4674_p1 = scmp.lt.u32.totalorder %s4672_s12, %s4667_s8 }
  0x3a   : > { %p4676_p4 = scmp.lt.u32.totalorder %s4667_s8, %s4936_s25 }
  0x3b   : > { %p4671_p7 = pneg %p4670_p5  ;;  %p4675_p2 = por %p4674_p1, %p4673_p9 }
  0x3d   : > { %p4677_p6 = por %p4676_p4, %p4675_p2 }
  0x3f   : > { %p4678_p8 = pnand %p4677_p6, %p4671_p7 }
  0x41   : > { %4681 = shalt.err (!%p4678_p8)
}
  0x42   : > { %s4682_s7 = scalar_lea.vmem %s4938_s6, 16384  ;;  %s4788_s27 = smov [#allocation2]  }
  0x43   : > { %p4683_p12 = scmp.ne.s32.totalorder %s4938_s6, %s4682_s7  ;;  %s4687_s14 = sshll.u32 %s4788_s27, 4  ;;  %s4688_s14 = int_to_ptr.vmem [resolvable:$false] %s4687_s14 }
  0x44   : > { %s4689_s16 = scalar_lea.vmem %s4688_s14, 32768  ;;  %p4690_p5 = scmp.lt.s32.totalorder %s4938_s6, %s4688_s14 }
  0x45   : > { %p4685_p11 = pnand %p4683_p12, %p4669_p3  ;;  %p4691_p9 = scmp.lt.s32.totalorder %s4689_s16, %s4682_s7 }
  0x47   : > { %p4686_p0 = pneg %p4685_p11  ;;  %p4692_p1 = por %p4691_p9, %p4690_p5 }
  0x49   : > { %p4693_p2 = pnand %p4692_p1, %p4686_p0 }
  0x4b   : > { %4696 = shalt.err (!%p4693_p2)
}
  0x4c   : > { %s4789_s8 = smov 128   ;;  %s4790_s12 = smov 8  }
  0x4d   : > { %4566 = dma.hbm_to_vmem [thread:$0]  (!%p4942_p13), %s4936_s25, 16384, %s4938_s6, %s4946_s11, %s4789_s8, %s4789_s8, %s4790_s12  }
  0x4e   : > { %p6048_p3 = scmp.ne.s32.totalorder %s6042_s30, 0 }
  0x50   : > { %238 = sbr.rel (%p6048_p3) target bundleno = 1197 (0x4ad), region = 40 }
  0x57   : > { %s4977_s17 = sand.u32 1, %s4767_s19   ;;  %p6049_p7 = scmp.ne.s32.totalorder %s6040_s28, 0 }
  0x58   : > { %s3879_s24 = sshll.u32 %s4977_s17, 10  ;;  %s241_s7 = scalar_lea.sflag [#allocation3], %s4977_s17 }
  0x59   : > { %s4981_s27 = scalar_lea.vmem [#allocation2], %s3879_s24 }
  0x5a   : > { %4750 = dma.done.wait (%p6049_p7), %s241_s7, 16384  }
  0x5b   : > { %4752 = vsyncadd (%p6049_p7), %s241_s7, 4294950912  ;;  %p6050_p13 = scmp.ne.s32.totalorder %s6038_s26, 0 }
  0x5d   : > { %4754 = dma.done.wait (%p6050_p13), [#allocation6], 32768  }
  0x5e   : > { %4756 = vsyncadd (%p6050_p13), [#allocation6], 4294934528  ;;  %v4791_v0 = vmov 0   ;;  %v308_v1 = vld [vmem:[%s4981_s27 + $0x100] sm:$0xff]  ;;  %v309_v2 = vld [vmem:[%s4981_s27 + $0x108] sm:$0xff]  ;;  %s3881_s6 = sshll.u32 %s4977_s17, 4 }
  0x5f   : > { %2677 = vmatprep.subr.bf16.mxu0 %v4791_v0  ;;  %2388 = vmatprep.subr.bf16.mxu1 %v4791_v0  ;;  %v310_v3 = vld [vmem:[%s4981_s27 + $0x110] sm:$0xff]  ;;  %v420_v4 = vpack.c.bf16 %v309_v2, %v308_v1  ;;  %v311_v5 = vld [vmem:[%s4981_s27 + $0x118] sm:$0xff]  ;;  %v312_v7 = vld [vmem:[%s4981_s27 + $0x120] sm:$0xff]  ;;  %s274_s10 = scalar_lea.vmem [#allocation7], %s3881_s6  ;;  %s4148_s14 = sshll.u32 %s4775_s21, 8 }
  0x60   : > { %4632 = vset.pattern.permute.xlu1 %v4791_v0  ;;  %4631 = vset.pattern.permute.xlu0 %v4791_v0  ;;  %v421_v6 = vpack.c.bf16 %v311_v5, %v310_v3  ;;  %v313_v8 = vld [vmem:[%s4981_s27 + $0x128] sm:$0xff]  ;;  %v276_v9 = vld [vmem:[%s4981_s27] sm:$0xff]  ;;  %v278_v12 = vld [vmem:[%s4981_s27 + $0x10] sm:$0xff]  ;;  %s3775_s11 = sshll.u32 %s274_s10, 4  ;;  %s5979_s12 = scalar_lea.hbm %s6033_s5, %s4148_s14  ;;  %s5974_s11 = int_to_ptr.vmem [resolvable:$true] %s3775_s11 }
  0x61   : > { %2678 = vmatpush1.bf16.msra.mxu0 %v420_v4  ;;  %v277_v10 = vld [vmem:[%s4981_s27 + $0x8] sm:$0xff]  ;;  %v279_v13 = vld [vmem:[%s4981_s27 + $0x18] sm:$0xff]  ;;  %v422_v14 = vpack.c.bf16 %v313_v8, %v312_v7  ;;  %v314_v15 = vld [vmem:[%s4981_s27 + $0x130] sm:$0xff]  ;;  %s3761_s24 = scalar_lea.sflag [#allocation4], %s4977_s17  ;;  %s4697_s21 = scalar_lea.vmem %s5974_s11, 256 }
  0x62   : > { %2679 = vmatprep.subr.bf16.mxu0 %v4791_v0  ;;  %v404_v11 = vpack.c.bf16 %v277_v10, %v276_v9  ;;  %v315_v16 = vld [vmem:[%s4981_s27 + $0x138] sm:$0xff]  ;;  %v405_v17 = vpack.c.bf16 %v279_v13, %v278_v12  ;;  %v280_v18 = vld [vmem:[%s4981_s27 + $0x20] sm:$0xff]  ;;  %v281_v19 = vld [vmem:[%s4981_s27 + $0x28] sm:$0xff]  ;;  %p4698_p4 = scmp.ne.s32.totalorder %s5974_s11, %s4697_s21 }
  0x63   : > { %v423_v20 = vpack.c.bf16 %v315_v16, %v314_v15  ;;  %v316_v21 = vld [vmem:[%s4981_s27 + $0x140] sm:$0xff]  ;;  %v317_v22 = vld [vmem:[%s4981_s27 + $0x148] sm:$0xff]  ;;  %v406_v23 = vpack.c.bf16 %v281_v19, %v280_v18  ;;  %v282_v24 = vld [vmem:[%s4981_s27 + $0x30] sm:$0xff] }
  0x64   : > { %2389 = vmatpush1.bf16.msra.mxu1 %v404_v11  ;;  %v283_v25 = vld [vmem:[%s4981_s27 + $0x38] sm:$0xff]  ;;  %v424_v26 = vpack.c.bf16 %v317_v22, %v316_v21  ;;  %v318_v27 = vld [vmem:[%s4981_s27 + $0x150] sm:$0xff]  ;;  %v284_v30 = vld [vmem:[%s4981_s27 + $0x40] sm:$0xff]  ;;  %p4699_p6 = pnand %p4698_p4, %p4921_p10 }
  0x65   : > { %2680 = vmatpush1.bf16.msra.mxu0 %v421_v6  ;;  %2390 = vmatprep.subr.bf16.mxu1 %v4791_v0  ;;  %v319_v28 = vld [vmem:[%s4981_s27 + $0x158] sm:$0xff]  ;;  %v407_v29 = vpack.c.bf16 %v283_v25, %v282_v24  ;;  %v285_v31 = vld [vmem:[%s4981_s27 + $0x48] sm:$0xff]  ;;  %v320_v36 = vld [vmem:[%s4981_s27 + $0x160] sm:$0xff] }
  0x66   : > { %2681 = vmatprep.subr.bf16.mxu0 %v4791_v0  ;;  %v5024_v32 = vld [vmem:[#allocation5 + $0x8] sm:$0xff]  ;;  %v425_v35 = vpack.c.bf16 %v319_v28, %v318_v27  ;;  %v408_v38 = vpack.c.bf16 %v285_v31, %v284_v30  ;;  %v286_v39 = vld [vmem:[%s4981_s27 + $0x50] sm:$0xff]  ;;  %v287_v40 = vld [vmem:[%s4981_s27 + $0x58] sm:$0xff]  ;;  %p4700_p8 = pneg %p4699_p6 }
  0x67   : > { %v5026_v33 = vld [vmem:[#allocation5 + $0x28] sm:$0xff]  ;;  %v322_v42 = vld [vmem:[%s4981_s27 + $0x170] sm:$0xff]  ;;  %v323_v43 = vld [vmem:[%s4981_s27 + $0x178] sm:$0xff]  ;;  %v409_v44 = vpack.c.bf16 %v287_v40, %v286_v39 }
  0x68   : > { %2391 = vmatpush1.bf16.msra.mxu1 %v405_v17  ;;  %v3885_v34 = vcombine.high %v5024_v32, %v5026_v33  ;;  %v321_v37 = vld [vmem:[%s4981_s27 + $0x168] sm:$0xff]  ;;  %v5039_v45 = vld [vmem:[#allocation5] sm:$0xff]  ;;  %v427_v50 = vpack.c.bf16 %v323_v43, %v322_v42  ;;  %v290_v54 = vld [vmem:[%s4981_s27 + $0x70] sm:$0xff]  ;;  %v3884_v43 = vcombine.low %v5024_v32, %v5026_v33 }
  0x69   : > { %2682 = vmatpush1.bf16.msra.mxu0 %v422_v14  ;;  %2392 = vmatprep.subr.bf16.mxu1 %v4791_v0  ;;  %v426_v41 = vpack.c.bf16 %v321_v37, %v320_v36  ;;  %v5041_v46 = vld [vmem:[#allocation5 + $0x20] sm:$0xff]  ;;  %v289_v48 = vld [vmem:[%s4981_s27 + $0x68] sm:$0xff]  ;;  %v291_v55 = vld [vmem:[%s4981_s27 + $0x78] sm:$0xff] }
  0x6a   : > { %2683 = vmatprep.subr.bf16.mxu0 %v4791_v0  ;;  %2709 = vmatprep.mubr.bf16.mxu0 %v3885_v34  ;;  %v288_v47 = vld [vmem:[%s4981_s27 + $0x60] sm:$0xff]  ;;  %v3883_v49 = vcombine.high %v5039_v45, %v5041_v46  ;;  %v325_v52 = vld [vmem:[%s4981_s27 + $0x188] sm:$0xff]  ;;  %v326_v57 = vld [vmem:[%s4981_s27 + $0x190] sm:$0xff]  ;;  %v411_v59 = vpack.c.bf16 %v291_v55, %v290_v54 }
  0x6b   : > { %v324_v51 = vld [vmem:[%s4981_s27 + $0x180] sm:$0xff]  ;;  %v410_v53 = vpack.c.bf16 %v289_v48, %v288_v47  ;;  %v327_v58 = vld [vmem:[%s4981_s27 + $0x198] sm:$0xff]  ;;  %v293_v61 = vld [vmem:[%s4981_s27 + $0x88] sm:$0xff] }
  0x6c   : > { %2393 = vmatpush1.bf16.msra.mxu1 %v406_v23  ;;  %2420 = vmatprep.mubr.bf16.mxu1 %v3883_v49  ;;  %v428_v56 = vpack.c.bf16 %v325_v52, %v324_v51  ;;  %v292_v60 = vld [vmem:[%s4981_s27 + $0x80] sm:$0xff]  ;;  %v429_v62 = vpack.c.bf16 %v327_v58, %v326_v57  ;;  %v329_v1 = vld [vmem:[%s4981_s27 + $0x1a8] sm:$0xff]  ;;  %v294_v3 = vld [vmem:[%s4981_s27 + $0x90] sm:$0xff] }
  0x6d   : > { %2684 = vmatpush1.bf16.msra.mxu0 %v423_v20  ;;  %2394 = vmatprep.subr.bf16.mxu1 %v4791_v0  ;;  %v328_v63 = vld [vmem:[%s4981_s27 + $0x1a0] sm:$0xff]  ;;  %v412_v2 = vpack.c.bf16 %v293_v61, %v292_v60  ;;  %v295_v4 = vld [vmem:[%s4981_s27 + $0x98] sm:$0xff]  ;;  %v330_v6 = vld [vmem:[%s4981_s27 + $0x1b0] sm:$0xff] }
  0x6e   : > { %2685 = vmatprep.subr.bf16.mxu0 %v4791_v0  ;;  %v430_v5 = vpack.c.bf16 %v329_v1, %v328_v63  ;;  %v331_v7 = vld [vmem:[%s4981_s27 + $0x1b8] sm:$0xff]  ;;  %v413_v8 = vpack.c.bf16 %v295_v4, %v294_v3  ;;  %v296_v9 = vld [vmem:[%s4981_s27 + $0xa0] sm:$0xff]  ;;  %v297_v10 = vld [vmem:[%s4981_s27 + $0xa8] sm:$0xff] }
  0x6f   : > { %v431_v11 = vpack.c.bf16 %v331_v7, %v330_v6  ;;  %v332_v12 = vld [vmem:[%s4981_s27 + $0x1c0] sm:$0xff]  ;;  %v333_v13 = vld [vmem:[%s4981_s27 + $0x1c8] sm:$0xff]  ;;  %v414_v14 = vpack.c.bf16 %v297_v10, %v296_v9  ;;  %v298_v15 = vld [vmem:[%s4981_s27 + $0xb0] sm:$0xff] }
  0x70   : > { %2395 = vmatpush1.bf16.msra.mxu1 %v407_v29  ;;  %v299_v16 = vld [vmem:[%s4981_s27 + $0xb8] sm:$0xff]  ;;  %v432_v17 = vpack.c.bf16 %v333_v13, %v332_v12  ;;  %v334_v18 = vld [vmem:[%s4981_s27 + $0x1d0] sm:$0xff]  ;;  %v300_v21 = vld [vmem:[%s4981_s27 + $0xc0] sm:$0xff] }
  0x71   : > { %2686 = vmatpush1.bf16.msra.mxu0 %v424_v26  ;;  %2396 = vmatprep.subr.bf16.mxu1 %v4791_v0  ;;  %v335_v19 = vld [vmem:[%s4981_s27 + $0x1d8] sm:$0xff]  ;;  %v415_v20 = vpack.c.bf16 %v299_v16, %v298_v15  ;;  %v301_v22 = vld [vmem:[%s4981_s27 + $0xc8] sm:$0xff]  ;;  %v336_v24 = vld [vmem:[%s4981_s27 + $0x1e0] sm:$0xff] }
  0x72   : > { %2687 = vmatprep.subr.bf16.mxu0 %v4791_v0  ;;  %v433_v23 = vpack.c.bf16 %v335_v19, %v334_v18  ;;  %v337_v25 = vld [vmem:[%s4981_s27 + $0x1e8] sm:$0xff]  ;;  %v416_v26 = vpack.c.bf16 %v301_v22, %v300_v21  ;;  %v302_v27 = vld [vmem:[%s4981_s27 + $0xd0] sm:$0xff]  ;;  %v303_v28 = vld [vmem:[%s4981_s27 + $0xd8] sm:$0xff] }
  0x73   : > { %v434_v29 = vpack.c.bf16 %v337_v25, %v336_v24  ;;  %v338_v30 = vld [vmem:[%s4981_s27 + $0x1f0] sm:$0xff]  ;;  %v339_v31 = vld [vmem:[%s4981_s27 + $0x1f8] sm:$0xff]  ;;  %v417_v34 = vpack.c.bf16 %v303_v28, %v302_v27  ;;  %v305_v36 = vld [vmem:[%s4981_s27 + $0xe8] sm:$0xff] }
  0x74   : > { %2397 = vmatpush1.bf16.msra.mxu1 %v408_v38  ;;  %v435_v37 = vpack.c.bf16 %v339_v31, %v338_v30  ;;  %v477_v38 = vld [vmem:[#allocation5 + $0x48] sm:$0xff]  ;;  %v307_v42 = vld [vmem:[%s4981_s27 + $0xf8] sm:$0xff]  ;;  %v476_v48 = vld [vmem:[#allocation5 + $0x40] sm:$0xff] }
  0x75   : > { %2688 = vmatpush1.bf16.msra.mxu0 %v425_v35  ;;  %2398 = vmatprep.subr.bf16.mxu1 %v4791_v0  ;;  %v304_v35 = vld [vmem:[%s4981_s27 + $0xe0] sm:$0xff]  ;;  %v481_v39 = vld [vmem:[#allocation5 + $0x68] sm:$0xff] }
  0x76   : > { %2689 = vmatprep.subr.bf16.mxu0 %v4791_v0  ;;  %v418_v40 = vpack.c.bf16 %v305_v36, %v304_v35  ;;  %v480_v49 = vld [vmem:[#allocation5 + $0x60] sm:$0xff]  ;;  %v485_v51 = vld [vmem:[#allocation5 + $0x88] sm:$0xff]  ;;  %v3892_v32 = vcombine.low %v477_v38, %v481_v39 }
  0x77   : > { %v489_v52 = vld [vmem:[#allocation5 + $0xa8] sm:$0xff]  ;;  %v484_v54 = vld [vmem:[#allocation5 + $0x80] sm:$0xff] }
  0x78   : > { %2399 = vmatpush1.bf16.msra.mxu1 %v409_v44  ;;  %v3893_v44 = vcombine.high %v477_v38, %v481_v39  ;;  %v3901_v33 = vcombine.high %v485_v51, %v489_v52  ;;  %v488_v55 = vld [vmem:[#allocation5 + $0xa0] sm:$0xff]  ;;  %v493_v57 = vld [vmem:[#allocation5 + $0xc8] sm:$0xff]  ;;  %v3900_v60 = vcombine.low %v485_v51, %v489_v52  ;;  %v742_v51 = vld [vmem:[%s6030_s2 + $0x90] sm:$0xff] }
  0x79   : > { %2690 = vmatpush1.bf16.msra.mxu0 %v426_v41  ;;  %2400 = vmatprep.subr.bf16.mxu1 %v4791_v0  ;;  %v306_v41 = vld [vmem:[%s4981_s27 + $0xf0] sm:$0xff]  ;;  %v497_v58 = vld [vmem:[#allocation5 + $0xe8] sm:$0xff]  ;;  %v496_v61 = vld [vmem:[#allocation5 + $0xe0] sm:$0xff] }
  0x7a   : > { %2691 = vmatprep.subr.bf16.mxu0 %v4791_v0  ;;  %v419_v47 = vpack.c.bf16 %v307_v42, %v306_v41  ;;  %v501_v63 = vld [vmem:[#allocation5 + $0x108] sm:$0xff]  ;;  %v3908_v3 = vcombine.low %v493_v57, %v497_v58  ;;  %v504_v6 = vld [vmem:[#allocation5 + $0x120] sm:$0xff]  ;;  %v743_v52 = vld [vmem:[%s6030_s2 + $0x98] sm:$0xff] }
  0x7b   : > { %v505_v1 = vld [vmem:[#allocation5 + $0x128] sm:$0xff]  ;;  %v508_v13 = vld [vmem:[#allocation5 + $0x140] sm:$0xff] }
  0x7c   : > { %2401 = vmatpush1.bf16.msra.mxu1 %v410_v53  ;;  %v3891_v53 = vcombine.high %v476_v48, %v480_v49  ;;  %v3917_v4 = vcombine.high %v501_v63, %v505_v1  ;;  %v513_v9 = vld [vmem:[#allocation5 + $0x168] sm:$0xff]  ;;  %v516_v21 = vld [vmem:[#allocation5 + $0x180] sm:$0xff] }
  0x7d   : > { %2692 = vmatpush1.bf16.msra.mxu0 %v427_v50  ;;  %2402 = vmatprep.subr.bf16.mxu1 %v4791_v0  ;;  %v3882_v50 = vcombine.low %v5039_v45, %v5041_v46  ;;  %v3909_v45 = vcombine.high %v493_v57, %v497_v58  ;;  %v492_v46 = vld [vmem:[#allocation5 + $0xc0] sm:$0xff]  ;;  %v517_v16 = vld [vmem:[#allocation5 + $0x188] sm:$0xff]  ;;  %v726_v58 = vld [vmem:[%s6030_s2 + $0x10] sm:$0xff] }
  0x7e   : > { %2693 = vmatprep.subr.bf16.mxu0 %v4791_v0  ;;  %v3906_v7 = vcombine.low %v492_v46, %v496_v61  ;;  %v520_v22 = vld [vmem:[#allocation5 + $0x1a0] sm:$0xff]  ;;  %v525_v24 = vld [vmem:[#allocation5 + $0x1c8] sm:$0xff] }
  0x7f   : > { %v529_v25 = vld [vmem:[#allocation5 + $0x1e8] sm:$0xff]  ;;  %v528_v30 = vld [vmem:[#allocation5 + $0x1e0] sm:$0xff] }
  0x80   : > { %2403 = vmatpush1.bf16.msra.mxu1 %v411_v59  ;;  %v3899_v59 = vcombine.high %v484_v54, %v488_v55  ;;  %v3941_v28 = vcombine.high %v525_v24, %v529_v25  ;;  %v533_v31 = vld [vmem:[#allocation5 + $0x208] sm:$0xff]  ;;  %v724_v38 = vld [vmem:[%s6030_s2] sm:$0xff]  ;;  %v3940_v39 = vcombine.low %v525_v24, %v529_v25 }
  0x81   : > { %2694 = vmatpush1.bf16.msra.mxu0 %v428_v56  ;;  %2404 = vmatprep.subr.bf16.mxu1 %v4791_v0  ;;  %v3890_v56 = vcombine.low %v476_v48, %v480_v49  ;;  %v537_v35 = vld [vmem:[#allocation5 + $0x228] sm:$0xff]  ;;  %v532_v42 = vld [vmem:[#allocation5 + $0x200] sm:$0xff] }
  0x82   : > { %2695 = vmatprep.subr.bf16.mxu0 %v4791_v0  ;;  %790 = vperm.xlu1 %4632, %v724_v38   ;;  %v741_v41 = vld [vmem:[%s6030_s2 + $0x88] sm:$0xff]  ;;  %v5160_v24 = vld [vmem:[#allocation5 + $0x2c0] sm:$0xff] }
  0x83   : > { %v545_v49 = vld [vmem:[#allocation5 + $0x268] sm:$0xff]  ;;  %v348_v25 = vld [vmem:[%s4981_s27 + $0x240] sm:$0xff] }
  0x84   : > { %2405 = vmatpush1.bf16.msra.mxu1 %v412_v2  ;;  %v3907_v2 = vcombine.high %v492_v46, %v496_v61 }
  0x85   : > { %2696 = vmatpush1.bf16.msra.mxu0 %v429_v62  ;;  %2406 = vmatprep.subr.bf16.mxu1 %v4791_v0  ;;  %v3898_v62 = vcombine.low %v484_v54, %v488_v55  ;;  %v340_v54 = vld [vmem:[%s4981_s27 + $0x200] sm:$0xff]  ;;  %v341_v55 = vld [vmem:[%s4981_s27 + $0x208] sm:$0xff] }
  0x86   : > { %2697 = vmatprep.subr.bf16.mxu0 %v4791_v0  ;;  %v436_v57 = vpack.c.bf16 %v341_v55, %v340_v54  ;;  %v5196_v54 = vld [vmem:[#allocation5 + $0x368] sm:$0xff] }
  0x88   : > { %2407 = vmatpush1.bf16.msra.mxu1 %v413_v8  ;;  %v509_v8 = vld [vmem:[#allocation5 + $0x148] sm:$0xff] }
  0x89   : > { %2698 = vmatpush1.bf16.msra.mxu0 %v430_v5  ;;  %2408 = vmatprep.subr.bf16.mxu1 %v4791_v0  ;;  %v500_v5 = vld [vmem:[#allocation5 + $0x100] sm:$0xff]  ;;  %v3925_v12 = vcombine.high %v509_v8, %v513_v9  ;;  %v3924_v19 = vcombine.low %v509_v8, %v513_v9  ;;  %v345_v9 = vld [vmem:[%s4981_s27 + $0x228] sm:$0xff] }
  0x8a   : > { %2699 = vmatprep.subr.bf16.mxu0 %v4791_v0  ;;  %v3915_v10 = vcombine.high %v500_v5, %v504_v6  ;;  %v3914_v15 = vcombine.low %v500_v5, %v504_v6  ;;  %v548_v6 = vld [vmem:[#allocation5 + $0x280] sm:$0xff] }
  0x8b   : > { %v552_v8 = vld [vmem:[#allocation5 + $0x2a0] sm:$0xff] }
  0x8c   : > { %2409 = vmatpush1.bf16.msra.mxu1 %v414_v14  ;;  %v512_v14 = vld [vmem:[#allocation5 + $0x160] sm:$0xff] }
  0x8d   : > { %2700 = vmatpush1.bf16.msra.mxu0 %v431_v11  ;;  %2410 = vmatprep.subr.bf16.mxu1 %v4791_v0  ;;  %v3916_v11 = vcombine.low %v501_v63, %v505_v1  ;;  %v3923_v18 = vcombine.high %v508_v13, %v512_v14  ;;  %v553_v63 = vld [vmem:[#allocation5 + $0x2a8] sm:$0xff] }
  0x8e   : > { %2701 = vmatprep.subr.bf16.mxu0 %v4791_v0 }
  0x90   : > { %2411 = vmatpush1.bf16.msra.mxu1 %v415_v20 }
  0x91   : > { %2702 = vmatpush1.bf16.msra.mxu0 %v432_v17  ;;  %2412 = vmatprep.subr.bf16.mxu1 %v4791_v0  ;;  %v521_v17 = vld [vmem:[#allocation5 + $0x1a8] sm:$0xff] }
  0x92   : > { %2703 = vmatprep.subr.bf16.mxu0 %v4791_v0  ;;  %v3933_v20 = vcombine.high %v517_v16, %v521_v17  ;;  %v3932_v27 = vcombine.low %v517_v16, %v521_v17  ;;  %v557_v16 = vld [vmem:[#allocation5 + $0x2c8] sm:$0xff] }
  0x93   : > { %v561_v17 = vld [vmem:[#allocation5 + $0x2e8] sm:$0xff] }
  0x94   : > { %2413 = vmatpush1.bf16.msra.mxu1 %v416_v26  ;;  %v3931_v26 = vcombine.high %v516_v21, %v520_v22 }
  0x95   : > { %2704 = vmatpush1.bf16.msra.mxu0 %v433_v23  ;;  %2414 = vmatprep.subr.bf16.mxu1 %v4791_v0  ;;  %v3922_v23 = vcombine.low %v508_v13, %v512_v14  ;;  %v347_v13 = vld [vmem:[%s4981_s27 + $0x238] sm:$0xff]  ;;  %v729_v14 = vld [vmem:[%s6030_s2 + $0x28] sm:$0xff] }
  0x96   : > { %2705 = vmatprep.subr.bf16.mxu0 %v4791_v0 }
  0x98   : > { %2415 = vmatpush1.bf16.msra.mxu1 %v417_v34  ;;  %v3930_v34 = vcombine.low %v516_v21, %v520_v22  ;;  %v747_v22 = vld [vmem:[%s6030_s2 + $0xb8] sm:$0xff] }
  0x99   : > { %2706 = vmatpush1.bf16.msra.mxu0 %v434_v29  ;;  %2416 = vmatprep.subr.bf16.mxu1 %v4791_v0  ;;  %v524_v29 = vld [vmem:[#allocation5 + $0x1c0] sm:$0xff] }
  0x9a   : > { %2707 = vmatprep.subr.bf16.mxu0 %v4791_v0  ;;  %v3939_v36 = vcombine.high %v524_v29, %v528_v30  ;;  %v3938_v48 = vcombine.low %v524_v29, %v528_v30  ;;  %v350_v30 = vld [vmem:[%s4981_s27 + $0x250] sm:$0xff] }
  0x9c   : > { %2417 = vmatpush1.bf16.msra.mxu1 %v418_v40  ;;  %v3949_v40 = vcombine.high %v533_v31, %v537_v35 }
  0x9d   : > { %2708 = vmatpush1.bf16.msra.mxu0 %v435_v37  ;;  %2418 = vmatprep.subr.bf16.mxu1 %v4791_v0  ;;  %v740_v37 = vld [vmem:[%s6030_s2 + $0x80] sm:$0xff] }
  0x9e   : > { %2966 = vmatprep.subr.bf16.mxu0 %v4791_v0  ;;  %870 = vperm.xlu0 %4631, %v740_v37   ;;  %v569_v37 = vld [vmem:[#allocation5 + $0x328] sm:$0xff] }
  0xa0   : > { %2710 = vmatmul.mubr.bf16.vlgmr.msra.gmra.mrb[0].mxu0 %v3884_v43  ;;  %2419 = vmatpush1.bf16.msra.mxu1 %v419_v47  ;;  %v536_v43 = vld [vmem:[#allocation5 + $0x220] sm:$0xff]  ;;  %v541_v47 = vld [vmem:[#allocation5 + $0x248] sm:$0xff] }
  0xa1   : > { %2717 = vmatprep.mubr.bf16.mxu0 %v3893_v44  ;;  %4193 = vmatprep.subr.bf16.mxu1 %v4791_v0  ;;  %v725_v44 = vld [vmem:[%s6030_s2 + $0x8] sm:$0xff]  ;;  %v3946_v46 = vcombine.low %v532_v42, %v536_v43 }
  0xa2   : > { %875 = vperm.xlu0 %4631, %v741_v41   ;;  %795 = vperm.xlu1 %4632, %v725_v44   ;;  %v3972_v41 = vcombine.low %v557_v16, %v561_v17  ;;  %v5181_v44 = vld [vmem:[#allocation5 + $0x300] sm:$0xff] }
  0xa3   : > { %2421 = vmatmul.mubr.bf16.vlgmr.msra.gmra.mrb[0].mxu1 %v3882_v50  ;;  %v3947_v50 = vcombine.high %v532_v42, %v536_v43  ;;  %2967 = vmatpush1.bf16.msra.mxu0 %v436_v57  ;;  %v749_v42 = vld [vmem:[%s6030_s2 + $0xc8] sm:$0xff]  ;;  %v355_v57 = vld [vmem:[%s4981_s27 + $0x278] sm:$0xff] }
  0xa4   : > { %2428 = vmatprep.mubr.bf16.mxu1 %v3891_v53  ;;  %v3948_v53 = vcombine.low %v533_v31, %v537_v35  ;;  %2968 = vmatprep.subr.bf16.mxu0 %v4791_v0  ;;  %v351_v31 = vld [vmem:[%s4981_s27 + $0x258] sm:$0xff]  ;;  %v3962_v35 = vcombine.low %v548_v6, %v552_v8 }
  0xa6   : > { %880 = vperm.xlu0 %4631, %v742_v51   ;;  %885 = vperm.xlu1 %4632, %v743_v52   ;;  %v5191_v51 = vld [vmem:[#allocation5 + $0x348] sm:$0xff] }
  0xa8   : > { %2718 = vmatmul.mubr.bf16.gmra.mrb[4].mxu0 %v3892_v32  ;;  %v3957_v32 = vcombine.high %v541_v47, %v545_v49 }
  0xa9   : > { %2725 = vmatprep.mubr.bf16.mxu0 %v3901_v33  ;;  %v540_v33 = vld [vmem:[#allocation5 + $0x240] sm:$0xff] }
  0xaa   : > { %800 = vperm.xlu0 %4631, %v726_v58   ;;  %v733_v58 = vld [vmem:[%s6030_s2 + $0x48] sm:$0xff] }
  0xab   : > { %2429 = vmatmul.mubr.bf16.gmra.mrb[4].mxu1 %v3890_v56  ;;  %v544_v56 = vld [vmem:[#allocation5 + $0x260] sm:$0xff] }
  0xac   : > { %2436 = vmatprep.mubr.bf16.mxu1 %v3899_v59  ;;  %v727_v59 = vld [vmem:[%s6030_s2 + $0x18] sm:$0xff]  ;;  %v3955_v1 = vcombine.high %v540_v33, %v544_v56 }
  0xad   : > { %805 = vperm.xlu1 %4632, %v727_v59  }
  0xb0   : > { %2726 = vmatmul.mubr.bf16.gmra.mrb[8].mxu0 %v3900_v60  ;;  %v342_v60 = vld [vmem:[%s4981_s27 + $0x210] sm:$0xff] }
  0xb1   : > { %2733 = vmatprep.mubr.bf16.mxu0 %v3909_v45  ;;  %v343_v45 = vld [vmem:[%s4981_s27 + $0x218] sm:$0xff] }
  0xb2   : > { %v437_v61 = vpack.c.bf16 %v343_v45, %v342_v60  ;;  %v374_v45 = vld [vmem:[%s4981_s27 + $0x310] sm:$0xff] }
  0xb3   : > { %2437 = vmatmul.mubr.bf16.gmra.mrb[8].mxu1 %v3898_v62  ;;  %v549_v62 = vld [vmem:[#allocation5 + $0x288] sm:$0xff] }
  0xb4   : > { %2444 = vmatprep.mubr.bf16.mxu1 %v3907_v2  ;;  %v744_v2 = vld [vmem:[%s6030_s2 + $0xa0] sm:$0xff]  ;;  %v3965_v5 = vcombine.high %v549_v62, %v553_v63  ;;  %2969 = vmatpush1.bf16.msra.mxu0 %v437_v61  ;;  %v3964_v21 = vcombine.low %v549_v62, %v553_v63  ;;  %v750_v61 = vld [vmem:[%s6030_s2 + $0xd0] sm:$0xff] }
  0xb5   : > { %890 = vperm.xlu0 %4631, %v744_v2   ;;  %2970 = vmatprep.subr.bf16.mxu0 %v4791_v0  ;;  %v5219_v2 = vld [vmem:[#allocation5 + $0x340] sm:$0xff] }
  0xb8   : > { %2734 = vmatmul.mubr.bf16.gmra.mrb[12].mxu0 %v3908_v3  ;;  %v3956_v3 = vcombine.low %v541_v47, %v545_v49  ;;  %v352_v47 = vld [vmem:[%s4981_s27 + $0x260] sm:$0xff]  ;;  %v353_v49 = vld [vmem:[%s4981_s27 + $0x268] sm:$0xff] }
  0xb9   : > { %2741 = vmatprep.mubr.bf16.mxu0 %v3917_v4  ;;  %v745_v4 = vld [vmem:[%s6030_s2 + $0xa8] sm:$0xff]  ;;  %v442_v52 = vpack.c.bf16 %v353_v49, %v352_v47  ;;  %v383_v47 = vld [vmem:[%s4981_s27 + $0x358] sm:$0xff] }
  0xba   : > { %895 = vperm.xlu1 %4632, %v745_v4   ;;  %v751_v4 = vld [vmem:[%s6030_s2 + $0xd8] sm:$0xff] }
  0xbb   : > { %2445 = vmatmul.mubr.bf16.gmra.mrb[12].mxu1 %v3906_v7  ;;  %v344_v7 = vld [vmem:[%s4981_s27 + $0x220] sm:$0xff] }
  0xbc   : > { %2452 = vmatprep.mubr.bf16.mxu1 %v3915_v10  ;;  %v728_v10 = vld [vmem:[%s6030_s2 + $0x20] sm:$0xff] }
  0xbd   : > { %810 = vperm.xlu0 %4631, %v728_v10   ;;  %v377_v10 = vld [vmem:[%s4981_s27 + $0x328] sm:$0xff] }
  0xbe   : > { %815 = vperm.xlu1 %4632, %v729_v14  }
  0xc0   : > { %2742 = vmatmul.mubr.bf16.gmra.mrb[16].mxu0 %v3916_v11  ;;  %v438_v11 = vpack.c.bf16 %v345_v9, %v344_v7  ;;  %v734_v7 = vld [vmem:[%s6030_s2 + $0x50] sm:$0xff]  ;;  %v376_v9 = vld [vmem:[%s4981_s27 + $0x320] sm:$0xff] }
  0xc1   : > { %2749 = vmatprep.mubr.bf16.mxu0 %v3925_v12  ;;  %v346_v12 = vld [vmem:[%s4981_s27 + $0x230] sm:$0xff] }
  0xc2   : > { %2971 = vmatpush1.bf16.msra.mxu0 %v438_v11  ;;  %905 = vperm.xlu1 %4632, %v747_v22   ;;  %v358_v11 = vld [vmem:[%s4981_s27 + $0x290] sm:$0xff] }
  0xc3   : > { %2453 = vmatmul.mubr.bf16.gmra.mrb[16].mxu1 %v3914_v15  ;;  %v3954_v15 = vcombine.low %v540_v33, %v544_v56  ;;  %2972 = vmatprep.subr.bf16.mxu0 %v4791_v0  ;;  %v354_v33 = vld [vmem:[%s4981_s27 + $0x270] sm:$0xff] }
  0xc4   : > { %2460 = vmatprep.mubr.bf16.mxu1 %v3923_v18  ;;  %v3963_v18 = vcombine.high %v548_v6, %v552_v8  ;;  %v443_v60 = vpack.c.bf16 %v355_v57, %v354_v33  ;;  %v357_v6 = vld [vmem:[%s4981_s27 + $0x288] sm:$0xff]  ;;  %v5311_v33 = vld [vmem:[#allocation5 + $0x3e0] sm:$0xff] }
  0xc8   : > { %2750 = vmatmul.mubr.bf16.gmra.mrb[20].mxu0 %v3924_v19  ;;  %v439_v19 = vpack.c.bf16 %v347_v13, %v346_v12  ;;  %v5237_v12 = vld [vmem:[#allocation5 + $0x388] sm:$0xff] }
  0xc9   : > { %2757 = vmatprep.mubr.bf16.mxu0 %v3933_v20  ;;  %v746_v20 = vld [vmem:[%s6030_s2 + $0xb0] sm:$0xff]  ;;  %v5239_v13 = vld [vmem:[#allocation5 + $0x3a8] sm:$0xff] }
  0xca   : > { %900 = vperm.xlu0 %4631, %v746_v20   ;;  %2973 = vmatpush1.bf16.msra.mxu0 %v439_v19  ;;  %v378_v19 = vld [vmem:[%s4981_s27 + $0x330] sm:$0xff]  ;;  %v379_v20 = vld [vmem:[%s4981_s27 + $0x338] sm:$0xff] }
  0xcb   : > { %2461 = vmatmul.mubr.bf16.gmra.mrb[20].mxu1 %v3922_v23  ;;  %v3973_v23 = vcombine.high %v557_v16, %v561_v17  ;;  %2974 = vmatprep.subr.bf16.mxu0 %v4791_v0  ;;  %v359_v16 = vld [vmem:[%s4981_s27 + $0x298] sm:$0xff]  ;;  %v5255_v22 = vpack.c.bf16 %v379_v20, %v378_v19  ;;  %v389_v19 = vld [vmem:[%s4981_s27 + $0x388] sm:$0xff]  ;;  %v370_v20 = vld [vmem:[%s4981_s27 + $0x2f0] sm:$0xff] }
  0xcc   : > { %2468 = vmatprep.mubr.bf16.mxu1 %v3931_v26  ;;  %v560_v26 = vld [vmem:[#allocation5 + $0x2e0] sm:$0xff] }
  0xcd   : > { %v3971_v38 = vcombine.high %v5160_v24, %v560_v26  ;;  %v3970_v55 = vcombine.low %v5160_v24, %v560_v26  ;;  %v3997_v24 = vcombine.high %v5237_v12, %v5239_v13  ;;  %v360_v26 = vld [vmem:[%s4981_s27 + $0x2a0] sm:$0xff] }
  0xd0   : > { %2758 = vmatmul.mubr.bf16.gmra.mrb[24].mxu0 %v3932_v27  ;;  %v349_v27 = vld [vmem:[%s4981_s27 + $0x248] sm:$0xff] }
  0xd1   : > { %2765 = vmatprep.mubr.bf16.mxu0 %v3941_v28  ;;  %v730_v28 = vld [vmem:[%s6030_s2 + $0x30] sm:$0xff]  ;;  %v440_v29 = vpack.c.bf16 %v349_v27, %v348_v25  ;;  %v5262_v25 = vld [vmem:[#allocation5 + $0x380] sm:$0xff] }
  0xd2   : > { %820 = vperm.xlu0 %4631, %v730_v28   ;;  %v752_v27 = vld [vmem:[%s6030_s2 + $0xe0] sm:$0xff] }
  0xd3   : > { %2469 = vmatmul.mubr.bf16.gmra.mrb[24].mxu1 %v3930_v34  ;;  %v731_v34 = vld [vmem:[%s6030_s2 + $0x38] sm:$0xff]  ;;  %2975 = vmatpush1.bf16.msra.mxu0 %v440_v29  ;;  %v5268_v28 = vld [vmem:[#allocation5 + $0x3a0] sm:$0xff]  ;;  %v361_v29 = vld [vmem:[%s4981_s27 + $0x2a8] sm:$0xff] }
  0xd4   : > { %2476 = vmatprep.mubr.bf16.mxu1 %v3939_v36  ;;  %v565_v36 = vld [vmem:[#allocation5 + $0x308] sm:$0xff]  ;;  %2976 = vmatprep.subr.bf16.mxu0 %v4791_v0 }
  0xd5   : > { %825 = vperm.xlu1 %4632, %v731_v34   ;;  %v3981_v43 = vcombine.high %v565_v36, %v569_v37  ;;  %v3980_v63 = vcombine.low %v565_v36, %v569_v37  ;;  %v380_v34 = vld [vmem:[%s4981_s27 + $0x340] sm:$0xff]  ;;  %v362_v36 = vld [vmem:[%s4981_s27 + $0x2b0] sm:$0xff]  ;;  %v5280_v37 = vld [vmem:[#allocation5 + $0x3c8] sm:$0xff] }
  0xd8   : > { %2766 = vmatmul.mubr.bf16.gmra.mrb[28].mxu0 %v3940_v39  ;;  %v441_v39 = vpack.c.bf16 %v351_v31, %v350_v30  ;;  %v753_v30 = vld [vmem:[%s6030_s2 + $0xe8] sm:$0xff]  ;;  %v446_v31 = vpack.c.bf16 %v361_v29, %v360_v26  ;;  %v390_v29 = vld [vmem:[%s4981_s27 + $0x390] sm:$0xff] }
  0xd9   : > { %2773 = vmatprep.mubr.bf16.mxu0 %v3949_v40  ;;  %v748_v40 = vld [vmem:[%s6030_s2 + $0xc0] sm:$0xff]  ;;  %915 = vperm.xlu1 %4632, %v749_v42   ;;  %v3995_v42 = vcombine.high %v5262_v25, %v5268_v28  ;;  %v609_v26 = vld [vmem:[#allocation5 + $0x468] sm:$0xff] }
  0xda   : > { %910 = vperm.xlu0 %4631, %v748_v40   ;;  %2977 = vmatpush1.bf16.msra.mxu0 %v441_v39 }
  0xdb   : > { %2477 = vmatmul.mubr.bf16.gmra.mrb[28].mxu1 %v3938_v48  ;;  %v5184_v48 = vld [vmem:[#allocation5 + $0x320] sm:$0xff]  ;;  %2978 = vmatprep.subr.bf16.mxu0 %v4791_v0 }
  0xdc   : > { %2484 = vmatprep.mubr.bf16.mxu1 %v3947_v50  ;;  %v732_v50 = vld [vmem:[%s6030_s2 + $0x40] sm:$0xff]  ;;  %v3979_v59 = vcombine.high %v5181_v44, %v5184_v48  ;;  %v3978_v14 = vcombine.low %v5181_v44, %v5184_v48  ;;  %v382_v44 = vld [vmem:[%s4981_s27 + $0x350] sm:$0xff] }
  0xdd   : > { %835 = vperm.xlu1 %4632, %v733_v58   ;;  %v736_v48 = vld [vmem:[%s6030_s2 + $0x60] sm:$0xff]  ;;  %v5298_v49 = vpack.c.bf16 %v383_v47, %v382_v44  ;;  %v395_v44 = vld [vmem:[%s4981_s27 + $0x3b8] sm:$0xff]  ;;  %v613_v47 = vld [vmem:[#allocation5 + $0x488] sm:$0xff] }
  0xde   : > { %830 = vperm.xlu0 %4631, %v732_v50   ;;  %2979 = vmatpush1.bf16.msra.mxu0 %v442_v52  ;;  %v3996_v50 = vcombine.low %v5237_v12, %v5239_v13  ;;  %v5305_v52 = vld [vmem:[#allocation5 + $0x3c0] sm:$0xff]  ;;  %v738_v12 = vld [vmem:[%s6030_s2 + $0x70] sm:$0xff] }
  0xdf   : > { %2980 = vmatprep.subr.bf16.mxu0 %v4791_v0  ;;  %v384_v58 = vld [vmem:[%s4981_s27 + $0x360] sm:$0xff] }
  0xe0   : > { %2774 = vmatmul.mubr.bf16.gmra.mrb[32].mxu0 %v3948_v53  ;;  %v372_v53 = vld [vmem:[%s4981_s27 + $0x300] sm:$0xff] }
  0xe1   : > { %2781 = vmatprep.mubr.bf16.mxu0 %v3957_v32  ;;  %v373_v32 = vld [vmem:[%s4981_s27 + $0x308] sm:$0xff]  ;;  %925 = vperm.xlu1 %4632, %v751_v4   ;;  %v386_v4 = vld [vmem:[%s4981_s27 + $0x370] sm:$0xff]  ;;  %v600_v13 = vld [vmem:[#allocation5 + $0x420] sm:$0xff] }
  0xe2   : > { %v5199_v56 = vpack.c.bf16 %v373_v32, %v372_v53  ;;  %920 = vperm.xlu0 %4631, %v750_v61   ;;  %2981 = vmatpush1.bf16.msra.mxu0 %v443_v60  ;;  %v364_v53 = vld [vmem:[%s4981_s27 + $0x2c0] sm:$0xff]  ;;  %v737_v32 = vld [vmem:[%s6030_s2 + $0x68] sm:$0xff]  ;;  %v366_v60 = vld [vmem:[%s4981_s27 + $0x2d0] sm:$0xff]  ;;  %v3994_v61 = vcombine.low %v5262_v25, %v5268_v28 }
  0xe3   : > { %2485 = vmatmul.mubr.bf16.gmra.mrb[32].mxu1 %v3946_v46  ;;  %v375_v46 = vld [vmem:[%s4981_s27 + $0x318] sm:$0xff]  ;;  %2982 = vmatprep.subr.bf16.mxu0 %v4791_v0 }
  0xe4   : > { %2492 = vmatprep.mubr.bf16.mxu1 %v3955_v1  ;;  %4209 = vmatpush1.bf16.msra.mxu1 %v5199_v56  ;;  %v5214_v62 = vpack.c.bf16 %v375_v46, %v374_v45  ;;  %v3989_v1 = vcombine.high %v5191_v51, %v5196_v54  ;;  %v5323_v45 = vld [vmem:[#allocation5 + $0x408] sm:$0xff]  ;;  %v371_v25 = vld [vmem:[%s4981_s27 + $0x2f8] sm:$0xff] }
  0xe5   : > { %4194 = vmatprep.subr.bf16.mxu1 %v4791_v0  ;;  %v601_v46 = vld [vmem:[#allocation5 + $0x428] sm:$0xff]  ;;  %v451_v28 = vpack.c.bf16 %v371_v25, %v370_v20  ;;  %v628_v20 = vld [vmem:[#allocation5 + $0x500] sm:$0xff] }
  0xe6   : > { %840 = vperm.xlu0 %4631, %v734_v7   ;;  %v637_v25 = vld [vmem:[#allocation5 + $0x548] sm:$0xff] }
  0xe8   : > { %2782 = vmatmul.mubr.bf16.gmra.mrb[36].mxu0 %v3956_v3  ;;  %v356_v3 = vld [vmem:[%s4981_s27 + $0x280] sm:$0xff]  ;;  %4210 = vmatpush1.bf16.msra.mxu1 %v5214_v62 }
  0xe9   : > { %2789 = vmatprep.mubr.bf16.mxu0 %v3965_v5  ;;  %v5225_v5 = vld [vmem:[#allocation5 + $0x360] sm:$0xff]  ;;  %v444_v8 = vpack.c.bf16 %v357_v6, %v356_v3  ;;  %4195 = vmatprep.subr.bf16.mxu1 %v4791_v0  ;;  %v755_v6 = vld [vmem:[%s6030_s2 + $0xf8] sm:$0xff] }
  0xea   : > { %v3987_v17 = vcombine.high %v5219_v2, %v5225_v5  ;;  %v3986_v39 = vcombine.low %v5219_v2, %v5225_v5  ;;  %930 = vperm.xlu0 %4631, %v752_v27   ;;  %v4003_v2 = vcombine.high %v5305_v52, %v5311_v33  ;;  %v387_v5 = vld [vmem:[%s4981_s27 + $0x378] sm:$0xff] }
  0xeb   : > { %2493 = vmatmul.mubr.bf16.gmra.mrb[36].mxu1 %v3954_v15  ;;  %v5243_v15 = vpack.c.bf16 %v377_v10, %v376_v9  ;;  %2983 = vmatpush1.bf16.msra.mxu0 %v444_v8  ;;  %v5339_v7 = vpack.c.bf16 %v387_v5, %v386_v4  ;;  %v4013_v9 = vcombine.high %v5323_v45, %v601_v46  ;;  %v596_v10 = vld [vmem:[#allocation5 + $0x400] sm:$0xff] }
  0xec   : > { %2500 = vmatprep.mubr.bf16.mxu1 %v3963_v18  ;;  %v445_v18 = vpack.c.bf16 %v359_v16, %v358_v11  ;;  %2984 = vmatprep.subr.bf16.mxu0 %v4791_v0  ;;  %v368_v11 = vld [vmem:[%s4981_s27 + $0x2e0] sm:$0xff]  ;;  %v739_v16 = vld [vmem:[%s6030_s2 + $0x78] sm:$0xff]  ;;  %v4011_v27 = vcombine.high %v596_v10, %v600_v13 }
  0xed   : > { %4211 = vmatpush1.bf16.msra.mxu1 %v5243_v15  ;;  %v620_v4 = vld [vmem:[#allocation5 + $0x4c0] sm:$0xff] }
  0xee   : > { %4196 = vmatprep.subr.bf16.mxu1 %v4791_v0  ;;  %850 = vperm.xlu0 %4631, %v736_v48   ;;  %v617_v48 = vld [vmem:[#allocation5 + $0x4a8] sm:$0xff]  ;;  %v624_v5 = vld [vmem:[#allocation5 + $0x4e0] sm:$0xff] }
  0xef   : > { %2985 = vmatpush1.bf16.msra.mxu0 %v445_v18  ;;  %v388_v18 = vld [vmem:[%s4981_s27 + $0x380] sm:$0xff] }
  0xf0   : > { %2790 = vmatmul.mubr.bf16.gmra.mrb[40].mxu0 %v3964_v21  ;;  %v735_v21 = vld [vmem:[%s6030_s2 + $0x58] sm:$0xff]  ;;  %2986 = vmatprep.subr.bf16.mxu0 %v4791_v0 }
  0xf1   : > { %2797 = vmatprep.mubr.bf16.mxu0 %v3973_v23  ;;  %v3988_v23 = vcombine.low %v5191_v51, %v5196_v54  ;;  %845 = vperm.xlu1 %4632, %v735_v21   ;;  %v365_v54 = vld [vmem:[%s4981_s27 + $0x2c8] sm:$0xff] }
  0xf2   : > { %4212 = vmatpush1.bf16.msra.mxu1 %v5255_v22  ;;  %v448_v57 = vpack.c.bf16 %v365_v54, %v364_v53  ;;  %v605_v21 = vld [vmem:[#allocation5 + $0x448] sm:$0xff]  ;;  %v4029_v53 = vcombine.high %v613_v47, %v617_v48  ;;  %v396_v54 = vld [vmem:[%s4981_s27 + $0x3c0] sm:$0xff] }
  0xf3   : > { %2501 = vmatmul.mubr.bf16.gmra.mrb[40].mxu1 %v3962_v35  ;;  %4197 = vmatprep.subr.bf16.mxu1 %v4791_v0  ;;  %v381_v35 = vld [vmem:[%s4981_s27 + $0x348] sm:$0xff] }
  0xf4   : > { %2508 = vmatprep.mubr.bf16.mxu1 %v3971_v38  ;;  %v5282_v38 = vld [vmem:[#allocation5 + $0x3e8] sm:$0xff]  ;;  %v5286_v40 = vpack.c.bf16 %v381_v35, %v380_v34  ;;  %2987 = vmatpush1.bf16.msra.mxu0 %v446_v31  ;;  %v4012_v34 = vcombine.low %v5323_v45, %v601_v46  ;;  %v4021_v35 = vcombine.high %v605_v21, %v609_v26 }
  0xf5   : > { %935 = vperm.xlu1 %4632, %v753_v30   ;;  %2988 = vmatprep.subr.bf16.mxu0 %v4791_v0  ;;  %v4005_v51 = vcombine.high %v5280_v37, %v5282_v38  ;;  %v4004_v8 = vcombine.low %v5280_v37, %v5282_v38  ;;  %v391_v30 = vld [vmem:[%s4981_s27 + $0x398] sm:$0xff]  ;;  %v608_v37 = vld [vmem:[#allocation5 + $0x460] sm:$0xff]  ;;  %v621_v45 = vld [vmem:[#allocation5 + $0x4c8] sm:$0xff] }
  0xf6   : > { %4213 = vmatpush1.bf16.msra.mxu1 %v5286_v40  ;;  %v5368_v31 = vpack.c.bf16 %v391_v30, %v390_v29  ;;  %v392_v38 = vld [vmem:[%s4981_s27 + $0x3a0] sm:$0xff]  ;;  %v625_v46 = vld [vmem:[#allocation5 + $0x4e8] sm:$0xff] }
  0xf7   : > { %4198 = vmatprep.subr.bf16.mxu1 %v4791_v0  ;;  %v636_v30 = vld [vmem:[#allocation5 + $0x540] sm:$0xff] }
  0xf8   : > { %2798 = vmatmul.mubr.bf16.gmra.mrb[44].mxu0 %v3972_v41  ;;  %v363_v41 = vld [vmem:[%s4981_s27 + $0x2b8] sm:$0xff] }
  0xf9   : > { %2805 = vmatprep.mubr.bf16.mxu0 %v3981_v43  ;;  %v447_v43 = vpack.c.bf16 %v363_v41, %v362_v36  ;;  %855 = vperm.xlu1 %4632, %v737_v32   ;;  %v604_v36 = vld [vmem:[#allocation5 + $0x440] sm:$0xff]  ;;  %v4010_v41 = vcombine.low %v596_v10, %v600_v13  ;;  %v629_v13 = vld [vmem:[#allocation5 + $0x508] sm:$0xff] }
  0xfa   : > { %4214 = vmatpush1.bf16.msra.mxu1 %v5298_v49  ;;  %v612_v32 = vld [vmem:[#allocation5 + $0x480] sm:$0xff] }
  0xfb   : > { %2509 = vmatmul.mubr.bf16.gmra.mrb[44].mxu1 %v3970_v55  ;;  %2989 = vmatpush1.bf16.msra.mxu0 %v447_v43  ;;  %v754_v55 = vld [vmem:[%s6030_s2 + $0xf0] sm:$0xff] }
  0xfc   : > { %2516 = vmatprep.mubr.bf16.mxu1 %v3979_v59  ;;  %2990 = vmatprep.subr.bf16.mxu0 %v4791_v0  ;;  %v385_v59 = vld [vmem:[%s4981_s27 + $0x368] sm:$0xff]  ;;  %v394_v43 = vld [vmem:[%s4981_s27 + $0x3b0] sm:$0xff] }
  0xfd   : > { %4199 = vmatprep.subr.bf16.mxu1 %v4791_v0  ;;  %940 = vperm.xlu0 %4631, %v754_v55   ;;  %v397_v55 = vld [vmem:[%s4981_s27 + $0x3c8] sm:$0xff] }
  0xfe   : > { %945 = vperm.xlu1 %4632, %v755_v6   ;;  %v400_v6 = vld [vmem:[%s4981_s27 + $0x3e0] sm:$0xff] }
  0xff   : > { %2991 = vmatpush1.bf16.msra.mxu0 %v448_v57  ;;  %v4018_v57 = vcombine.low %v604_v36, %v608_v37 }
 0x100   : > { %2806 = vmatmul.mubr.bf16.gmra.mrb[48].mxu0 %v3980_v63  ;;  %v5327_v63 = vpack.c.bf16 %v385_v59, %v384_v58  ;;  %2992 = vmatprep.subr.bf16.mxu0 %v4791_v0  ;;  %v5389_v58 = vpack.c.bf16 %v397_v55, %v396_v54  ;;  %v398_v59 = vld [vmem:[%s4981_s27 + $0x3d0] sm:$0xff]  ;;  %v656_v54 = vld [vmem:[#allocation5 + $0x5e0] sm:$0xff]  ;;  %v661_v55 = vld [vmem:[#allocation5 + $0x608] sm:$0xff] }
 0x101   : > { %2813 = vmatprep.mubr.bf16.mxu0 %v3989_v1  ;;  %v367_v1 = vld [vmem:[%s4981_s27 + $0x2d8] sm:$0xff]  ;;  %860 = vperm.xlu0 %4631, %v738_v12  }
 0x102   : > { %v449_v3 = vpack.c.bf16 %v367_v1, %v366_v60  ;;  %4215 = vmatpush1.bf16.msra.mxu1 %v5327_v63  ;;  %865 = vperm.xlu1 %4632, %v739_v16   ;;  %v399_v60 = vld [vmem:[%s4981_s27 + $0x3d8] sm:$0xff]  ;;  %v4035_v16 = vcombine.high %v620_v4, %v624_v5 }
 0x103   : > { %2517 = vmatmul.mubr.bf16.gmra.mrb[48].mxu1 %v3978_v14  ;;  %4200 = vmatprep.subr.bf16.mxu1 %v4791_v0  ;;  %v369_v14 = vld [vmem:[%s4981_s27 + $0x2e8] sm:$0xff]  ;;  %v5394_v1 = vpack.c.bf16 %v399_v60, %v398_v59  ;;  %v403_v12 = vld [vmem:[%s4981_s27 + $0x3f8] sm:$0xff] }
 0x104   : > { %2524 = vmatprep.mubr.bf16.mxu1 %v3987_v17  ;;  %2993 = vmatpush1.bf16.msra.mxu0 %v449_v3  ;;  %v450_v17 = vpack.c.bf16 %v369_v14, %v368_v11  ;;  %v4037_v3 = vcombine.high %v621_v45, %v625_v46  ;;  %v402_v11 = vld [vmem:[%s4981_s27 + $0x3f0] sm:$0xff]  ;;  %v633_v14 = vld [vmem:[#allocation5 + $0x528] sm:$0xff] }
 0x105   : > { %2994 = vmatprep.subr.bf16.mxu0 %v4791_v0  ;;  %v665_v59 = vld [vmem:[#allocation5 + $0x628] sm:$0xff] }
 0x106   : > { %4216 = vmatpush1.bf16.msra.mxu1 %v5339_v7 }
 0x107   : > { %4201 = vmatprep.subr.bf16.mxu1 %v4791_v0 }
 0x108   : > { %2814 = vmatmul.mubr.bf16.gmra.mrb[52].mxu0 %v3988_v23  ;;  %v4002_v23 = vcombine.low %v5305_v52, %v5311_v33  ;;  %v4020_v52 = vcombine.low %v605_v21, %v609_v26  ;;  %v616_v33 = vld [vmem:[#allocation5 + $0x4a0] sm:$0xff]  ;;  %v641_v26 = vld [vmem:[#allocation5 + $0x568] sm:$0xff] }
 0x109   : > { %2821 = vmatprep.mubr.bf16.mxu0 %v3997_v24  ;;  %v5361_v24 = vpack.c.bf16 %v389_v19, %v388_v18  ;;  %2995 = vmatpush1.bf16.msra.mxu0 %v450_v17  ;;  %v5406_v17 = vpack.c.bf16 %v403_v12, %v402_v11  ;;  %v4036_v18 = vcombine.low %v621_v45, %v625_v46  ;;  %v632_v21 = vld [vmem:[#allocation5 + $0x520] sm:$0xff]  ;;  %v773_v46 = vld [vmem:[%s6030_s2 + $0x188] sm:$0xff] }
 0x10a   : > { %2996 = vmatprep.subr.bf16.mxu0 %v4791_v0  ;;  %v4045_v19 = vcombine.high %v629_v13, %v633_v14  ;;  %v4053_v29 = vcombine.high %v637_v25, %v641_v26  ;;  %v772_v45 = vld [vmem:[%s6030_s2 + $0x180] sm:$0xff]  ;;  %1035 = vperm.xlu1 %4632, %v773_v46   ;;  %v673_v11 = vld [vmem:[#allocation5 + $0x668] sm:$0xff] }
 0x10b   : > { %2525 = vmatmul.mubr.bf16.gmra.mrb[52].mxu1 %v3986_v39  ;;  %v393_v39 = vld [vmem:[%s4981_s27 + $0x3a8] sm:$0xff]  ;;  %1030 = vperm.xlu0 %4631, %v772_v45   ;;  %v780_v46 = vld [vmem:[%s6030_s2 + $0x1c0] sm:$0xff] }
 0x10c   : > { %2532 = vmatprep.mubr.bf16.mxu1 %v3995_v42  ;;  %4217 = vmatpush1.bf16.msra.mxu1 %v5361_v24  ;;  %v5377_v42 = vpack.c.bf16 %v393_v39, %v392_v38  ;;  %v4052_v39 = vcombine.low %v637_v25, %v641_v26  ;;  %v677_v25 = vld [vmem:[#allocation5 + $0x688] sm:$0xff] }
 0x10d   : > { %4202 = vmatprep.subr.bf16.mxu1 %v4791_v0  ;;  %2997 = vmatpush1.bf16.msra.mxu0 %v451_v28  ;;  %v4044_v28 = vcombine.low %v629_v13, %v633_v14  ;;  %v774_v13 = vld [vmem:[%s6030_s2 + $0x190] sm:$0xff]  ;;  %v775_v14 = vld [vmem:[%s6030_s2 + $0x198] sm:$0xff] }
 0x10e   : > { %3255 = vmatprep.subr.bf16.mxu0 %v4791_v0 }
 0x110   : > { %2822 = vmatmul.mubr.bf16.gmra.mrb[56].mxu0 %v3996_v50  ;;  %4218 = vmatpush1.bf16.msra.mxu1 %v5368_v31  ;;  %v4019_v50 = vcombine.high %v604_v36, %v608_v37  ;;  %v645_v36 = vld [vmem:[#allocation5 + $0x588] sm:$0xff] }
 0x111   : > { %2829 = vmatprep.mubr.bf16.mxu0 %v4005_v51  ;;  %4203 = vmatprep.subr.bf16.mxu1 %v4791_v0  ;;  %v5382_v51 = vpack.c.bf16 %v395_v44, %v394_v43  ;;  %v649_v37 = vld [vmem:[#allocation5 + $0x5a8] sm:$0xff]  ;;  %v644_v43 = vld [vmem:[#allocation5 + $0x580] sm:$0xff] }
 0x112   : > { %v648_v44 = vld [vmem:[#allocation5 + $0x5a0] sm:$0xff] }
 0x113   : > { %2533 = vmatmul.mubr.bf16.gmra.mrb[56].mxu1 %v3994_v61  ;;  %v4027_v61 = vcombine.high %v612_v32, %v616_v33 }
 0x114   : > { %2540 = vmatprep.mubr.bf16.mxu1 %v4003_v2  ;;  %4219 = vmatpush1.bf16.msra.mxu1 %v5377_v42  ;;  %v4028_v2 = vcombine.low %v613_v47, %v617_v48  ;;  %v653_v48 = vld [vmem:[#allocation5 + $0x5c8] sm:$0xff] }
 0x115   : > { %4204 = vmatprep.subr.bf16.mxu1 %v4791_v0 }
 0x118   : > { %2830 = vmatmul.mubr.bf16.gmra.mrb[60].mxu0 %v4004_v8  ;;  %4220 = vmatpush1.bf16.msra.mxu1 %v5382_v51  ;;  %v401_v8 = vld [vmem:[%s4981_s27 + $0x3e8] sm:$0xff]  ;;  %s4792_s27 = smov [#allocation7]  }
 0x119   : > { %2837 = vmatprep.mubr.bf16.mxu0 %v4013_v9  ;;  %4205 = vmatprep.subr.bf16.mxu1 %v4791_v0  ;;  %v4026_v9 = vcombine.low %v612_v32, %v616_v33  ;;  %v5401_v10 = vpack.c.bf16 %v401_v8, %v400_v6  ;;  %v652_v33 = vld [vmem:[#allocation5 + $0x5c0] sm:$0xff]  ;;  %v757_v6 = vld [vmem:[%s6030_s2 + $0x108] sm:$0xff]  ;;  %s4701_s7 = sshll.u32 %s4792_s27, 4  ;;  %s4702_s7 = int_to_ptr.vmem [resolvable:$false] %s4701_s7 }
 0x11a   : > { %v4067_v60 = vcombine.high %v652_v33, %v656_v54  ;;  %955 = vperm.xlu1 %4632, %v757_v6   ;;  %v669_v8 = vld [vmem:[#allocation5 + $0x648] sm:$0xff]  ;;  %v696_v6 = vld [vmem:[#allocation5 + $0x720] sm:$0xff]  ;;  %s4703_s26 = scalar_lea.vmem %s4702_s7, 512  ;;  %p4704_p12 = scmp.lt.s32.totalorder %s5974_s11, %s4702_s7 }
 0x11b   : > { %2541 = vmatmul.mubr.bf16.gmra.mrb[60].mxu1 %v4002_v23  ;;  %v4034_v23 = vcombine.low %v620_v4, %v624_v5  ;;  %v660_v4 = vld [vmem:[#allocation5 + $0x600] sm:$0xff]  ;;  %p4705_p11 = scmp.lt.s32.totalorder %s4703_s26, %s4697_s21 }
 0x11c   : > { %2548 = vmatprep.mubr.bf16.mxu1 %v4011_v27  ;;  %4221 = vmatpush1.bf16.msra.mxu1 %v5389_v58  ;;  %v4043_v27 = vcombine.high %v628_v20, %v632_v21  ;;  %v664_v5 = vld [vmem:[#allocation5 + $0x620] sm:$0xff] }
 0x11d   : > { %4206 = vmatprep.subr.bf16.mxu1 %v4791_v0  ;;  %v4075_v12 = vcombine.high %v660_v4, %v664_v5  ;;  %v4074_v26 = vcombine.low %v660_v4, %v664_v5  ;;  %v764_v4 = vld [vmem:[%s6030_s2 + $0x140] sm:$0xff]  ;;  %p4706_p0 = por %p4705_p11, %p4704_p12 }
 0x11e   : > { %1045 = vperm.xlu1 %4632, %v775_v14   ;;  %v692_v5 = vld [vmem:[#allocation5 + $0x700] sm:$0xff]  ;;  %v705_v14 = vld [vmem:[#allocation5 + $0x768] sm:$0xff] }
 0x11f   : > { %p4707_p5 = pnand %p4706_p0, %p4700_p8 }
 0x120   : > { %2838 = vmatmul.mubr.bf16.gmra.mrb[64].mxu0 %v4012_v34  ;;  %4222 = vmatpush1.bf16.msra.mxu1 %v5394_v1  ;;  %v640_v34 = vld [vmem:[#allocation5 + $0x560] sm:$0xff] }
 0x121   : > { %2845 = vmatprep.mubr.bf16.mxu0 %v4021_v35  ;;  %4207 = vmatprep.subr.bf16.mxu1 %v4791_v0  ;;  %v4042_v35 = vcombine.low %v628_v20, %v632_v21  ;;  %v4051_v38 = vcombine.high %v636_v30, %v640_v34  ;;  %v4050_v47 = vcombine.low %v636_v30, %v640_v34  ;;  %v668_v20 = vld [vmem:[#allocation5 + $0x640] sm:$0xff]  ;;  %v777_v30 = vld [vmem:[%s6030_s2 + $0x1a8] sm:$0xff] }
 0x122   : > { %v672_v21 = vld [vmem:[#allocation5 + $0x660] sm:$0xff]  ;;  %v4084_v34 = vcombine.low %v669_v8, %v673_v11 }
 0x123   : > { %2549 = vmatmul.mubr.bf16.gmra.mrb[64].mxu1 %v4010_v41  ;;  %v4061_v41 = vcombine.high %v645_v36, %v649_v37 }
 0x124   : > { %2556 = vmatprep.mubr.bf16.mxu1 %v4019_v50  ;;  %4223 = vmatpush1.bf16.msra.mxu1 %v5401_v10  ;;  %v657_v50 = vld [vmem:[#allocation5 + $0x5e8] sm:$0xff] }
 0x125   : > { %4208 = vmatprep.subr.bf16.mxu1 %v4791_v0  ;;  %v4069_v32 = vcombine.high %v653_v48, %v657_v50 }
 0x128   : > { %2846 = vmatmul.mubr.bf16.gmra.mrb[68].mxu0 %v4020_v52  ;;  %4224 = vmatpush1.bf16.msra.mxu1 %v5406_v17  ;;  %v4059_v52 = vcombine.high %v644_v43, %v648_v44 }
 0x129   : > { %2853 = vmatprep.mubr.bf16.mxu0 %v4029_v53  ;;  %v4060_v53 = vcombine.low %v645_v36, %v649_v37  ;;  %v760_v36 = vld [vmem:[%s6030_s2 + $0x120] sm:$0xff] }
 0x12a   : > { %v676_v37 = vld [vmem:[#allocation5 + $0x680] sm:$0xff] }
 0x12b   : > { %2557 = vmatmul.mubr.bf16.gmra.mrb[68].mxu1 %v4018_v57  ;;  %v4058_v57 = vcombine.low %v644_v43, %v648_v44  ;;  %v4082_v43 = vcombine.low %v668_v20, %v672_v21  ;;  %v689_v44 = vld [vmem:[#allocation5 + $0x6e8] sm:$0xff] }
 0x12c   : > { %2564 = vmatprep.mubr.bf16.mxu1 %v4027_v61  ;;  %v4068_v61 = vcombine.low %v653_v48, %v657_v50  ;;  %v778_v48 = vld [vmem:[%s6030_s2 + $0x1b0] sm:$0xff]  ;;  %v779_v50 = vld [vmem:[%s6030_s2 + $0x1b8] sm:$0xff] }
 0x130   : > { %2854 = vmatmul.mubr.bf16.gmra.mrb[72].mxu0 %v4028_v2  ;;  %v4077_v2 = vcombine.high %v661_v55, %v665_v59 }
 0x131   : > { %2861 = vmatprep.mubr.bf16.mxu0 %v4037_v3  ;;  %v756_v3 = vld [vmem:[%s6030_s2 + $0x100] sm:$0xff] }
 0x132   : > { %950 = vperm.xlu0 %4631, %v756_v3  }
 0x133   : > { %2565 = vmatmul.mubr.bf16.gmra.mrb[72].mxu1 %v4026_v9  ;;  %v4066_v9 = vcombine.low %v652_v33, %v656_v54  ;;  %v684_v33 = vld [vmem:[#allocation5 + $0x6c0] sm:$0xff] }
 0x134   : > { %2572 = vmatprep.mubr.bf16.mxu1 %v4035_v16  ;;  %v4076_v16 = vcombine.low %v661_v55, %v665_v59  ;;  %v688_v54 = vld [vmem:[#allocation5 + $0x6e0] sm:$0xff]  ;;  %v763_v55 = vld [vmem:[%s6030_s2 + $0x138] sm:$0xff] }
 0x135   : > { %v4099_v45 = vcombine.high %v684_v33, %v688_v54 }
 0x136   : > { %1040 = vperm.xlu0 %4631, %v774_v13  }
 0x138   : > { %2862 = vmatmul.mubr.bf16.gmra.mrb[76].mxu0 %v4036_v18  ;;  %v4085_v18 = vcombine.high %v669_v8, %v673_v11  ;;  %v765_v8 = vld [vmem:[%s6030_s2 + $0x148] sm:$0xff] }
 0x139   : > { %2869 = vmatprep.mubr.bf16.mxu0 %v4045_v19  ;;  %v758_v19 = vld [vmem:[%s6030_s2 + $0x110] sm:$0xff]  ;;  %v701_v11 = vld [vmem:[#allocation5 + $0x748] sm:$0xff] }
 0x13a   : > { %960 = vperm.xlu0 %4631, %v758_v19   ;;  %v782_v19 = vld [vmem:[%s6030_s2 + $0x1d0] sm:$0xff] }
 0x13b   : > { %2573 = vmatmul.mubr.bf16.gmra.mrb[76].mxu1 %v4034_v23  ;;  %v759_v23 = vld [vmem:[%s6030_s2 + $0x118] sm:$0xff] }
 0x13c   : > { %2580 = vmatprep.mubr.bf16.mxu1 %v4043_v27  ;;  %965 = vperm.xlu1 %4632, %v759_v23   ;;  %v681_v27 = vld [vmem:[#allocation5 + $0x6a8] sm:$0xff] }
 0x140   : > { %2870 = vmatmul.mubr.bf16.gmra.mrb[80].mxu0 %v4044_v28  ;;  %v4083_v28 = vcombine.high %v668_v20, %v672_v21  ;;  %1055 = vperm.xlu1 %4632, %v777_v30   ;;  %v783_v20 = vld [vmem:[%s6030_s2 + $0x1d8] sm:$0xff] }
 0x141   : > { %2877 = vmatprep.mubr.bf16.mxu0 %v4053_v29  ;;  %v776_v29 = vld [vmem:[%s6030_s2 + $0x1a0] sm:$0xff] }
 0x142   : > { %1050 = vperm.xlu0 %4631, %v776_v29   ;;  %v767_v29 = vld [vmem:[%s6030_s2 + $0x158] sm:$0xff] }
 0x143   : > { %2581 = vmatmul.mubr.bf16.gmra.mrb[80].mxu1 %v4042_v35  ;;  %v4093_v35 = vcombine.high %v677_v25, %v681_v27 }
 0x144   : > { %2588 = vmatprep.mubr.bf16.mxu1 %v4051_v38  ;;  %v680_v38 = vld [vmem:[#allocation5 + $0x6a0] sm:$0xff] }
 0x145   : > { %v4090_v59 = vcombine.low %v676_v37, %v680_v38 }
 0x146   : > { %970 = vperm.xlu0 %4631, %v760_v36  }
 0x148   : > { %2878 = vmatmul.mubr.bf16.gmra.mrb[84].mxu0 %v4052_v39  ;;  %v761_v39 = vld [vmem:[%s6030_s2 + $0x128] sm:$0xff] }
 0x149   : > { %2885 = vmatprep.mubr.bf16.mxu0 %v4061_v41  ;;  %975 = vperm.xlu1 %4632, %v761_v39   ;;  %v685_v41 = vld [vmem:[#allocation5 + $0x6c8] sm:$0xff] }
 0x14a   : > { %1060 = vperm.xlu0 %4631, %v778_v48  }
 0x14b   : > { %2589 = vmatmul.mubr.bf16.gmra.mrb[84].mxu1 %v4050_v47  ;;  %v4091_v47 = vcombine.high %v676_v37, %v680_v38  ;;  %v713_v37 = vld [vmem:[#allocation5 + $0x7a8] sm:$0xff] }
 0x14c   : > { %2596 = vmatprep.mubr.bf16.mxu1 %v4059_v52  ;;  %v4092_v52 = vcombine.low %v677_v25, %v681_v27  ;;  %v4117_v25 = vcombine.high %v701_v11, %v705_v14  ;;  %v700_v27 = vld [vmem:[#allocation5 + $0x740] sm:$0xff] }
 0x14d   : > { %1065 = vperm.xlu1 %4632, %v779_v50   ;;  %v768_v50 = vld [vmem:[%s6030_s2 + $0x160] sm:$0xff] }
 0x150   : > { %2886 = vmatmul.mubr.bf16.gmra.mrb[88].mxu0 %v4060_v53  ;;  %v4101_v53 = vcombine.high %v685_v41, %v689_v44 }
 0x151   : > { %2893 = vmatprep.mubr.bf16.mxu0 %v4069_v32  ;;  %v762_v32 = vld [vmem:[%s6030_s2 + $0x130] sm:$0xff]  ;;  %985 = vperm.xlu1 %4632, %v763_v55  }
 0x152   : > { %980 = vperm.xlu0 %4631, %v762_v32   ;;  %v769_v32 = vld [vmem:[%s6030_s2 + $0x168] sm:$0xff] }
 0x153   : > { %2597 = vmatmul.mubr.bf16.gmra.mrb[88].mxu1 %v4058_v57  ;;  %v693_v57 = vld [vmem:[#allocation5 + $0x708] sm:$0xff] }
 0x154   : > { %2604 = vmatprep.mubr.bf16.mxu1 %v4067_v60  ;;  %v697_v60 = vld [vmem:[#allocation5 + $0x728] sm:$0xff] }
 0x155   : > { %v4109_v3 = vcombine.high %v693_v57, %v697_v60  ;;  %v4108_v23 = vcombine.low %v693_v57, %v697_v60 }
 0x156   : > { %1070 = vperm.xlu0 %4631, %v780_v46   ;;  %v786_v46 = vld [vmem:[%s6030_s2 + $0x1f0] sm:$0xff] }
 0x158   : > { %2894 = vmatmul.mubr.bf16.gmra.mrb[92].mxu0 %v4068_v61  ;;  %v781_v61 = vld [vmem:[%s6030_s2 + $0x1c8] sm:$0xff] }
 0x159   : > { %2901 = vmatprep.mubr.bf16.mxu0 %v4077_v2  ;;  %v4100_v2 = vcombine.low %v685_v41, %v689_v44  ;;  %1075 = vperm.xlu1 %4632, %v781_v61   ;;  %v784_v41 = vld [vmem:[%s6030_s2 + $0x1e0] sm:$0xff]  ;;  %v787_v61 = vld [vmem:[%s6030_s2 + $0x1f8] sm:$0xff] }
 0x15a   : > { %990 = vperm.xlu0 %4631, %v764_v4  }
 0x15b   : > { %2605 = vmatmul.mubr.bf16.gmra.mrb[92].mxu1 %v4066_v9 }
 0x15c   : > { %2612 = vmatprep.mubr.bf16.mxu1 %v4075_v12  ;;  %v4098_v12 = vcombine.low %v684_v33, %v688_v54  ;;  %v717_v54 = vld [vmem:[#allocation5 + $0x7c8] sm:$0xff] }
 0x15d   : > { %995 = vperm.xlu1 %4632, %v765_v8   ;;  %v720_v8 = vld [vmem:[#allocation5 + $0x7e0] sm:$0xff] }
 0x15e   : > { %1080 = vperm.xlu0 %4631, %v782_v19   ;;  %v474_v19 = vld [vmem:[#allocation5 + $0x30] sm:$0xff] }
 0x160   : > { %2902 = vmatmul.mubr.bf16.gmra.mrb[96].mxu0 %v4076_v16  ;;  %v4107_v16 = vcombine.high %v692_v5, %v696_v6 }
 0x161   : > { %2909 = vmatprep.mubr.bf16.mxu0 %v4085_v18  ;;  %1085 = vperm.xlu1 %4632, %v783_v20  }
 0x163   : > { %2613 = vmatmul.mubr.bf16.gmra.mrb[96].mxu1 %v4074_v26  ;;  %v766_v26 = vld [vmem:[%s6030_s2 + $0x150] sm:$0xff] }
 0x164   : > { %2620 = vmatprep.mubr.bf16.mxu1 %v4083_v28  ;;  %v704_v28 = vld [vmem:[#allocation5 + $0x760] sm:$0xff]  ;;  %1000 = vperm.xlu0 %4631, %v766_v26  }
 0x165   : > { %1005 = vperm.xlu1 %4632, %v767_v29   ;;  %v4115_v38 = vcombine.high %v700_v27, %v704_v28  ;;  %v4114_v55 = vcombine.low %v700_v27, %v704_v28  ;;  %v495_v27 = vld [vmem:[#allocation5 + $0xd8] sm:$0xff] }
 0x166   : > { %v499_v28 = vld [vmem:[#allocation5 + $0xf8] sm:$0xff] }
 0x168   : > { %2910 = vmatmul.mubr.bf16.gmra.mrb[100].mxu0 %v4084_v34  ;;  %v709_v34 = vld [vmem:[#allocation5 + $0x788] sm:$0xff]  ;;  %1090 = vperm.xlu0 %4631, %v784_v41  }
 0x169   : > { %2917 = vmatprep.mubr.bf16.mxu0 %v4093_v35  ;;  %v4106_v35 = vcombine.low %v692_v5, %v696_v6  ;;  %v4125_v48 = vcombine.high %v709_v34, %v713_v37  ;;  %v770_v5 = vld [vmem:[%s6030_s2 + $0x170] sm:$0xff]  ;;  %v716_v6 = vld [vmem:[#allocation5 + $0x7c0] sm:$0xff] }
 0x16a   : > { %v4131_v20 = vcombine.high %v716_v6, %v720_v8 }
 0x16b   : > { %2621 = vmatmul.mubr.bf16.gmra.mrb[100].mxu1 %v4082_v43  ;;  %v785_v43 = vld [vmem:[%s6030_s2 + $0x1e8] sm:$0xff] }
 0x16c   : > { %2628 = vmatprep.mubr.bf16.mxu1 %v4091_v47  ;;  %v4116_v47 = vcombine.low %v701_v11, %v705_v14  ;;  %1095 = vperm.xlu1 %4632, %v785_v43   ;;  %v771_v11 = vld [vmem:[%s6030_s2 + $0x178] sm:$0xff] }
 0x16d   : > { %1010 = vperm.xlu0 %4631, %v768_v50   ;;  %v507_v50 = vld [vmem:[#allocation5 + $0x138] sm:$0xff] }
 0x170   : > { %2918 = vmatmul.mubr.bf16.gmra.mrb[104].mxu0 %v4092_v52  ;;  %v708_v52 = vld [vmem:[#allocation5 + $0x780] sm:$0xff]  ;;  %1015 = vperm.xlu1 %4632, %v769_v32  }
 0x171   : > { %2925 = vmatprep.mubr.bf16.mxu0 %v4101_v53  ;;  %v712_v53 = vld [vmem:[#allocation5 + $0x7a0] sm:$0xff]  ;;  %1100 = vperm.xlu0 %4631, %v786_v46  }
 0x172   : > { %v4123_v60 = vcombine.high %v708_v52, %v712_v53 }
 0x173   : > { %2629 = vmatmul.mubr.bf16.gmra.mrb[104].mxu1 %v4090_v59  ;;  %v721_v59 = vld [vmem:[#allocation5 + $0x7e8] sm:$0xff] }
 0x174   : > { %2636 = vmatprep.mubr.bf16.mxu1 %v4099_v45  ;;  %1105 = vperm.xlu1 %4632, %v787_v61   ;;  %v4133_v4 = vcombine.high %v717_v54, %v721_v59 }
 0x175   : > { %1020 = vperm.xlu0 %4631, %v770_v5  }
 0x176   : > { %v5470_v9 = vpop.f32.mrb[0].mxu1 }
 0x177   : > { %6051 = vst [vmem:[#allocation11_spill] sm:$0xff] %v5470_v9  ;;  %v2424_v13 = vpop.f32.mrb[1].mxu1  ;;  %v650_v9 = vld [vmem:[#allocation5 + $0x5b0] sm:$0xff] }
 0x178   : > { %2926 = vmatmul.mubr.bf16.gmra.mrb[108].mxu0 %v4100_v2  ;;  %v5472_v18 = vpop.f32.mrb[2].mxu1  ;;  %1025 = vperm.xlu1 %4632, %v771_v11   ;;  %v4122_v13 = vcombine.low %v708_v52, %v712_v53  ;;  %v3912_v53 = vcombine.low %v495_v27, %v499_v28 }
 0x179   : > { %2933 = vmatprep.mubr.bf16.mxu0 %v4109_v3  ;;  %6052 = vst [vmem:[#allocation12_spill] sm:$0xff] %v5472_v18  ;;  %v2427_v21 = vpop.f32.mrb[3].mxu1  ;;  %v4124_v3 = vcombine.low %v709_v34, %v713_v37  ;;  %v4130_v34 = vcombine.low %v716_v6, %v720_v8  ;;  %v482_v37 = vld [vmem:[#allocation5 + $0x70] sm:$0xff] }
 0x17a   : > { %v494_v6 = vld [vmem:[#allocation5 + $0xd0] sm:$0xff] }
 0x17b   : > { %2637 = vmatmul.mubr.bf16.gmra.mrb[108].mxu1 %v4098_v12  ;;  %v498_v8 = vld [vmem:[#allocation5 + $0xf0] sm:$0xff] }
 0x17c   : > { %2644 = vmatprep.mubr.bf16.mxu1 %v4107_v16  ;;  %v470_v16 = vld [vmem:[#allocation5 + $0x10] sm:$0xff] }
 0x17d   : > { %v3887_v26 = vcombine.high %v470_v16, %v474_v19  ;;  %v646_v18 = vld [vmem:[#allocation5 + $0x590] sm:$0xff] }
 0x17e   : > { %v5486_v30 = vpop.f32.mrb[4].mxu1 }
 0x17f   : > { %6053 = vst [vmem:[#allocation13_spill] sm:$0xff] %v5486_v30  ;;  %v2432_v36 = vpop.f32.mrb[5].mxu1 }
 0x180   : > { %2934 = vmatmul.mubr.bf16.gmra.mrb[112].mxu0 %v4108_v23  ;;  %v5488_v39 = vpop.f32.mrb[6].mxu1  ;;  %v478_v36 = vld [vmem:[#allocation5 + $0x50] sm:$0xff] }
 0x181   : > { %2941 = vmatprep.mubr.bf16.mxu0 %v4117_v25  ;;  %6054 = vst [vmem:[#allocation14_spill] sm:$0xff] %v5488_v39  ;;  %v2435_v44 = vpop.f32.mrb[7].mxu1  ;;  %v4132_v25 = vcombine.low %v717_v54, %v721_v59  ;;  %v486_v54 = vld [vmem:[#allocation5 + $0x90] sm:$0xff]  ;;  %v3894_v46 = vcombine.low %v478_v36, %v482_v37 }
 0x182   : > { %v3886_v44 = vcombine.low %v470_v16, %v474_v19  ;;  %v3911_v16 = vcombine.high %v494_v6, %v498_v8  ;;  %v519_v19 = vld [vmem:[#allocation5 + $0x198] sm:$0xff] }
 0x183   : > { %2645 = vmatmul.mubr.bf16.gmra.mrb[112].mxu1 %v4106_v35 }
 0x184   : > { %2652 = vmatprep.mubr.bf16.mxu1 %v4115_v38  ;;  %v3913_v38 = vcombine.high %v495_v27, %v499_v28  ;;  %v506_v27 = vld [vmem:[#allocation5 + $0x130] sm:$0xff] }
 0x186   : > { %v5502_v33 = vpop.f32.mrb[8].mxu1 }
 0x187   : > { %6055 = vst [vmem:[#allocation15_spill] sm:$0xff] %v5502_v33  ;;  %v2440_v57 = vpop.f32.mrb[9].mxu1 }
 0x188   : > { %2942 = vmatmul.mubr.bf16.gmra.mrb[116].mxu0 %v4116_v47  ;;  %v5504_v45 = vpop.f32.mrb[10].mxu1  ;;  %v3895_v47 = vcombine.high %v478_v36, %v482_v37  ;;  %v527_v37 = vld [vmem:[#allocation5 + $0x1d8] sm:$0xff] }
 0x189   : > { %2949 = vmatprep.mubr.bf16.mxu0 %v4125_v48  ;;  %6056 = vst [vmem:[#allocation16_spill] sm:$0xff] %v5504_v45  ;;  %v2443_v2 = vpop.f32.mrb[11].mxu1  ;;  %v503_v48 = vld [vmem:[#allocation5 + $0x118] sm:$0xff] }
 0x18a   : > { %v3921_v57 = vcombine.high %v503_v48, %v507_v50  ;;  %v511_v2 = vld [vmem:[#allocation5 + $0x158] sm:$0xff] }
 0x18b   : > { %2653 = vmatmul.mubr.bf16.gmra.mrb[116].mxu1 %v4114_v55  ;;  %v490_v55 = vld [vmem:[#allocation5 + $0xb0] sm:$0xff] }
 0x18c   : > { %2660 = vmatprep.mubr.bf16.mxu1 %v4123_v60  ;;  %v3903_v61 = vcombine.high %v486_v54, %v490_v55 }
 0x18e   : > { %v5518_v12 = vpop.f32.mrb[12].mxu1 }
 0x18f   : > { %v2448_v14 = vpop.f32.mrb[13].mxu1 }
 0x190   : > { %2950 = vmatmul.mubr.bf16.gmra.mrb[120].mxu0 %v4124_v3  ;;  %v5520_v21 = vpop.f32.mrb[14].mxu1  ;;  %v515_v3 = vld [vmem:[#allocation5 + $0x178] sm:$0xff]  ;;  %v3902_v14 = vcombine.low %v486_v54, %v490_v55 }
 0x191   : > { %2957 = vmatprep.mubr.bf16.mxu0 %v4133_v4  ;;  %v2451_v23 = vpop.f32.mrb[15].mxu1  ;;  %v3920_v4 = vcombine.low %v503_v48, %v507_v50  ;;  %v3929_v11 = vcombine.high %v511_v2, %v515_v3  ;;  %v514_v48 = vld [vmem:[#allocation5 + $0x170] sm:$0xff]  ;;  %v535_v55 = vld [vmem:[#allocation5 + $0x218] sm:$0xff] }
 0x192   : > { %v3928_v23 = vcombine.low %v511_v2, %v515_v3  ;;  %v522_v2 = vld [vmem:[#allocation5 + $0x1b0] sm:$0xff] }
 0x193   : > { %2661 = vmatmul.mubr.bf16.gmra.mrb[120].mxu1 %v4122_v13 }
 0x194   : > { %2668 = vmatprep.mubr.bf16.mxu1 %v4131_v20  ;;  %v523_v20 = vld [vmem:[#allocation5 + $0x1b8] sm:$0xff] }
 0x195   : > { %v3937_v28 = vcombine.high %v519_v19, %v523_v20 }
 0x196   : > { %v5522_v29 = vpop.f32.mrb[16].mxu1 }
 0x197   : > { %v2456_v35 = vpop.f32.mrb[17].mxu1 }
 0x198   : > { %2958 = vmatmul.mubr.bf16.gmra.mrb[124].mxu0 %v4132_v25  ;;  %v5524_v41 = vpop.f32.mrb[18].mxu1  ;;  %v3910_v35 = vcombine.low %v494_v6, %v498_v8  ;;  %v543_v8 = vld [vmem:[#allocation5 + $0x258] sm:$0xff] }
 0x199   : > { %2998 = vmatprep.mubr.bf16.mxu0 %v3887_v26  ;;  %v2459_v43 = vpop.f32.mrb[19].mxu1  ;;  %v502_v26 = vld [vmem:[#allocation5 + $0x110] sm:$0xff] }
 0x19a   : > { %v3919_v36 = vcombine.high %v502_v26, %v506_v27  ;;  %v3936_v43 = vcombine.low %v519_v19, %v523_v20  ;;  %v530_v19 = vld [vmem:[#allocation5 + $0x1f0] sm:$0xff] }
 0x19b   : > { %2669 = vmatmul.mubr.bf16.gmra.mrb[124].mxu1 %v4130_v34 }
 0x19c   : > { %3311 = vmatprep.mubr.bf16.mxu1 %v3913_v38  ;;  %v531_v38 = vld [vmem:[#allocation5 + $0x1f8] sm:$0xff] }
 0x19d   : > { %v3945_v50 = vcombine.high %v527_v37, %v531_v38 }
 0x19e   : > { %v5526_v52 = vpop.f32.mrb[20].mxu1 }
 0x19f   : > { %v2464_v32 = vpop.f32.mrb[21].mxu1 }
 0x1a0   : > { %2999 = vmatmul.mubr.bf16.vlgmr.msra.gmra.mrb[0].mxu0 %v3886_v44  ;;  %v5529_v59 = vpop.f32.mrb[22].mxu1  ;;  %v3918_v32 = vcombine.low %v502_v26, %v506_v27  ;;  %v551_v27 = vld [vmem:[#allocation5 + $0x298] sm:$0xff] }
 0x1a1   : > { %3006 = vmatprep.mubr.bf16.mxu0 %v3895_v47  ;;  %3256 = vmatpush1.bf16.msra.mxu0 %v5199_v56  ;;  %v2467_v60 = vpop.f32.mrb[23].mxu1  ;;  %v510_v47 = vld [vmem:[#allocation5 + $0x150] sm:$0xff] }
 0x1a2   : > { %3257 = vmatprep.subr.bf16.mxu0 %v4791_v0  ;;  %v3927_v54 = vcombine.high %v510_v47, %v514_v48  ;;  %v3944_v60 = vcombine.low %v527_v37, %v531_v38  ;;  %v538_v37 = vld [vmem:[#allocation5 + $0x230] sm:$0xff] }
 0x1a3   : > { %3312 = vmatmul.mubr.bf16.vlgmr.msra.gmra.mrb[128].mxu1 %v3912_v53 }
 0x1a4   : > { %3319 = vmatprep.mubr.bf16.mxu1 %v3921_v57  ;;  %v539_v57 = vld [vmem:[#allocation5 + $0x238] sm:$0xff] }
 0x1a5   : > { %3258 = vmatpush1.bf16.msra.mxu0 %v5214_v62  ;;  %v3953_v3 = vcombine.high %v535_v55, %v539_v57 }
 0x1a6   : > { %3259 = vmatprep.subr.bf16.mxu0 %v4791_v0  ;;  %v5534_v56 = vpop.f32.mrb[24].mxu1 }
 0x1a7   : > { %v2472_v5 = vpop.f32.mrb[25].mxu1 }
 0x1a8   : > { %3007 = vmatmul.mubr.bf16.gmra.mrb[4].mxu0 %v3894_v46  ;;  %v5537_v13 = vpop.f32.mrb[26].mxu1  ;;  %v3926_v5 = vcombine.low %v510_v47, %v514_v48  ;;  %v559_v48 = vld [vmem:[#allocation5 + $0x2d8] sm:$0xff] }
 0x1a9   : > { %3014 = vmatprep.mubr.bf16.mxu0 %v3903_v61  ;;  %3260 = vmatpush1.bf16.msra.mxu0 %v5243_v15  ;;  %v2475_v62 = vpop.f32.mrb[27].mxu1  ;;  %v518_v61 = vld [vmem:[#allocation5 + $0x190] sm:$0xff] }
 0x1aa   : > { %3261 = vmatprep.subr.bf16.mxu0 %v4791_v0  ;;  %v3935_v6 = vcombine.high %v518_v61, %v522_v2  ;;  %v3952_v62 = vcombine.low %v535_v55, %v539_v57  ;;  %v546_v55 = vld [vmem:[#allocation5 + $0x270] sm:$0xff] }
 0x1ab   : > { %3320 = vmatmul.mubr.bf16.gmra.mrb[132].mxu1 %v3920_v4 }
 0x1ac   : > { %3327 = vmatprep.mubr.bf16.mxu1 %v3929_v11  ;;  %v547_v11 = vld [vmem:[#allocation5 + $0x278] sm:$0xff] }
 0x1ad   : > { %3262 = vmatpush1.bf16.msra.mxu0 %v5255_v22  ;;  %v3961_v20 = vcombine.high %v543_v8, %v547_v11 }
 0x1ae   : > { %3263 = vmatprep.subr.bf16.mxu0 %v4791_v0  ;;  %v5542_v15 = vpop.f32.mrb[28].mxu1 }
 0x1af   : > { %v2480_v25 = vpop.f32.mrb[29].mxu1 }
 0x1b0   : > { %3015 = vmatmul.mubr.bf16.gmra.mrb[8].mxu0 %v3902_v14  ;;  %v5545_v34 = vpop.f32.mrb[30].mxu1  ;;  %v3934_v25 = vcombine.low %v518_v61, %v522_v2  ;;  %v567_v2 = vld [vmem:[#allocation5 + $0x318] sm:$0xff] }
 0x1b1   : > { %3022 = vmatprep.mubr.bf16.mxu0 %v3911_v16  ;;  %3264 = vmatpush1.bf16.msra.mxu0 %v5286_v40  ;;  %v2483_v22 = vpop.f32.mrb[31].mxu1  ;;  %v526_v16 = vld [vmem:[#allocation5 + $0x1d0] sm:$0xff] }
 0x1b2   : > { %3265 = vmatprep.subr.bf16.mxu0 %v4791_v0  ;;  %v3943_v26 = vcombine.high %v526_v16, %v530_v19  ;;  %v3960_v22 = vcombine.low %v543_v8, %v547_v11  ;;  %v554_v8 = vld [vmem:[#allocation5 + $0x2b0] sm:$0xff] }
 0x1b3   : > { %3328 = vmatmul.mubr.bf16.gmra.mrb[136].mxu1 %v3928_v23 }
 0x1b4   : > { %3335 = vmatprep.mubr.bf16.mxu1 %v3937_v28  ;;  %v555_v28 = vld [vmem:[#allocation5 + $0x2b8] sm:$0xff] }
 0x1b5   : > { %3266 = vmatpush1.bf16.msra.mxu0 %v5298_v49  ;;  %v3969_v38 = vcombine.high %v551_v27, %v555_v28 }
 0x1b6   : > { %3267 = vmatprep.subr.bf16.mxu0 %v4791_v0  ;;  %v5550_v40 = vpop.f32.mrb[32].mxu1 }
 0x1b7   : > { %v2488_v44 = vpop.f32.mrb[33].mxu1 }
 0x1b8   : > { %3023 = vmatmul.mubr.bf16.gmra.mrb[12].mxu0 %v3910_v35  ;;  %v5553_v53 = vpop.f32.mrb[34].mxu1  ;;  %v3942_v44 = vcombine.low %v526_v16, %v530_v19  ;;  %v579_v19 = vld [vmem:[#allocation5 + $0x378] sm:$0xff] }
 0x1b9   : > { %3030 = vmatprep.mubr.bf16.mxu0 %v3919_v36  ;;  %3268 = vmatpush1.bf16.msra.mxu0 %v5327_v63  ;;  %v2491_v49 = vpop.f32.mrb[35].mxu1  ;;  %v534_v36 = vld [vmem:[#allocation5 + $0x210] sm:$0xff] }
 0x1ba   : > { %3269 = vmatprep.subr.bf16.mxu0 %v4791_v0  ;;  %v3951_v47 = vcombine.high %v534_v36, %v538_v37  ;;  %v3968_v49 = vcombine.low %v551_v27, %v555_v28  ;;  %v562_v27 = vld [vmem:[#allocation5 + $0x2f0] sm:$0xff] }
 0x1bb   : > { %3336 = vmatmul.mubr.bf16.gmra.mrb[140].mxu1 %v3936_v43 }
 0x1bc   : > { %3343 = vmatprep.mubr.bf16.mxu1 %v3945_v50  ;;  %v563_v50 = vld [vmem:[#allocation5 + $0x2f8] sm:$0xff] }
 0x1bd   : > { %3270 = vmatpush1.bf16.msra.mxu0 %v5339_v7  ;;  %v3977_v57 = vcombine.high %v559_v48, %v563_v50 }
 0x1be   : > { %3271 = vmatprep.subr.bf16.mxu0 %v4791_v0  ;;  %v5558_v63 = vpop.f32.mrb[36].mxu1 }
 0x1bf   : > { %v2496_v46 = vpop.f32.mrb[37].mxu1 }
 0x1c0   : > { %3031 = vmatmul.mubr.bf16.gmra.mrb[16].mxu0 %v3918_v32  ;;  %v5561_v4 = vpop.f32.mrb[38].mxu1  ;;  %v3950_v46 = vcombine.low %v534_v36, %v538_v37 }
 0x1c1   : > { %3038 = vmatprep.mubr.bf16.mxu0 %v3927_v54  ;;  %3272 = vmatpush1.bf16.msra.mxu0 %v5361_v24  ;;  %v2499_v7 = vpop.f32.mrb[39].mxu1  ;;  %v542_v54 = vld [vmem:[#allocation5 + $0x250] sm:$0xff] }
 0x1c2   : > { %3273 = vmatprep.subr.bf16.mxu0 %v4791_v0  ;;  %v3959_v61 = vcombine.high %v542_v54, %v546_v55 }
 0x1c3   : > { %3344 = vmatmul.mubr.bf16.gmra.mrb[144].mxu1 %v3944_v60 }
 0x1c4   : > { %3351 = vmatprep.mubr.bf16.mxu1 %v3953_v3  ;;  %v571_v3 = vld [vmem:[#allocation5 + $0x338] sm:$0xff] }
 0x1c5   : > { %3274 = vmatpush1.bf16.msra.mxu0 %v5368_v31  ;;  %v3985_v11 = vcombine.high %v567_v2, %v571_v3 }
 0x1c6   : > { %3275 = vmatprep.subr.bf16.mxu0 %v4791_v0  ;;  %v5566_v24 = vpop.f32.mrb[40].mxu1 }
 0x1c7   : > { %v2504_v14 = vpop.f32.mrb[41].mxu1 }
 0x1c8   : > { %3039 = vmatmul.mubr.bf16.gmra.mrb[20].mxu0 %v3926_v5  ;;  %v5569_v23 = vpop.f32.mrb[42].mxu1  ;;  %v3958_v14 = vcombine.low %v542_v54, %v546_v55 }
 0x1c9   : > { %3046 = vmatprep.mubr.bf16.mxu0 %v3935_v6  ;;  %3276 = vmatpush1.bf16.msra.mxu0 %v5377_v42  ;;  %v2507_v31 = vpop.f32.mrb[43].mxu1  ;;  %v550_v6 = vld [vmem:[#allocation5 + $0x290] sm:$0xff] }
 0x1ca   : > { %3277 = vmatprep.subr.bf16.mxu0 %v4791_v0  ;;  %v3967_v16 = vcombine.high %v550_v6, %v554_v8  ;;  %v3984_v31 = vcombine.low %v567_v2, %v571_v3  ;;  %v3966_v36 = vcombine.low %v550_v6, %v554_v8  ;;  %v578_v6 = vld [vmem:[#allocation5 + $0x370] sm:$0xff] }
 0x1cb   : > { %3352 = vmatmul.mubr.bf16.gmra.mrb[148].mxu1 %v3952_v62 }
 0x1cc   : > { %3359 = vmatprep.mubr.bf16.mxu1 %v3961_v20 }
 0x1cd   : > { %3278 = vmatpush1.bf16.msra.mxu0 %v5382_v51 }
 0x1ce   : > { %3279 = vmatprep.subr.bf16.mxu0 %v4791_v0  ;;  %v5574_v42 = vpop.f32.mrb[44].mxu1 }
 0x1cf   : > { %v2512_v35 = vpop.f32.mrb[45].mxu1 }
 0x1d0   : > { %3047 = vmatmul.mubr.bf16.gmra.mrb[24].mxu0 %v3934_v25  ;;  %v5577_v43 = vpop.f32.mrb[46].mxu1 }
 0x1d1   : > { %3054 = vmatprep.mubr.bf16.mxu0 %v3943_v26  ;;  %3280 = vmatpush1.bf16.msra.mxu0 %v5389_v58  ;;  %v2515_v51 = vpop.f32.mrb[47].mxu1  ;;  %v558_v26 = vld [vmem:[#allocation5 + $0x2d0] sm:$0xff] }
 0x1d2   : > { %3281 = vmatprep.subr.bf16.mxu0 %v4791_v0  ;;  %v3975_v37 = vcombine.high %v558_v26, %v562_v27  ;;  %v587_v51 = vld [vmem:[#allocation5 + $0x3b8] sm:$0xff] }
 0x1d3   : > { %3360 = vmatmul.mubr.bf16.gmra.mrb[152].mxu1 %v3960_v22 }
 0x1d4   : > { %3367 = vmatprep.mubr.bf16.mxu1 %v3969_v38  ;;  %v583_v38 = vld [vmem:[#allocation5 + $0x398] sm:$0xff] }
 0x1d5   : > { %3282 = vmatpush1.bf16.msra.mxu0 %v5394_v1  ;;  %v4000_v3 = vcombine.low %v583_v38, %v587_v51 }
 0x1d6   : > { %3283 = vmatprep.subr.bf16.mxu0 %v4791_v0  ;;  %v5582_v58 = vpop.f32.mrb[48].mxu1 }
 0x1d7   : > { %v2520_v32 = vpop.f32.mrb[49].mxu1 }
 0x1d8   : > { %3055 = vmatmul.mubr.bf16.gmra.mrb[28].mxu0 %v3942_v44  ;;  %v5585_v60 = vpop.f32.mrb[50].mxu1  ;;  %v4001_v32 = vcombine.high %v583_v38, %v587_v51 }
 0x1d9   : > { %3062 = vmatprep.mubr.bf16.mxu0 %v3951_v47  ;;  %3284 = vmatpush1.bf16.msra.mxu0 %v5401_v10  ;;  %v2523_v1 = vpop.f32.mrb[51].mxu1  ;;  %v3976_v10 = vcombine.low %v559_v48, %v563_v50  ;;  %v566_v50 = vld [vmem:[#allocation5 + $0x310] sm:$0xff] }
 0x1da   : > { %3285 = vmatprep.subr.bf16.mxu0 %v4791_v0 }
 0x1db   : > { %3368 = vmatmul.mubr.bf16.gmra.mrb[156].mxu1 %v3968_v49  ;;  %v570_v49 = vld [vmem:[#allocation5 + $0x330] sm:$0xff] }
 0x1dc   : > { %3375 = vmatprep.mubr.bf16.mxu1 %v3977_v57  ;;  %v3974_v57 = vcombine.low %v558_v26, %v562_v27  ;;  %v3983_v1 = vcombine.high %v566_v50, %v570_v49  ;;  %v582_v27 = vld [vmem:[#allocation5 + $0x390] sm:$0xff] }
 0x1dd   : > { %3286 = vmatpush1.bf16.msra.mxu0 %v5406_v17  ;;  %v575_v17 = vld [vmem:[#allocation5 + $0x358] sm:$0xff] }
 0x1de   : > { %v5589_v7 = vpop.f32.mrb[52].mxu1  ;;  %v3993_v28 = vcombine.high %v575_v17, %v579_v19  ;;  %v3992_v47 = vcombine.low %v575_v17, %v579_v19  ;;  %v599_v17 = vld [vmem:[#allocation5 + $0x418] sm:$0xff] }
 0x1df   : > { %v2528_v5 = vpop.f32.mrb[53].mxu1  ;;  %v603_v19 = vld [vmem:[#allocation5 + $0x438] sm:$0xff] }
 0x1e0   : > { %3063 = vmatmul.mubr.bf16.gmra.mrb[32].mxu0 %v3950_v46  ;;  %v5591_v62 = vpop.f32.mrb[54].mxu1  ;;  %v591_v46 = vld [vmem:[#allocation5 + $0x3d8] sm:$0xff]  ;;  %v574_v5 = vld [vmem:[#allocation5 + $0x350] sm:$0xff] }
 0x1e1   : > { %3070 = vmatprep.mubr.bf16.mxu0 %v3959_v61  ;;  %v2531_v0 = vpop.f32.mrb[55].mxu1  ;;  %v595_v61 = vld [vmem:[#allocation5 + $0x3f8] sm:$0xff]  ;;  %v3990_v38 = vcombine.low %v574_v5, %v578_v6 }
 0x1e2   : > { %v4009_v8 = vcombine.high %v591_v46, %v595_v61 }
 0x1e3   : > { %3376 = vmatmul.mubr.bf16.gmra.mrb[160].mxu1 %v3976_v10 }
 0x1e4   : > { %3383 = vmatprep.mubr.bf16.mxu1 %v3985_v11 }
 0x1e6   : > { %v5593_v20 = vpop.f32.mrb[56].mxu1 }
 0x1e7   : > { %6057 = vst [vmem:[#allocation17_spill] sm:$0xff] %v5593_v20  ;;  %v2536_v25 = vpop.f32.mrb[57].mxu1 }
 0x1e8   : > { %3071 = vmatmul.mubr.bf16.gmra.mrb[36].mxu0 %v3958_v14  ;;  %v5595_v22 = vpop.f32.mrb[58].mxu1  ;;  %v3982_v14 = vcombine.low %v566_v50, %v570_v49  ;;  %v4008_v25 = vcombine.low %v591_v46, %v595_v61  ;;  %v4016_v49 = vcombine.low %v599_v17, %v603_v19 }
 0x1e9   : > { %3078 = vmatprep.mubr.bf16.mxu0 %v3967_v16  ;;  %6058 = vst [vmem:[#allocation18_spill] sm:$0xff] %v5595_v22  ;;  %v2539_v35 = vpop.f32.mrb[59].mxu1  ;;  %v3991_v16 = vcombine.high %v574_v5, %v578_v6  ;;  %v615_v5 = vld [vmem:[#allocation5 + $0x498] sm:$0xff] }
 0x1ea   : > { %v4017_v35 = vcombine.high %v599_v17, %v603_v19  ;;  %v619_v6 = vld [vmem:[#allocation5 + $0x4b8] sm:$0xff]  ;;  %v602_v17 = vld [vmem:[#allocation5 + $0x430] sm:$0xff] }
 0x1eb   : > { %3384 = vmatmul.mubr.bf16.gmra.mrb[164].mxu1 %v3984_v31  ;;  %v4033_v19 = vcombine.high %v615_v5, %v619_v6 }
 0x1ec   : > { %3391 = vmatprep.mubr.bf16.mxu1 %v3993_v28  ;;  %v586_v28 = vld [vmem:[#allocation5 + $0x3b0] sm:$0xff] }
 0x1ed   : > { %v3999_v51 = vcombine.high %v582_v27, %v586_v28 }
 0x1ee   : > { %v5597_v44 = vpop.f32.mrb[60].mxu1 }
 0x1ef   : > { %6059 = vst [vmem:[#allocation19_spill] sm:$0xff] %v5597_v44  ;;  %v2544_v48 = vpop.f32.mrb[61].mxu1 }
 0x1f0   : > { %3079 = vmatmul.mubr.bf16.gmra.mrb[40].mxu0 %v3966_v36  ;;  %v5599_v54 = vpop.f32.mrb[62].mxu1  ;;  %v611_v48 = vld [vmem:[#allocation5 + $0x478] sm:$0xff] }
 0x1f1   : > { %3086 = vmatprep.mubr.bf16.mxu0 %v3975_v37  ;;  %6060 = vst [vmem:[#allocation20_spill] sm:$0xff] %v5599_v54  ;;  %v2547_v55 = vpop.f32.mrb[63].mxu1 }
 0x1f2   : > { %v590_v55 = vld [vmem:[#allocation5 + $0x3d0] sm:$0xff] }
 0x1f3   : > { %3392 = vmatmul.mubr.bf16.gmra.mrb[168].mxu1 %v3992_v47  ;;  %v607_v47 = vld [vmem:[#allocation5 + $0x458] sm:$0xff] }
 0x1f4   : > { %3399 = vmatprep.mubr.bf16.mxu1 %v4001_v32 }
 0x1f6   : > { %v5601_v2 = vpop.f32.mrb[64].mxu1 }
 0x1f7   : > { %6061 = vst [vmem:[#allocation21_spill] sm:$0xff] %v5601_v2  ;;  %v2552_v10 = vpop.f32.mrb[65].mxu1 }
 0x1f8   : > { %3087 = vmatmul.mubr.bf16.gmra.mrb[44].mxu0 %v3974_v57  ;;  %v5603_v11 = vpop.f32.mrb[66].mxu1  ;;  %v594_v57 = vld [vmem:[#allocation5 + $0x3f0] sm:$0xff] }
 0x1f9   : > { %3094 = vmatprep.mubr.bf16.mxu0 %v3983_v1  ;;  %6062 = vst [vmem:[#allocation22_spill] sm:$0xff] %v5603_v11  ;;  %v2555_v0 = vpop.f32.mrb[67].mxu1  ;;  %v4025_v1 = vcombine.high %v607_v47, %v611_v48  ;;  %v4007_v10 = vcombine.high %v590_v55, %v594_v57 }
 0x1fa   : > { %v4024_v0 = vcombine.low %v607_v47, %v611_v48  ;;  %v606_v47 = vld [vmem:[#allocation5 + $0x450] sm:$0xff] }
 0x1fb   : > { %3400 = vmatmul.mubr.bf16.gmra.mrb[172].mxu1 %v4000_v3  ;;  %v3998_v3 = vcombine.low %v582_v27, %v586_v28  ;;  %v623_v27 = vld [vmem:[#allocation5 + $0x4d8] sm:$0xff]  ;;  %v610_v48 = vld [vmem:[#allocation5 + $0x470] sm:$0xff] }
 0x1fc   : > { %3407 = vmatprep.mubr.bf16.mxu1 %v4009_v8  ;;  %v627_v28 = vld [vmem:[#allocation5 + $0x4f8] sm:$0xff] }
 0x1fe   : > { %v5605_v31 = vpop.f32.mrb[68].mxu1 }
 0x1ff   : > { %6063 = vst [vmem:[#allocation23_spill] sm:$0xff] %v5605_v31  ;;  %v2560_v26 = vpop.f32.mrb[69].mxu1 }
 0x200   : > { %3095 = vmatmul.mubr.bf16.gmra.mrb[48].mxu0 %v3982_v14  ;;  %v5607_v36 = vpop.f32.mrb[70].mxu1 }
 0x201   : > { %3102 = vmatprep.mubr.bf16.mxu0 %v3991_v16  ;;  %6064 = vst [vmem:[#allocation24_spill] sm:$0xff] %v5607_v36  ;;  %v2563_v37 = vpop.f32.mrb[71].mxu1  ;;  %v598_v16 = vld [vmem:[#allocation5 + $0x410] sm:$0xff] }
 0x202   : > { %v4015_v37 = vcombine.high %v598_v16, %v602_v17 }
 0x203   : > { %3408 = vmatmul.mubr.bf16.gmra.mrb[176].mxu1 %v4008_v25 }
 0x204   : > { %3415 = vmatprep.mubr.bf16.mxu1 %v4017_v35  ;;  %v4006_v35 = vcombine.low %v590_v55, %v594_v57  ;;  %v631_v55 = vld [vmem:[#allocation5 + $0x518] sm:$0xff] }
 0x205   : > { %v635_v57 = vld [vmem:[#allocation5 + $0x538] sm:$0xff] }
 0x206   : > { %v5609_v50 = vpop.f32.mrb[72].mxu1 }
 0x207   : > { %6065 = vst [vmem:[#allocation25_spill] sm:$0xff] %v5609_v50  ;;  %v2568_v32 = vpop.f32.mrb[73].mxu1 }
 0x208   : > { %3103 = vmatmul.mubr.bf16.gmra.mrb[52].mxu0 %v3990_v38  ;;  %v5611_v46 = vpop.f32.mrb[74].mxu1  ;;  %v4041_v32 = vcombine.high %v623_v27, %v627_v28 }
 0x209   : > { %3110 = vmatprep.mubr.bf16.mxu0 %v3999_v51  ;;  %6066 = vst [vmem:[#allocation26_spill] sm:$0xff] %v5611_v46  ;;  %v2571_v61 = vpop.f32.mrb[75].mxu1  ;;  %v4032_v51 = vcombine.low %v615_v5, %v619_v6  ;;  %v614_v5 = vld [vmem:[#allocation5 + $0x490] sm:$0xff] }
 0x20a   : > { %v618_v6 = vld [vmem:[#allocation5 + $0x4b0] sm:$0xff] }
 0x20b   : > { %3416 = vmatmul.mubr.bf16.gmra.mrb[180].mxu1 %v4016_v49  ;;  %v4030_v33 = vcombine.low %v614_v5, %v618_v6 }
 0x20c   : > { %3423 = vmatprep.mubr.bf16.mxu1 %v4025_v1 }
 0x20e   : > { %v5613_v8 = vpop.f32.mrb[76].mxu1 }
 0x20f   : > { %6067 = vst [vmem:[#allocation27_spill] sm:$0xff] %v5613_v8  ;;  %v2576_v14 = vpop.f32.mrb[77].mxu1 }
 0x210   : > { %3111 = vmatmul.mubr.bf16.gmra.mrb[56].mxu0 %v3998_v3  ;;  %v5615_v25 = vpop.f32.mrb[78].mxu1  ;;  %v4014_v3 = vcombine.low %v598_v16, %v602_v17  ;;  %v4040_v14 = vcombine.low %v623_v27, %v627_v28  ;;  %v639_v16 = vld [vmem:[#allocation5 + $0x558] sm:$0xff]  ;;  %v622_v27 = vld [vmem:[#allocation5 + $0x4d0] sm:$0xff] }
 0x211   : > { %3118 = vmatprep.mubr.bf16.mxu0 %v4007_v10  ;;  %6068 = vst [vmem:[#allocation28_spill] sm:$0xff] %v5615_v25  ;;  %v2579_v26 = vpop.f32.mrb[79].mxu1  ;;  %v4023_v10 = vcombine.high %v606_v47, %v610_v48  ;;  %v643_v17 = vld [vmem:[#allocation5 + $0x578] sm:$0xff]  ;;  %v626_v28 = vld [vmem:[#allocation5 + $0x4f0] sm:$0xff] }
 0x212   : > { %v4049_v26 = vcombine.high %v631_v55, %v635_v57  ;;  %v4038_v30 = vcombine.low %v622_v27, %v626_v28 }
 0x213   : > { %3424 = vmatmul.mubr.bf16.gmra.mrb[184].mxu1 %v4024_v0 }
 0x214   : > { %3431 = vmatprep.mubr.bf16.mxu1 %v4033_v19 }
 0x216   : > { %v5617_v38 = vpop.f32.mrb[80].mxu1 }
 0x217   : > { %6069 = vst [vmem:[#allocation29_spill] sm:$0xff] %v5617_v38  ;;  %v2584_v49 = vpop.f32.mrb[81].mxu1 }
 0x218   : > { %3119 = vmatmul.mubr.bf16.gmra.mrb[60].mxu0 %v4006_v35  ;;  %v5619_v1 = vpop.f32.mrb[82].mxu1  ;;  %v4022_v49 = vcombine.low %v606_v47, %v610_v48  ;;  %v647_v47 = vld [vmem:[#allocation5 + $0x598] sm:$0xff] }
 0x219   : > { %3126 = vmatprep.mubr.bf16.mxu0 %v4015_v37  ;;  %6070 = vst [vmem:[#allocation30_spill] sm:$0xff] %v5619_v1  ;;  %v2587_v61 = vpop.f32.mrb[83].mxu1  ;;  %v651_v48 = vld [vmem:[#allocation5 + $0x5b8] sm:$0xff] }
 0x21a   : > { %v4031_v61 = vcombine.high %v614_v5, %v618_v6  ;;  %v655_v5 = vld [vmem:[#allocation5 + $0x5d8] sm:$0xff] }
 0x21b   : > { %3432 = vmatmul.mubr.bf16.gmra.mrb[188].mxu1 %v4032_v51  ;;  %v659_v6 = vld [vmem:[#allocation5 + $0x5f8] sm:$0xff] }
 0x21c   : > { %3439 = vmatprep.mubr.bf16.mxu1 %v4041_v32  ;;  %v4048_v32 = vcombine.low %v631_v55, %v635_v57  ;;  %v630_v55 = vld [vmem:[#allocation5 + $0x510] sm:$0xff] }
 0x21d   : > { %v634_v57 = vld [vmem:[#allocation5 + $0x530] sm:$0xff] }
 0x21e   : > { %v5621_v0 = vpop.f32.mrb[84].mxu1 }
 0x21f   : > { %6071 = vst [vmem:[#allocation31_spill] sm:$0xff] %v5621_v0  ;;  %v2592_v19 = vpop.f32.mrb[85].mxu1  ;;  %v719_v0 = vld [vmem:[#allocation5 + $0x7d8] sm:$0xff] }
 0x220   : > { %3127 = vmatmul.mubr.bf16.gmra.mrb[64].mxu0 %v4014_v3  ;;  %v5623_v35 = vpop.f32.mrb[86].mxu1 }
 0x221   : > { %3134 = vmatprep.mubr.bf16.mxu0 %v4023_v10  ;;  %6072 = vst [vmem:[#allocation32_spill] sm:$0xff] %v5623_v35  ;;  %v2595_v37 = vpop.f32.mrb[87].mxu1  ;;  %v4057_v10 = vcombine.high %v639_v16, %v643_v17  ;;  %v715_v35 = vld [vmem:[#allocation5 + $0x7b8] sm:$0xff] }
 0x222   : > { %v4039_v37 = vcombine.high %v622_v27, %v626_v28  ;;  %v642_v27 = vld [vmem:[#allocation5 + $0x570] sm:$0xff]  ;;  %v4073_v28 = vcombine.high %v655_v5, %v659_v6 }
 0x223   : > { %3440 = vmatmul.mubr.bf16.gmra.mrb[192].mxu1 %v4040_v14 }
 0x224   : > { %3447 = vmatprep.mubr.bf16.mxu1 %v4049_v26  ;;  %v4056_v26 = vcombine.low %v639_v16, %v643_v17  ;;  %v3644_v16 = vld [vmem:[%s6032_s4] sm:$0xff]  ;;  %v638_v17 = vld [vmem:[#allocation5 + $0x550] sm:$0xff] }
 0x225   : > { %3648 = vperm.xlu0 %4631, %v3644_v16  }
 0x226   : > { %v5625_v51 = vpop.f32.mrb[88].mxu1 }
 0x227   : > { %6073 = vst [vmem:[#allocation33_spill] sm:$0xff] %v5625_v51  ;;  %v2600_v3 = vpop.f32.mrb[89].mxu1 }
 0x228   : > { %3135 = vmatmul.mubr.bf16.gmra.mrb[68].mxu0 %v4022_v49  ;;  %v5627_v19 = vpop.f32.mrb[90].mxu1 }
 0x229   : > { %3142 = vmatprep.mubr.bf16.mxu0 %v4031_v61  ;;  %6074 = vst [vmem:[#allocation34_spill] sm:$0xff] %v5627_v19  ;;  %v2603_v45 = vpop.f32.mrb[91].mxu1  ;;  %v4065_v61 = vcombine.high %v647_v47, %v651_v48  ;;  %v682_v19 = vld [vmem:[#allocation5 + $0x6b0] sm:$0xff] }
 0x22a   : > { %v4047_v45 = vcombine.high %v630_v55, %v634_v57 }
 0x22b   : > { %3448 = vmatmul.mubr.bf16.gmra.mrb[196].mxu1 %v4048_v32 }
 0x22c   : > { %3455 = vmatprep.mubr.bf16.mxu1 %v4057_v10 }
 0x22e   : > { %v5629_v14 = vpop.f32.mrb[92].mxu1 }
 0x22f   : > { %6075 = vst [vmem:[#allocation35_spill] sm:$0xff] %v5629_v14  ;;  %v2608_v49 = vpop.f32.mrb[93].mxu1  ;;  %v699_v14 = vld [vmem:[#allocation5 + $0x738] sm:$0xff] }
 0x230   : > { %3143 = vmatmul.mubr.bf16.gmra.mrb[72].mxu0 %v4030_v33  ;;  %v5631_v3 = vpop.f32.mrb[94].mxu1  ;;  %v4064_v33 = vcombine.low %v647_v47, %v651_v48  ;;  %v4055_v49 = vcombine.high %v638_v17, %v642_v27  ;;  %v663_v47 = vld [vmem:[#allocation5 + $0x618] sm:$0xff] }
 0x231   : > { %3150 = vmatprep.mubr.bf16.mxu0 %v4039_v37  ;;  %6076 = vst [vmem:[#allocation36_spill] sm:$0xff] %v5631_v3  ;;  %v2611_v39 = vpop.f32.mrb[95].mxu1  ;;  %v667_v48 = vld [vmem:[#allocation5 + $0x638] sm:$0xff] }
 0x232   : > { %v3645_v39 = vld [vmem:[%s6032_s4 + $0x8] sm:$0xff] }
 0x233   : > { %3456 = vmatmul.mubr.bf16.gmra.mrb[200].mxu1 %v4056_v26  ;;  %3653 = vperm.xlu1 %4632, %v3645_v39   ;;  %v4046_v26 = vcombine.low %v630_v55, %v634_v57  ;;  %v4054_v39 = vcombine.low %v638_v17, %v642_v27  ;;  %v671_v55 = vld [vmem:[#allocation5 + $0x658] sm:$0xff]  ;;  %v4062_v17 = vcombine.low %v646_v18, %v650_v9 }
 0x234   : > { %3463 = vmatprep.mubr.bf16.mxu1 %v4065_v61  ;;  %v675_v57 = vld [vmem:[#allocation5 + $0x678] sm:$0xff] }
 0x236   : > { %v5633_v32 = vpop.f32.mrb[96].mxu1 }
 0x237   : > { %6077 = vst [vmem:[#allocation37_spill] sm:$0xff] %v5633_v32  ;;  %v2616_v10 = vpop.f32.mrb[97].mxu1  ;;  %v4081_v32 = vcombine.high %v663_v47, %v667_v48 }
 0x238   : > { %3151 = vmatmul.mubr.bf16.gmra.mrb[76].mxu0 %v4038_v30  ;;  %v5641_v37 = vpop.f32.mrb[98].mxu1 }
 0x239   : > { %3158 = vmatprep.mubr.bf16.mxu0 %v4047_v45  ;;  %6078 = vst [vmem:[#allocation38_spill] sm:$0xff] %v5641_v37  ;;  %v2619_v30 = vpop.f32.mrb[99].mxu1  ;;  %v4072_v45 = vcombine.low %v655_v5, %v659_v6  ;;  %v654_v5 = vld [vmem:[#allocation5 + $0x5d0] sm:$0xff] }
 0x23a   : > { %v4063_v30 = vcombine.high %v646_v18, %v650_v9  ;;  %v658_v6 = vld [vmem:[#allocation5 + $0x5f0] sm:$0xff] }
 0x23b   : > { %3464 = vmatmul.mubr.bf16.gmra.mrb[204].mxu1 %v4064_v33  ;;  %v4071_v27 = vcombine.high %v654_v5, %v658_v6 }
 0x23c   : > { %3471 = vmatprep.mubr.bf16.mxu1 %v4073_v28  ;;  %v4080_v28 = vcombine.low %v663_v47, %v667_v48  ;;  %v4088_v47 = vcombine.low %v671_v55, %v675_v57 }
 0x23e   : > { %v5643_v61 = vpop.f32.mrb[100].mxu1 }
 0x23f   : > { %6079 = vst [vmem:[#allocation39_spill] sm:$0xff] %v5643_v61  ;;  %v2624_v10 = vpop.f32.mrb[101].mxu1 }
 0x240   : > { %3159 = vmatmul.mubr.bf16.gmra.mrb[80].mxu0 %v4046_v26  ;;  %v5645_v3 = vpop.f32.mrb[102].mxu1 }
 0x241   : > { %3166 = vmatprep.mubr.bf16.mxu0 %v4055_v49  ;;  %6080 = vst [vmem:[#allocation40_spill] sm:$0xff] %v5645_v3  ;;  %v2627_v16 = vpop.f32.mrb[103].mxu1  ;;  %v4089_v49 = vcombine.high %v671_v55, %v675_v57  ;;  %v5651_v3 = vpop.permute.xlu0 %870 }
 0x242   : > { %v683_v16 = vld [vmem:[#allocation5 + $0x6b8] sm:$0xff] }
 0x243   : > { %3472 = vmatmul.mubr.bf16.gmra.mrb[208].mxu1 %v4072_v45  ;;  %v679_v45 = vld [vmem:[#allocation5 + $0x698] sm:$0xff] }
 0x244   : > { %3479 = vmatprep.mubr.bf16.mxu1 %v4081_v32  ;;  %v5653_v32 = vpop.permute.xlu1 %790  ;;  %v4096_v57 = vcombine.low %v679_v45, %v683_v16 }
 0x245   : > { %6083 = vst [vmem:[#allocation43_spill] sm:$0xff] %v5653_v32  ;;  %v691_v32 = vld [vmem:[#allocation5 + $0x6f8] sm:$0xff] }
 0x246   : > { %v5647_v33 = vpop.f32.mrb[104].mxu1 }
 0x247   : > { %6081 = vst [vmem:[#allocation41_spill] sm:$0xff] %v5647_v33  ;;  %v2632_v26 = vpop.f32.mrb[105].mxu1 }
 0x248   : > { %3167 = vmatmul.mubr.bf16.gmra.mrb[84].mxu0 %v4054_v39  ;;  %v5649_v10 = vpop.f32.mrb[106].mxu1  ;;  %v662_v26 = vld [vmem:[#allocation5 + $0x610] sm:$0xff]  ;;  %v5661_v18 = vpop.permute.xlu1 %795 }
 0x249   : > { %3174 = vmatprep.mubr.bf16.mxu0 %v4063_v30  ;;  %6082 = vst [vmem:[#allocation42_spill] sm:$0xff] %v5649_v10  ;;  %v2635_v61 = vpop.f32.mrb[107].mxu1  ;;  %v5657_v30 = vpop.permute.xlu0 %875  ;;  %v4097_v10 = vcombine.high %v679_v45, %v683_v16  ;;  %6086 = vst [vmem:[#allocation46_spill] sm:$0xff] %v5661_v18 }
 0x24a   : > { %v666_v61 = vld [vmem:[#allocation5 + $0x630] sm:$0xff] }
 0x24b   : > { %3480 = vmatmul.mubr.bf16.gmra.mrb[212].mxu1 %v4080_v28  ;;  %v4070_v28 = vcombine.low %v654_v5, %v658_v6  ;;  %v4078_v6 = vcombine.low %v662_v26, %v666_v61 }
 0x24c   : > { %3487 = vmatprep.mubr.bf16.mxu1 %v4089_v49  ;;  %v4079_v49 = vcombine.high %v662_v26, %v666_v61 }
 0x24e   : > { %v5655_v39 = vpop.f32.mrb[108].mxu1 }
 0x24f   : > { %6084 = vst [vmem:[#allocation44_spill] sm:$0xff] %v5655_v39  ;;  %v2640_v48 = vpop.f32.mrb[109].mxu1  ;;  %v5663_v39 = vpop.permute.xlu0 %880 }
 0x250   : > { %3175 = vmatmul.mubr.bf16.gmra.mrb[88].mxu0 %v4062_v17  ;;  %v5659_v33 = vpop.f32.mrb[110].mxu1  ;;  %v687_v17 = vld [vmem:[#allocation5 + $0x6d8] sm:$0xff]  ;;  %v5667_v48 = vpop.permute.xlu1 %885 }
 0x251   : > { %3182 = vmatprep.mubr.bf16.mxu0 %v4071_v27  ;;  %6085 = vst [vmem:[#allocation45_spill] sm:$0xff] %v5659_v33  ;;  %v2643_v9 = vpop.f32.mrb[111].mxu1  ;;  %v670_v33 = vld [vmem:[#allocation5 + $0x650] sm:$0xff]  ;;  %v4105_v37 = vcombine.high %v687_v17, %v691_v32  ;;  %v4104_v16 = vcombine.low %v687_v17, %v691_v32 }
 0x252   : > { %v674_v9 = vld [vmem:[#allocation5 + $0x670] sm:$0xff] }
 0x253   : > { %3488 = vmatmul.mubr.bf16.gmra.mrb[216].mxu1 %v4088_v47  ;;  %v5671_v47 = vpop.permute.xlu0 %800 }
 0x254   : > { %3495 = vmatprep.mubr.bf16.mxu1 %v4097_v10  ;;  %v4087_v10 = vcombine.high %v670_v33, %v674_v9  ;;  %6089 = vst [vmem:[#allocation49_spill] sm:$0xff] %v5671_v47 }
 0x256   : > { %v5665_v55 = vpop.f32.mrb[112].mxu1 }
 0x257   : > { %6087 = vst [vmem:[#allocation47_spill] sm:$0xff] %v5665_v55  ;;  %v2648_v27 = vpop.f32.mrb[113].mxu1  ;;  %v5673_v55 = vpop.permute.xlu1 %805 }
 0x258   : > { %3183 = vmatmul.mubr.bf16.gmra.mrb[92].mxu0 %v4070_v28  ;;  %v5669_v18 = vpop.f32.mrb[114].mxu1  ;;  %v695_v28 = vld [vmem:[#allocation5 + $0x718] sm:$0xff]  ;;  %6090 = vst [vmem:[#allocation50_spill] sm:$0xff] %v5673_v55  ;;  %v678_v27 = vld [vmem:[#allocation5 + $0x690] sm:$0xff]  ;;  %v5679_v61 = vpop.permute.xlu0 %890 }
 0x259   : > { %3190 = vmatprep.mubr.bf16.mxu0 %v4079_v49  ;;  %6088 = vst [vmem:[#allocation48_spill] sm:$0xff] %v5669_v18  ;;  %v2651_v5 = vpop.f32.mrb[115].mxu1  ;;  %v4113_v18 = vcombine.high %v695_v28, %v699_v14  ;;  %v707_v55 = vld [vmem:[#allocation5 + $0x778] sm:$0xff]  ;;  %v4112_v32 = vcombine.low %v695_v28, %v699_v14  ;;  %v4094_v51 = vcombine.low %v678_v27, %v682_v19 }
 0x25b   : > { %3496 = vmatmul.mubr.bf16.gmra.mrb[220].mxu1 %v4096_v57  ;;  %v4086_v57 = vcombine.low %v670_v33, %v674_v9  ;;  %v5681_v47 = vpop.permute.xlu1 %895 }
 0x25c   : > { %3503 = vmatprep.mubr.bf16.mxu1 %v4105_v37  ;;  %v4095_v37 = vcombine.high %v678_v27, %v682_v19 }
 0x25e   : > { %v5675_v45 = vpop.f32.mrb[116].mxu1 }
 0x25f   : > { %6091 = vst [vmem:[#allocation51_spill] sm:$0xff] %v5675_v45  ;;  %v2656_v49 = vpop.f32.mrb[117].mxu1 }
 0x260   : > { %3191 = vmatmul.mubr.bf16.gmra.mrb[96].mxu0 %v4078_v6  ;;  %v5677_v5 = vpop.f32.mrb[118].mxu1  ;;  %v703_v6 = vld [vmem:[#allocation5 + $0x758] sm:$0xff]  ;;  %v5685_v49 = vpop.permute.xlu0 %810 }
 0x261   : > { %3198 = vmatprep.mubr.bf16.mxu0 %v4087_v10  ;;  %6092 = vst [vmem:[#allocation52_spill] sm:$0xff] %v5677_v5  ;;  %v2659_v26 = vpop.f32.mrb[119].mxu1  ;;  %6094 = vst [vmem:[#allocation54_spill] sm:$0xff] %v5685_v49  ;;  %v686_v5 = vld [vmem:[#allocation5 + $0x6d0] sm:$0xff]  ;;  %v4121_v33 = vcombine.high %v703_v6, %v707_v55 }
 0x262   : > { %v690_v26 = vld [vmem:[#allocation5 + $0x6f0] sm:$0xff] }
 0x263   : > { %3504 = vmatmul.mubr.bf16.gmra.mrb[224].mxu1 %v4104_v16  ;;  %v5689_v16 = vpop.permute.xlu1 %815  ;;  %v694_v49 = vld [vmem:[#allocation5 + $0x710] sm:$0xff] }
 0x264   : > { %3511 = vmatprep.mubr.bf16.mxu1 %v4113_v18  ;;  %6096 = vst [vmem:[#allocation56_spill] sm:$0xff] %v5689_v16  ;;  %v4103_v18 = vcombine.high %v686_v5, %v690_v26 }
 0x266   : > { %v5683_v10 = vpop.f32.mrb[120].mxu1 }
 0x267   : > { %6093 = vst [vmem:[#allocation53_spill] sm:$0xff] %v5683_v10  ;;  %v2664_v17 = vpop.f32.mrb[121].mxu1  ;;  %v5691_v10 = vpop.permute.xlu0 %900 }
 0x268   : > { %3199 = vmatmul.mubr.bf16.gmra.mrb[100].mxu0 %v4086_v57  ;;  %v5687_v45 = vpop.f32.mrb[122].mxu1  ;;  %v711_v57 = vld [vmem:[#allocation5 + $0x798] sm:$0xff]  ;;  %v5695_v17 = vpop.permute.xlu1 %905 }
 0x269   : > { %3206 = vmatprep.mubr.bf16.mxu0 %v4095_v37  ;;  %6095 = vst [vmem:[#allocation55_spill] sm:$0xff] %v5687_v45  ;;  %v2667_v9 = vpop.f32.mrb[123].mxu1  ;;  %v4120_v37 = vcombine.low %v703_v6, %v707_v55  ;;  %v4129_v19 = vcombine.high %v711_v57, %v715_v35  ;;  %v4128_v6 = vcombine.low %v711_v57, %v715_v35  ;;  %v710_v35 = vld [vmem:[#allocation5 + $0x790] sm:$0xff] }
 0x26a   : > { %v698_v9 = vld [vmem:[#allocation5 + $0x730] sm:$0xff] }
 0x26b   : > { %3512 = vmatmul.mubr.bf16.gmra.mrb[228].mxu1 %v4112_v32  ;;  %v4102_v32 = vcombine.low %v686_v5, %v690_v26  ;;  %v821_v16 = vpop.permute.xlu0 %820  ;;  %v4110_v5 = vcombine.low %v694_v49, %v698_v9  ;;  %v714_v57 = vld [vmem:[#allocation5 + $0x7b0] sm:$0xff] }
 0x26c   : > { %3519 = vmatprep.mubr.bf16.mxu1 %v4121_v33  ;;  %v4111_v33 = vcombine.high %v694_v49, %v698_v9  ;;  %v826_v1 = vpop.permute.xlu1 %825  ;;  %v4127_v36 = vcombine.high %v710_v35, %v714_v57  ;;  %v4126_v31 = vcombine.low %v710_v35, %v714_v57 }
 0x26e   : > { %v5693_v14 = vpop.f32.mrb[124].mxu1 }
 0x26f   : > { %6097 = vst [vmem:[#allocation57_spill] sm:$0xff] %v5693_v14  ;;  %v2672_v28 = vpop.f32.mrb[125].mxu1  ;;  %v706_v14 = vld [vmem:[#allocation5 + $0x770] sm:$0xff]  ;;  %v5699_v8 = vpop.permute.xlu0 %910 }
 0x270   : > { %3207 = vmatmul.mubr.bf16.gmra.mrb[104].mxu0 %v4094_v51  ;;  %v5697_v45 = vpop.f32.mrb[126].mxu1  ;;  %v723_v51 = vld [vmem:[#allocation5 + $0x7f8] sm:$0xff]  ;;  %v702_v28 = vld [vmem:[#allocation5 + $0x750] sm:$0xff] }
 0x271   : > { %3214 = vmatprep.mubr.bf16.mxu0 %v4103_v18  ;;  %6098 = vst [vmem:[#allocation58_spill] sm:$0xff] %v5697_v45  ;;  %v2675_v27 = vpop.f32.mrb[127].mxu1  ;;  %v4137_v25 = vcombine.high %v719_v0, %v723_v51  ;;  %v4119_v26 = vcombine.high %v702_v28, %v706_v14 }
 0x273   : > { %3520 = vmatmul.mubr.bf16.gmra.mrb[232].mxu1 %v4120_v37  ;;  %v5701_v37 = vpop.permute.xlu1 %915 }
 0x274   : > { %3527 = vmatprep.mubr.bf16.mxu1 %v4129_v19 }
 0x276   : > { %v3313_v18 = vpop.f32.mrb[128].mxu1 }
 0x277   : > { %v3315_v55 = vpop.f32.mrb[129].mxu1  ;;  %v836_v50 = vpop.permute.xlu1 %835 }
 0x278   : > { %3215 = vmatmul.mubr.bf16.gmra.mrb[108].mxu0 %v4102_v32  ;;  %v3316_v38 = vpop.f32.mrb[130].mxu1  ;;  %v4136_v32 = vcombine.low %v719_v0, %v723_v51  ;;  %v718_v0 = vld [vmem:[#allocation5 + $0x7d0] sm:$0xff] }
 0x279   : > { %3222 = vmatprep.mubr.bf16.mxu0 %v4111_v33  ;;  %v3318_v45 = vpop.f32.mrb[131].mxu1  ;;  %v831_v33 = vpop.permute.xlu0 %830  ;;  %v722_v51 = vld [vmem:[#allocation5 + $0x7f0] sm:$0xff] }
 0x27a   : > { %v4118_v45 = vcombine.low %v702_v28, %v706_v14  ;;  %v2450_v14 = vadd.f32 %v5520_v21, %v826_v1  ;;  %v4135_v11 = vcombine.high %v718_v0, %v722_v51  ;;  %v471_v1 = vld [vmem:[#allocation5 + $0x18] sm:$0xff] }
 0x27b   : > { %3528 = vmatmul.mubr.bf16.gmra.mrb[236].mxu1 %v4128_v6  ;;  %v2447_v6 = vadd.f32 %v5518_v12, %v821_v16 }
 0x27c   : > { %3535 = vmatprep.mubr.bf16.mxu1 %v4137_v25 }
 0x27d   : > { %v5703_v49 = vpop.permute.xlu0 %920 }
 0x27e   : > { %v3321_v19 = vpop.f32.mrb[132].mxu1 }
 0x27f   : > { %v3323_v27 = vpop.f32.mrb[133].mxu1 }
 0x280   : > { %3223 = vmatmul.mubr.bf16.gmra.mrb[112].mxu0 %v4110_v5  ;;  %v3324_v55 = vpop.f32.mrb[134].mxu1  ;;  %v5708_v5 = vpop.permute.xlu1 %925 }
 0x281   : > { %3230 = vmatprep.mubr.bf16.mxu0 %v4119_v26  ;;  %v3326_v46 = vpop.f32.mrb[135].mxu1  ;;  %v841_v2 = vpop.permute.xlu0 %840 }
 0x283   : > { %3536 = vmatmul.mubr.bf16.gmra.mrb[240].mxu1 %v4136_v32 }
 0x284   : > { %v846_v12 = vpop.permute.xlu1 %845 }
 0x286   : > { %v5705_v9 = vpop.f32.mrb[136].mxu1 }
 0x287   : > { %v3331_v25 = vpop.f32.mrb[137].mxu1 }
 0x288   : > { %3231 = vmatmul.mubr.bf16.gmra.mrb[116].mxu0 %v4118_v45  ;;  %v5710_v26 = vpop.f32.mrb[138].mxu1 }
 0x289   : > { %3238 = vmatprep.mubr.bf16.mxu0 %v4127_v36  ;;  %v3334_v27 = vpop.f32.mrb[139].mxu1 }
 0x28a   : > { %v2455_v27 = vadd.f32 %v5522_v29, %v831_v33  ;;  %v5723_v29 = vpop.permute.xlu1 %935 }
 0x28b   : > { %v3024_v46 = vpop.f32.mrb[12].mxu0 }
 0x28c   : > { %v4238_v28 = vadd.f32 %v3024_v46, %v2447_v6  ;;  %v3026_v32 = vpop.f32.mrb[13].mxu0  ;;  %v475_v6 = vld [vmem:[#allocation5 + $0x38] sm:$0xff] }
 0x28d   : > { %v3027_v45 = vpop.f32.mrb[14].mxu0 }
 0x28e   : > { %v4241_v36 = vadd.f32 %v3027_v45, %v2450_v14  ;;  %v4239_v25 = vadd.f32 %v4238_v28, %v3313_v18  ;;  %v3029_v54 = vpop.f32.mrb[15].mxu0  ;;  %v5713_v44 = vpop.f32.mrb[140].mxu1  ;;  %v2458_v18 = vadd.f32 %v5524_v41, %v836_v50  ;;  %v3889_v28 = vcombine.high %v471_v1, %v475_v6 }
 0x28f   : > { %v3339_v22 = vpop.f32.mrb[141].mxu1  ;;  %v5719_v54 = vpop.permute.xlu0 %930  ;;  %v2463_v50 = vadd.f32 %v5526_v52, %v841_v2 }
 0x290   : > { %v4242_v16 = vadd.f32 %v4241_v36, %v3316_v38  ;;  %3239 = vmatmul.mubr.bf16.gmra.mrb[120].mxu0 %v4126_v31  ;;  %v3550_v20 = vmax.f32 %v4239_v25, 0.0  ;;  %v5716_v35 = vpop.f32.mrb[142].mxu1 }
 0x291   : > { %3246 = vmatprep.mubr.bf16.mxu0 %v4135_v11  ;;  %v3342_v46 = vpop.f32.mrb[143].mxu1  ;;  %v4134_v11 = vcombine.low %v718_v0, %v722_v51  ;;  %v483_v0 = vld [vmem:[#allocation5 + $0x78] sm:$0xff] }
 0x292   : > { %v3551_v21 = vmax.f32 %v4242_v16, 0.0 }
 0x293   : > { %v3032_v57 = vpop.f32.mrb[16].mxu0 }
 0x294   : > { %v5721_v38 = vpack.c.bf16 %v3551_v21, %v3550_v20  ;;  %v4244_v31 = vadd.f32 %v3032_v57, %v2455_v27  ;;  %v3034_v14 = vpop.f32.mrb[17].mxu0  ;;  %v851_v20 = vpop.permute.xlu0 %850  ;;  %v479_v21 = vld [vmem:[#allocation5 + $0x58] sm:$0xff] }
 0x295   : > { %v3035_v22 = vpop.f32.mrb[18].mxu0 }
 0x296   : > { %v4247_v33 = vadd.f32 %v3035_v22, %v2458_v18  ;;  %v4245_v32 = vadd.f32 %v4244_v31, %v3321_v19  ;;  %v3037_v45 = vpop.f32.mrb[19].mxu0  ;;  %v5725_v25 = vpop.f32.mrb[144].mxu1  ;;  %v2466_v18 = vadd.f32 %v5529_v59, %v846_v12  ;;  %v2471_v12 = vadd.f32 %v5534_v56, %v851_v20 }
 0x297   : > { %v3347_v41 = vpop.f32.mrb[145].mxu1  ;;  %v856_v19 = vpop.permute.xlu1 %855 }
 0x298   : > { %v4248_v36 = vadd.f32 %v4247_v33, %v3324_v55  ;;  %3247 = vmatmul.mubr.bf16.gmra.mrb[124].mxu0 %v4134_v11  ;;  %v3552_v16 = vmax.f32 %v4245_v32, 0.0  ;;  %v3348_v51 = vpop.f32.mrb[146].mxu1  ;;  %v3888_v11 = vcombine.low %v471_v1, %v475_v6  ;;  %v487_v6 = vld [vmem:[#allocation5 + $0x98] sm:$0xff] }
 0x299   : > { %3287 = vmatprep.mubr.bf16.mxu0 %v3889_v28  ;;  %v3350_v46 = vpop.f32.mrb[147].mxu1  ;;  %v3897_v28 = vcombine.high %v479_v21, %v483_v0 }
 0x29a   : > { %v3553_v27 = vmax.f32 %v4248_v36, 0.0  ;;  %v5733_v36 = vpop.permute.xlu0 %940  ;;  %v2474_v46 = vadd.f32 %v5537_v13, %v856_v19 }
 0x29b   : > { %v3040_v57 = vpop.f32.mrb[20].mxu0  ;;  %v5736_v41 = vpop.permute.xlu1 %945 }
 0x29c   : > { %v5729_v31 = vpack.c.bf16 %v3553_v27, %v3552_v16  ;;  %v4250_v55 = vadd.f32 %v3040_v57, %v2463_v50  ;;  %v3042_v14 = vpop.f32.mrb[21].mxu0  ;;  %v491_v16 = vld [vmem:[#allocation5 + $0xb8] sm:$0xff] }
 0x29d   : > { %v3043_v22 = vpop.f32.mrb[22].mxu0  ;;  %v3896_v14 = vcombine.low %v479_v21, %v483_v0 }
 0x29e   : > { %v4253_v33 = vadd.f32 %v3043_v22, %v2466_v18  ;;  %v4251_v52 = vadd.f32 %v4250_v55, %v5705_v9  ;;  %v3045_v2 = vpop.f32.mrb[23].mxu0  ;;  %v3353_v45 = vpop.f32.mrb[148].mxu1  ;;  %v3905_v22 = vcombine.high %v487_v6, %v491_v16 }
 0x29f   : > { %v3355_v59 = vpop.f32.mrb[149].mxu1 }
 0x2a0   : > { %v4254_v32 = vadd.f32 %v4253_v33, %v5710_v26  ;;  %3288 = vmatmul.mubr.bf16.vlgmr.msra.gmra.mrb[0].mxu0 %v3888_v11  ;;  %v3554_v50 = vmax.f32 %v4251_v52, 0.0  ;;  %v3356_v27 = vpop.f32.mrb[150].mxu1  ;;  %v861_v33 = vpop.permute.xlu0 %860 }
 0x2a1   : > { %3295 = vmatprep.mubr.bf16.mxu0 %v3897_v28  ;;  %v3358_v9 = vpop.f32.mrb[151].mxu1  ;;  %v2479_v13 = vadd.f32 %v5542_v15, %v861_v33 }
 0x2a2   : > { %v3555_v1 = vmax.f32 %v4254_v32, 0.0  ;;  %v866_v32 = vpop.permute.xlu1 %865 }
 0x2a3   : > { %v3048_v57 = vpop.f32.mrb[24].mxu0 }
 0x2a4   : > { %v5739_v26 = vpack.c.bf16 %v3555_v1, %v3554_v50  ;;  %v4256_v18 = vadd.f32 %v3048_v57, %v2471_v12  ;;  %v3050_v55 = vpop.f32.mrb[25].mxu0  ;;  %v2482_v1 = vadd.f32 %v5545_v34, %v866_v32 }
 0x2a5   : > { %v3051_v11 = vpop.f32.mrb[26].mxu0 }
 0x2a6   : > { %v4259_v28 = vadd.f32 %v3051_v11, %v2474_v46  ;;  %v4257_v56 = vadd.f32 %v4256_v18, %v5713_v44  ;;  %v3053_v20 = vpop.f32.mrb[27].mxu0  ;;  %v3361_v2 = vpop.f32.mrb[152].mxu1  ;;  %v3904_v46 = vcombine.low %v487_v6, %v491_v16  ;;  %v2490_v6 = vadd.f32 %v5553_v53, %v5657_v30 }
 0x2a7   : > { %v3363_v59 = vpop.f32.mrb[153].mxu1  ;;  %v2498_v53 = vadd.f32 %v5561_v4, %v5667_v48  ;;  %v2506_v4 = vadd.f32 %v5569_v23, %v5681_v47  ;;  %v2514_v23 = vadd.f32 %v5577_v43, %v5695_v17  ;;  %v5768_v47 = vpop.permute.xlu0 %1030 }
 0x2a8   : > { %v4260_v52 = vadd.f32 %v4259_v28, %v5716_v35  ;;  %3296 = vmatmul.mubr.bf16.gmra.mrb[4].mxu0 %v3896_v14  ;;  %v3556_v19 = vmax.f32 %v4257_v56, 0.0  ;;  %v3364_v50 = vpop.f32.mrb[154].mxu1  ;;  %v2487_v28 = vadd.f32 %v5550_v40, %v5651_v3  ;;  %v2495_v40 = vadd.f32 %v5558_v63, %v5663_v39 }
 0x2a9   : > { %3303 = vmatprep.mubr.bf16.mxu0 %v3905_v22  ;;  %v3366_v0 = vpop.f32.mrb[155].mxu1  ;;  %v2503_v63 = vadd.f32 %v5566_v24, %v5679_v61  ;;  %v2511_v24 = vadd.f32 %v5574_v42, %v5691_v10 }
 0x2aa   : > { %v3557_v12 = vmax.f32 %v4260_v52, 0.0 }
 0x2ab   : > { %v3056_v21 = vpop.f32.mrb[28].mxu0 }
 0x2ac   : > { %v5745_v57 = vpack.c.bf16 %v3557_v12, %v3556_v19  ;;  %v4262_v44 = vadd.f32 %v3056_v21, %v2479_v13  ;;  %v3058_v9 = vpop.f32.mrb[29].mxu0 }
 0x2ad   : > { %v3059_v35 = vpop.f32.mrb[30].mxu0 }
 0x2ae   : > { %v4265_v18 = vadd.f32 %v3059_v35, %v2482_v1  ;;  %v4263_v55 = vadd.f32 %v4262_v44, %v5725_v25  ;;  %v3061_v14 = vpop.f32.mrb[31].mxu0  ;;  %v3369_v15 = vpop.f32.mrb[156].mxu1 }
 0x2af   : > { %v3371_v22 = vpop.f32.mrb[157].mxu1 }
 0x2b0   : > { %v4266_v11 = vadd.f32 %v4265_v18, %v3348_v51  ;;  %3304 = vmatmul.mubr.bf16.gmra.mrb[8].mxu0 %v3904_v46  ;;  %v3558_v56 = vmax.f32 %v4263_v55, 0.0  ;;  %v3372_v34 = vpop.f32.mrb[158].mxu1 }
 0x2b1   : > { %v3374_v52 = vpop.f32.mrb[159].mxu1 }
 0x2b2   : > { %v3559_v20 = vmax.f32 %v4266_v11, 0.0 }
 0x2b3   : > { %v3064_v33 = vpop.f32.mrb[32].mxu0 }
 0x2b4   : > { %v5752_v16 = vpack.c.bf16 %v3559_v20, %v3558_v56  ;;  %v4268_v32 = vadd.f32 %v3064_v33, %v2487_v28  ;;  %v3066_v25 = vpop.f32.mrb[33].mxu0 }
 0x2b5   : > { %v3067_v59 = vpop.f32.mrb[34].mxu0 }
 0x2b6   : > { %v4271_v51 = vadd.f32 %v3067_v59, %v2490_v6  ;;  %v4269_v13 = vadd.f32 %v4268_v32, %v3353_v45  ;;  %v3069_v19 = vpop.f32.mrb[35].mxu0  ;;  %v3377_v21 = vpop.f32.mrb[160].mxu1 }
 0x2b7   : > { %v3379_v0 = vpop.f32.mrb[161].mxu1 }
 0x2b8   : > { %v4272_v12 = vadd.f32 %v4271_v51, %v3356_v27  ;;  %v3560_v3 = vmax.f32 %v4269_v13, 0.0  ;;  %v3380_v44 = vpop.f32.mrb[162].mxu1 }
 0x2b9   : > { %v3382_v46 = vpop.f32.mrb[163].mxu1 }
 0x2ba   : > { %v3561_v1 = vmax.f32 %v4272_v12, 0.0  ;;  %v5772_v46 = vpop.permute.xlu1 %1035 }
 0x2bb   : > { %v3072_v9 = vpop.f32.mrb[36].mxu0 }
 0x2bc   : > { %v3620_v30 = vpack.c.bf16 %v3561_v1, %v3560_v3  ;;  %v4274_v35 = vadd.f32 %v3072_v9, %v2495_v40  ;;  %v3074_v18 = vpop.f32.mrb[37].mxu0 }
 0x2bd   : > { %v3075_v55 = vpop.f32.mrb[38].mxu0 }
 0x2be   : > { %v4277_v45 = vadd.f32 %v3075_v55, %v2498_v53  ;;  %v4275_v14 = vadd.f32 %v4274_v35, %v3361_v2  ;;  %v3077_v27 = vpop.f32.mrb[39].mxu0  ;;  %4149 = vmatprep.subr.bf16.mxu1 %v3620_v30  ;;  %v3385_v22 = vpop.f32.mrb[164].mxu1  ;;  %v2519_v55 = vadd.f32 %v5582_v58, %v5699_v8 }
 0x2bf   : > { %v3387_v28 = vpop.f32.mrb[165].mxu1 }
 0x2c0   : > { %v4278_v11 = vadd.f32 %v4277_v45, %v3364_v50  ;;  %v3562_v39 = vmax.f32 %v4275_v14, 0.0  ;;  %v3388_v20 = vpop.f32.mrb[166].mxu1  ;;  %v5776_v45 = vpop.permute.xlu0 %950  ;;  %v2522_v28 = vadd.f32 %v5585_v60, %v5701_v37 }
 0x2c1   : > { %v3390_v52 = vpop.f32.mrb[167].mxu1 }
 0x2c2   : > { %v3563_v56 = vmax.f32 %v4278_v11, 0.0 }
 0x2c3   : > { %v3080_v33 = vpop.f32.mrb[40].mxu0 }
 0x2c4   : > { %v5762_v48 = vpack.c.bf16 %v3563_v56, %v3562_v39  ;;  %v4280_v6 = vadd.f32 %v3080_v33, %v2503_v63  ;;  %v3082_v2 = vpop.f32.mrb[41].mxu0  ;;  %v5780_v63 = vpop.permute.xlu1 %955 }
 0x2c5   : > { %v3083_v32 = vpop.f32.mrb[42].mxu0  ;;  %v5784_v8 = vpop.permute.xlu0 %1040 }
 0x2c6   : > { %v4283_v25 = vadd.f32 %v3083_v32, %v2506_v4  ;;  %v4281_v50 = vadd.f32 %v4280_v6, %v3369_v15  ;;  %v3085_v59 = vpop.f32.mrb[43].mxu0  ;;  %v3393_v13 = vpop.f32.mrb[168].mxu1  ;;  %v2527_v32 = vadd.f32 %v5589_v7, %v5703_v49 }
 0x2c7   : > { %v3395_v19 = vpop.f32.mrb[169].mxu1 }
 0x2c8   : > { %v4284_v51 = vadd.f32 %v4283_v25, %v3372_v34  ;;  %v3564_v61 = vmax.f32 %v4281_v50, 0.0  ;;  %v3396_v0 = vpop.f32.mrb[170].mxu1  ;;  %v5788_v25 = vpop.permute.xlu1 %1045  ;;  %v2530_v19 = vadd.f32 %v5591_v62, %v5708_v5 }
 0x2c9   : > { %v3398_v3 = vpop.f32.mrb[171].mxu1 }
 0x2ca   : > { %v3565_v12 = vmax.f32 %v4284_v51, 0.0 }
 0x2cb   : > { %v3088_v40 = vpop.f32.mrb[44].mxu0 }
 0x2cc   : > { %v5770_v1 = vpack.c.bf16 %v3565_v12, %v3564_v61  ;;  %v4286_v15 = vadd.f32 %v3088_v40, %v2511_v24  ;;  %v3090_v9 = vpop.f32.mrb[45].mxu0  ;;  %v5794_v12 = vpop.permute.xlu0 %960 }
 0x2cd   : > { %v3091_v34 = vpop.f32.mrb[46].mxu0  ;;  %v5796_v49 = vpop.permute.xlu1 %965 }
 0x2ce   : > { %v4289_v53 = vadd.f32 %v3091_v34, %v2514_v23  ;;  %v4287_v30 = vadd.f32 %v4286_v15, %v3377_v21  ;;  %v3093_v42 = vpop.f32.mrb[47].mxu0  ;;  %v3401_v35 = vpop.f32.mrb[172].mxu1  ;;  %v6099_v34 = vld [vmem:[#allocation17_spill] sm:$0xff] }
 0x2cf   : > { %v3403_v18 = vpop.f32.mrb[173].mxu1 }
 0x2d0   : > { %v4290_v10 = vadd.f32 %v4289_v53, %v3380_v44  ;;  %v3566_v43 = vmax.f32 %v4287_v30, 0.0  ;;  %v3404_v14 = vpop.f32.mrb[174].mxu1  ;;  %v2535_v53 = vadd.f32 %v6099_v34, %v5719_v54  ;;  %v6100_v18 = vld [vmem:[#allocation18_spill] sm:$0xff]  ;;  %v6103_v34 = vld [vmem:[#allocation21_spill] sm:$0xff] }
 0x2d1   : > { %v3406_v11 = vpop.f32.mrb[175].mxu1 }
 0x2d2   : > { %v3567_v17 = vmax.f32 %v4290_v10, 0.0  ;;  %v5806_v11 = vpop.permute.xlu1 %1055 }
 0x2d3   : > { %v3096_v27 = vpop.f32.mrb[48].mxu0 }
 0x2d4   : > { %v5782_v21 = vpack.c.bf16 %v3567_v17, %v3566_v43  ;;  %v4292_v44 = vadd.f32 %v3096_v27, %v2519_v55  ;;  %v3098_v39 = vpop.f32.mrb[49].mxu0  ;;  %v2538_v55 = vadd.f32 %v6100_v18, %v5723_v29  ;;  %v5802_v43 = vpop.permute.xlu0 %1050 }
 0x2d5   : > { %v3099_v56 = vpop.f32.mrb[50].mxu0 }
 0x2d6   : > { %v4295_v33 = vadd.f32 %v3099_v56, %v2522_v28  ;;  %v4293_v52 = vadd.f32 %v4292_v44, %v3385_v22  ;;  %v3101_v58 = vpop.f32.mrb[51].mxu0  ;;  %v3409_v6 = vpop.f32.mrb[176].mxu1 }
 0x2d7   : > { %v3411_v2 = vpop.f32.mrb[177].mxu1 }
 0x2d8   : > { %v4296_v4 = vadd.f32 %v4295_v33, %v3388_v20  ;;  %v3568_v60 = vmax.f32 %v4293_v52, 0.0  ;;  %v3412_v50 = vpop.f32.mrb[178].mxu1  ;;  %v6101_v52 = vld [vmem:[#allocation19_spill] sm:$0xff] }
 0x2d9   : > { %v3414_v51 = vpop.f32.mrb[179].mxu1  ;;  %v2543_v58 = vadd.f32 %v6101_v52, %v5733_v36 }
 0x2da   : > { %v3569_v37 = vmax.f32 %v4296_v4, 0.0  ;;  %v971_v4 = vpop.permute.xlu0 %970 }
 0x2db   : > { %v3104_v59 = vpop.f32.mrb[52].mxu0 }
 0x2dc   : > { %v5792_v22 = vpack.c.bf16 %v3569_v37, %v3568_v60  ;;  %v4298_v24 = vadd.f32 %v3104_v59, %v2527_v32  ;;  %v3106_v61 = vpop.f32.mrb[53].mxu0  ;;  %v6102_v59 = vld [vmem:[#allocation20_spill] sm:$0xff] }
 0x2dd   : > { %v3107_v20 = vpop.f32.mrb[54].mxu0  ;;  %v2546_v51 = vadd.f32 %v6102_v59, %v5736_v41 }
 0x2de   : > { %v4301_v40 = vadd.f32 %v3107_v20, %v2530_v19  ;;  %v4299_v3 = vadd.f32 %v4298_v24, %v3393_v13  ;;  %v3109_v7 = vpop.f32.mrb[55].mxu0  ;;  %v3417_v15 = vpop.f32.mrb[180].mxu1 }
 0x2df   : > { %v3419_v9 = vpop.f32.mrb[181].mxu1  ;;  %v976_v19 = vpop.permute.xlu1 %975 }
 0x2e0   : > { %v4302_v23 = vadd.f32 %v4301_v40, %v3396_v0  ;;  %v3570_v30 = vmax.f32 %v4299_v3, 0.0  ;;  %v3420_v5 = vpop.f32.mrb[182].mxu1  ;;  %v5814_v7 = vpop.permute.xlu0 %1060 }
 0x2e1   : > { %v3422_v10 = vpop.f32.mrb[183].mxu1 }
 0x2e2   : > { %v3571_v62 = vmax.f32 %v4302_v23, 0.0 }
 0x2e3   : > { %v3112_v42 = vpop.f32.mrb[56].mxu0 }
 0x2e4   : > { %v5804_v13 = vpack.c.bf16 %v3571_v62, %v3570_v30  ;;  %v4304_v17 = vadd.f32 %v3112_v42, %v2535_v53  ;;  %v3114_v27 = vpop.f32.mrb[57].mxu0  ;;  %v2551_v53 = vadd.f32 %v6103_v34, %v5776_v45  ;;  %v5818_v30 = vpop.permute.xlu1 %1065 }
 0x2e5   : > { %v3115_v0 = vpop.f32.mrb[58].mxu0 }
 0x2e6   : > { %v4307_v28 = vadd.f32 %v3115_v0, %v2538_v55  ;;  %v4305_v44 = vadd.f32 %v4304_v17, %v3401_v35  ;;  %v3117_v54 = vpop.f32.mrb[59].mxu0  ;;  %v3425_v56 = vpop.f32.mrb[184].mxu1  ;;  %v6104_v55 = vld [vmem:[#allocation22_spill] sm:$0xff] }
 0x2e7   : > { %v3427_v33 = vpop.f32.mrb[185].mxu1  ;;  %v2554_v17 = vadd.f32 %v6104_v55, %v5780_v63 }
 0x2e8   : > { %v4308_v39 = vadd.f32 %v4307_v28, %v3404_v14  ;;  %v3572_v29 = vmax.f32 %v4305_v44, 0.0  ;;  %v3428_v32 = vpop.f32.mrb[186].mxu1  ;;  %v981_v28 = vpop.permute.xlu0 %980 }
 0x2e9   : > { %v3430_v37 = vpop.f32.mrb[187].mxu1  ;;  %v986_v45 = vpop.permute.xlu1 %985 }
 0x2ea   : > { %v3573_v2 = vmax.f32 %v4308_v39, 0.0 }
 0x2eb   : > { %v3120_v60 = vpop.f32.mrb[60].mxu0 }
 0x2ec   : > { %v5812_v24 = vpack.c.bf16 %v3573_v2, %v3572_v29  ;;  %v4310_v35 = vadd.f32 %v3120_v60, %v2543_v58  ;;  %v3122_v61 = vpop.f32.mrb[61].mxu0  ;;  %v6105_v29 = vld [vmem:[#allocation23_spill] sm:$0xff] }
 0x2ed   : > { %v3123_v14 = vpop.f32.mrb[62].mxu0  ;;  %v2559_v2 = vadd.f32 %v6105_v29, %v5794_v12 }
 0x2ee   : > { %v4313_v20 = vadd.f32 %v3123_v14, %v2546_v51  ;;  %v4311_v40 = vadd.f32 %v4310_v35, %v3409_v6  ;;  %v3125_v3 = vpop.f32.mrb[63].mxu0  ;;  %v3433_v23 = vpop.f32.mrb[188].mxu1  ;;  %v6106_v35 = vld [vmem:[#allocation24_spill] sm:$0xff] }
 0x2ef   : > { %v3435_v9 = vpop.f32.mrb[189].mxu1  ;;  %v2562_v61 = vadd.f32 %v6106_v35, %v5796_v49  ;;  %v5828_v14 = vpop.permute.xlu0 %1070 }
 0x2f0   : > { %v4314_v36 = vadd.f32 %v4313_v20, %v3412_v50  ;;  %v3574_v41 = vmax.f32 %v4311_v40, 0.0  ;;  %v3436_v42 = vpop.f32.mrb[190].mxu1  ;;  %v5832_v3 = vpop.permute.xlu1 %1075 }
 0x2f1   : > { %v3438_v18 = vpop.f32.mrb[191].mxu1 }
 0x2f2   : > { %v3575_v62 = vmax.f32 %v4314_v36, 0.0 }
 0x2f3   : > { %v3128_v10 = vpop.f32.mrb[64].mxu0  ;;  %v991_v18 = vpop.permute.xlu0 %990 }
 0x2f4   : > { %v5822_v6 = vpack.c.bf16 %v3575_v62, %v3574_v41  ;;  %v4316_v27 = vadd.f32 %v3128_v10, %v2551_v53  ;;  %v3130_v0 = vpop.f32.mrb[65].mxu0  ;;  %v6107_v62 = vld [vmem:[#allocation25_spill] sm:$0xff] }
 0x2f5   : > { %v3131_v50 = vpop.f32.mrb[66].mxu0  ;;  %v2567_v10 = vadd.f32 %v6107_v62, %v971_v4 }
 0x2f6   : > { %v4319_v44 = vadd.f32 %v3131_v50, %v2554_v17  ;;  %v4317_v54 = vadd.f32 %v4316_v27, %v3417_v15  ;;  %v3133_v39 = vpop.f32.mrb[67].mxu0  ;;  %v3441_v52 = vpop.f32.mrb[192].mxu1  ;;  %v6108_v50 = vld [vmem:[#allocation26_spill] sm:$0xff] }
 0x2f7   : > { %v3443_v58 = vpop.f32.mrb[193].mxu1 }
 0x2f8   : > { %v4320_v33 = vadd.f32 %v4319_v44, %v3420_v5  ;;  %v3576_v60 = vmax.f32 %v4317_v54, 0.0  ;;  %v3444_v59 = vpop.f32.mrb[194].mxu1  ;;  %v2570_v44 = vadd.f32 %v6108_v50, %v976_v19  ;;  %v996_v54 = vpop.permute.xlu1 %995 }
 0x2f9   : > { %v3446_v51 = vpop.f32.mrb[195].mxu1 }
 0x2fa   : > { %v3577_v37 = vmax.f32 %v4320_v33, 0.0  ;;  %v6109_v51 = vld [vmem:[#allocation27_spill] sm:$0xff] }
 0x2fb   : > { %v3136_v63 = vpop.f32.mrb[68].mxu0  ;;  %v2575_v35 = vadd.f32 %v6109_v51, %v981_v28 }
 0x2fc   : > { %v5830_v20 = vpack.c.bf16 %v3577_v37, %v3576_v60  ;;  %v4322_v15 = vadd.f32 %v3136_v63, %v2559_v2  ;;  %v3138_v40 = vpop.f32.mrb[69].mxu0  ;;  %v5838_v60 = vpop.permute.xlu0 %1080 }
 0x2fd   : > { %v3139_v5 = vpop.f32.mrb[70].mxu0 }
 0x2fe   : > { %v4325_v36 = vadd.f32 %v3139_v5, %v2562_v61  ;;  %v4323_v9 = vadd.f32 %v4322_v15, %v3425_v56  ;;  %v3141_v12 = vpop.f32.mrb[71].mxu0  ;;  %v3449_v53 = vpop.f32.mrb[196].mxu1 }
 0x2ff   : > { %v3451_v41 = vpop.f32.mrb[197].mxu1  ;;  %v5841_v61 = vpop.permute.xlu1 %1085 }
 0x300   : > { %v4326_v34 = vadd.f32 %v4325_v36, %v3428_v32  ;;  %v3578_v55 = vmax.f32 %v4323_v9, 0.0  ;;  %v3452_v17 = vpop.f32.mrb[198].mxu1  ;;  %v6110_v9 = vld [vmem:[#allocation28_spill] sm:$0xff] }
 0x301   : > { %v3454_v0 = vpop.f32.mrb[199].mxu1  ;;  %v2578_v12 = vadd.f32 %v6110_v9, %v986_v45 }
 0x302   : > { %v3579_v49 = vmax.f32 %v4326_v34, 0.0 }
 0x303   : > { %v3144_v27 = vpop.f32.mrb[72].mxu0 }
 0x304   : > { %v5836_v39 = vpack.c.bf16 %v3579_v49, %v3578_v55  ;;  %v4328_v33 = vadd.f32 %v3144_v27, %v2567_v10  ;;  %v3146_v58 = vpop.f32.mrb[73].mxu0  ;;  %v1001_v10 = vpop.permute.xlu0 %1000 }
 0x305   : > { %v3147_v56 = vpop.f32.mrb[74].mxu0  ;;  %v1006_v27 = vpop.permute.xlu1 %1005 }
 0x306   : > { %v4331_v29 = vadd.f32 %v3147_v56, %v2570_v44  ;;  %v4329_v32 = vadd.f32 %v4328_v33, %v3433_v23  ;;  %v3149_v2 = vpop.f32.mrb[75].mxu0  ;;  %v3457_v37 = vpop.f32.mrb[200].mxu1  ;;  %v6111_v44 = vld [vmem:[#allocation29_spill] sm:$0xff] }
 0x307   : > { %v3459_v63 = vpop.f32.mrb[201].mxu1  ;;  %v2583_v33 = vadd.f32 %v6111_v44, %v991_v18  ;;  %v6112_v2 = vld [vmem:[#allocation30_spill] sm:$0xff] }
 0x308   : > { %v4332_v4 = vadd.f32 %v4331_v29, %v3436_v42  ;;  %v3580_v15 = vmax.f32 %v4329_v32, 0.0  ;;  %v3460_v40 = vpop.f32.mrb[202].mxu1  ;;  %v5848_v63 = vpop.permute.xlu0 %1090 }
 0x309   : > { %v3462_v36 = vpop.f32.mrb[203].mxu1 }
 0x30a   : > { %v3581_v19 = vmax.f32 %v4332_v4, 0.0  ;;  %v2586_v4 = vadd.f32 %v6112_v2, %v996_v54 }
 0x30b   : > { %v3152_v5 = vpop.f32.mrb[76].mxu0 }
 0x30c   : > { %v5844_v34 = vpack.c.bf16 %v3581_v19, %v3580_v15  ;;  %v4334_v23 = vadd.f32 %v3152_v5, %v2575_v35  ;;  %v3154_v41 = vpop.f32.mrb[77].mxu0  ;;  %v5852_v19 = vpop.permute.xlu1 %1095 }
 0x30d   : > { %v3155_v62 = vpop.f32.mrb[78].mxu0 }
 0x30e   : > { %v4337_v42 = vadd.f32 %v3155_v62, %v2578_v12  ;;  %v4335_v55 = vadd.f32 %v4334_v23, %v3441_v52  ;;  %v3157_v49 = vpop.f32.mrb[79].mxu0  ;;  %v3465_v0 = vpop.f32.mrb[204].mxu1  ;;  %v6113_v23 = vld [vmem:[#allocation31_spill] sm:$0xff] }
 0x30f   : > { %v3467_v50 = vpop.f32.mrb[205].mxu1  ;;  %v2591_v41 = vadd.f32 %v6113_v23, %v1001_v10  ;;  %v1011_v62 = vpop.permute.xlu0 %1010  ;;  %v4635_v10 = vld [vmem:[%s6031_s3 + $0x4] ss:$16 sps:$4 sm:$0xff]  }
 0x310   : > { %v4338_v28 = vadd.f32 %v4337_v42, %v3444_v59  ;;  %v3582_v58 = vmax.f32 %v4335_v55, 0.0  ;;  %v3468_v29 = vpop.f32.mrb[206].mxu1  ;;  %v6114_v50 = vld [vmem:[#allocation32_spill] sm:$0xff]  ;;  %3708 = vmatprep.mubr.bf16.mxu1 %v4635_v10 }
 0x311   : > { %v3470_v45 = vpop.f32.mrb[207].mxu1  ;;  %v2594_v44 = vadd.f32 %v6114_v50, %v1006_v27 }
 0x312   : > { %v3583_v56 = vmax.f32 %v4338_v28, 0.0 }
 0x313   : > { %v3160_v32 = vpop.f32.mrb[80].mxu0 }
 0x314   : > { %v5850_v51 = vpack.c.bf16 %v3583_v56, %v3582_v58  ;;  %v4340_v35 = vadd.f32 %v3160_v32, %v2583_v33  ;;  %v3162_v52 = vpop.f32.mrb[81].mxu0  ;;  %v1016_v33 = vpop.permute.xlu1 %1015 }
 0x315   : > { %v3163_v15 = vpop.f32.mrb[82].mxu0  ;;  %v5861_v52 = vpop.permute.xlu0 %1100 }
 0x316   : > { %v4343_v59 = vadd.f32 %v3163_v15, %v2586_v4  ;;  %v4341_v5 = vadd.f32 %v4340_v35, %v3449_v53  ;;  %v3165_v36 = vpop.f32.mrb[83].mxu0  ;;  %v3473_v9 = vpop.f32.mrb[208].mxu1 }
 0x317   : > { %v3475_v12 = vpop.f32.mrb[209].mxu1 }
 0x318   : > { %v4344_v18 = vadd.f32 %v4343_v59, %v3452_v17  ;;  %v3584_v42 = vmax.f32 %v4341_v5, 0.0  ;;  %v3476_v55 = vpop.f32.mrb[210].mxu1  ;;  %v6115_v59 = vld [vmem:[#allocation33_spill] sm:$0xff]  ;;  %v5864_v5 = vpop.permute.xlu1 %1105 }
 0x319   : > { %v3478_v28 = vpop.f32.mrb[211].mxu1  ;;  %v2599_v27 = vadd.f32 %v6115_v59, %v1011_v62 }
 0x31a   : > { %v3585_v54 = vmax.f32 %v4344_v18, 0.0 }
 0x31b   : > { %v3168_v49 = vpop.f32.mrb[84].mxu0 }
 0x31c   : > { %v5856_v58 = vpack.c.bf16 %v3585_v54, %v3584_v42  ;;  %v4346_v56 = vadd.f32 %v3168_v49, %v2591_v41  ;;  %v3170_v32 = vpop.f32.mrb[85].mxu0  ;;  %v6116_v41 = vld [vmem:[#allocation34_spill] sm:$0xff] }
 0x31d   : > { %v3171_v53 = vpop.f32.mrb[86].mxu0  ;;  %v1021_v32 = vpop.permute.xlu0 %1020 }
 0x31e   : > { %v4349_v45 = vadd.f32 %v3171_v53, %v2594_v44  ;;  %v4347_v17 = vadd.f32 %v4346_v56, %v3457_v37  ;;  %v3173_v2 = vpop.f32.mrb[87].mxu0  ;;  %v3481_v35 = vpop.f32.mrb[212].mxu1 }
 0x31f   : > { %v3483_v15 = vpop.f32.mrb[213].mxu1  ;;  %v6117_v2 = vld [vmem:[#allocation35_spill] sm:$0xff] }
 0x320   : > { %v4350_v4 = vadd.f32 %v4349_v45, %v3460_v40  ;;  %v3586_v36 = vmax.f32 %v4347_v17, 0.0  ;;  %v3484_v12 = vpop.f32.mrb[214].mxu1  ;;  %v2602_v40 = vadd.f32 %v6116_v41, %v1016_v33  ;;  %v1026_v45 = vpop.permute.xlu1 %1025 }
 0x321   : > { %v3486_v37 = vpop.f32.mrb[215].mxu1 }
 0x322   : > { %v3587_v18 = vmax.f32 %v4350_v4, 0.0  ;;  %v2607_v4 = vadd.f32 %v6117_v2, %v1021_v32 }
 0x323   : > { %v3176_v23 = vpop.f32.mrb[88].mxu0 }
 0x324   : > { %v5867_v42 = vpack.c.bf16 %v3587_v18, %v3586_v36  ;;  %v4352_v54 = vadd.f32 %v3176_v23, %v2599_v27  ;;  %v3178_v49 = vpop.f32.mrb[89].mxu0  ;;  %v6118_v36 = vld [vmem:[#allocation36_spill] sm:$0xff] }
 0x325   : > { %v3179_v28 = vpop.f32.mrb[90].mxu0  ;;  %v2610_v18 = vadd.f32 %v6118_v36, %v1026_v45  ;;  %v6120_v45 = vld [vmem:[#allocation38_spill] sm:$0xff] }
 0x326   : > { %v4355_v50 = vadd.f32 %v3179_v28, %v2602_v40  ;;  %v4353_v44 = vadd.f32 %v4352_v54, %v3465_v0  ;;  %v3181_v56 = vpop.f32.mrb[91].mxu0  ;;  %v3489_v53 = vpop.f32.mrb[216].mxu1 }
 0x327   : > { %v3491_v17 = vpop.f32.mrb[217].mxu1  ;;  %v6119_v56 = vld [vmem:[#allocation37_spill] sm:$0xff] }
 0x328   : > { %v4356_v62 = vadd.f32 %v4355_v50, %v3468_v29  ;;  %v3588_v10 = vmax.f32 %v4353_v44, 0.0  ;;  %v3492_v59 = vpop.f32.mrb[218].mxu1  ;;  %v2615_v44 = vadd.f32 %v6119_v56, %v5768_v47  ;;  %v6121_v47 = vld [vmem:[#allocation39_spill] sm:$0xff] }
 0x329   : > { %v3494_v33 = vpop.f32.mrb[219].mxu1 }
 0x32a   : > { %v3589_v15 = vmax.f32 %v4356_v62, 0.0 }
 0x32b   : > { %v3184_v37 = vpop.f32.mrb[92].mxu0 }
 0x32c   : > { %v5871_v27 = vpack.c.bf16 %v3589_v15, %v3588_v10  ;;  %v4358_v23 = vadd.f32 %v3184_v37, %v2607_v4  ;;  %v3186_v41 = vpop.f32.mrb[93].mxu0  ;;  %v2618_v10 = vadd.f32 %v6120_v45, %v5772_v46  ;;  %v6122_v46 = vld [vmem:[#allocation40_spill] sm:$0xff] }
 0x32d   : > { %v3187_v0 = vpop.f32.mrb[94].mxu0 }
 0x32e   : > { %v4361_v40 = vadd.f32 %v3187_v0, %v2610_v18  ;;  %v4359_v54 = vadd.f32 %v4358_v23, %v3473_v9  ;;  %v3189_v29 = vpop.f32.mrb[95].mxu0  ;;  %v3497_v28 = vpop.f32.mrb[220].mxu1 }
 0x32f   : > { %v3499_v50 = vpop.f32.mrb[221].mxu1 }
 0x330   : > { %v4362_v49 = vadd.f32 %v4361_v40, %v3476_v55  ;;  %v3590_v32 = vmax.f32 %v4359_v54, 0.0  ;;  %v3500_v17 = vpop.f32.mrb[222].mxu1  ;;  %v2623_v40 = vadd.f32 %v6121_v47, %v5784_v8  ;;  %v6123_v8 = vld [vmem:[#allocation41_spill] sm:$0xff] }
 0x331   : > { %v3502_v33 = vpop.f32.mrb[223].mxu1 }
 0x332   : > { %v3591_v62 = vmax.f32 %v4362_v49, 0.0 }
 0x333   : > { %v3192_v2 = vpop.f32.mrb[96].mxu0 }
 0x334   : > { %v5877_v4 = vpack.c.bf16 %v3591_v62, %v3590_v32  ;;  %v4364_v15 = vadd.f32 %v3192_v2, %v2615_v44  ;;  %v3194_v37 = vpop.f32.mrb[97].mxu0  ;;  %v2626_v32 = vadd.f32 %v6122_v46, %v5788_v25  ;;  %v6124_v25 = vld [vmem:[#allocation42_spill] sm:$0xff] }
 0x335   : > { %v3195_v9 = vpop.f32.mrb[98].mxu0  ;;  %v2634_v47 = vadd.f32 %v6124_v25, %v5806_v11  ;;  %v6126_v11 = vld [vmem:[#allocation45_spill] sm:$0xff] }
 0x336   : > { %v4367_v36 = vadd.f32 %v3195_v9, %v2618_v10  ;;  %v4365_v55 = vadd.f32 %v4364_v15, %v3481_v35  ;;  %v3197_v18 = vpop.f32.mrb[99].mxu0  ;;  %v3505_v41 = vpop.f32.mrb[224].mxu1  ;;  %v2631_v9 = vadd.f32 %v6123_v8, %v5802_v43  ;;  %v6125_v43 = vld [vmem:[#allocation44_spill] sm:$0xff] }
 0x337   : > { %v3507_v0 = vpop.f32.mrb[225].mxu1 }
 0x338   : > { %v4368_v23 = vadd.f32 %v4367_v36, %v3484_v12  ;;  %v3592_v54 = vmax.f32 %v4365_v55, 0.0  ;;  %v3508_v49 = vpop.f32.mrb[226].mxu1 }
 0x339   : > { %v3510_v56 = vpop.f32.mrb[227].mxu1 }
 0x33a   : > { %v3593_v29 = vmax.f32 %v4368_v23, 0.0 }
 0x33b   : > { %v3200_v50 = vpop.f32.mrb[100].mxu0 }
 0x33c   : > { %v5883_v44 = vpack.c.bf16 %v3593_v29, %v3592_v54  ;;  %v4370_v62 = vadd.f32 %v3200_v50, %v2623_v40  ;;  %v3202_v2 = vpop.f32.mrb[101].mxu0 }
 0x33d   : > { %v3203_v35 = vpop.f32.mrb[102].mxu0  ;;  %v2639_v2 = vadd.f32 %v6125_v43, %v5814_v7  ;;  %v6127_v7 = vld [vmem:[#allocation47_spill] sm:$0xff] }
 0x33e   : > { %v4373_v33 = vadd.f32 %v3203_v35, %v2626_v32  ;;  %v4371_v12 = vadd.f32 %v4370_v62, %v3489_v53  ;;  %v3205_v45 = vpop.f32.mrb[103].mxu0  ;;  %v3513_v15 = vpop.f32.mrb[228].mxu1 }
 0x33f   : > { %v3515_v37 = vpop.f32.mrb[229].mxu1 }
 0x340   : > { %v4374_v10 = vadd.f32 %v4373_v33, %v3492_v59  ;;  %v3594_v36 = vmax.f32 %v4371_v12, 0.0  ;;  %v3516_v18 = vpop.f32.mrb[230].mxu1  ;;  %v2642_v37 = vadd.f32 %v6126_v11, %v5818_v30  ;;  %v6128_v30 = vld [vmem:[#allocation48_spill] sm:$0xff] }
 0x341   : > { %v3518_v0 = vpop.f32.mrb[231].mxu1 }
 0x342   : > { %v3595_v55 = vmax.f32 %v4374_v10, 0.0 }
 0x343   : > { %v3208_v23 = vpop.f32.mrb[104].mxu0 }
 0x344   : > { %v5889_v40 = vpack.c.bf16 %v3595_v55, %v3594_v36  ;;  %v4376_v54 = vadd.f32 %v3208_v23, %v2631_v9  ;;  %v3210_v29 = vpop.f32.mrb[105].mxu0 }
 0x345   : > { %v3211_v53 = vpop.f32.mrb[106].mxu0 }
 0x346   : > { %v4379_v50 = vadd.f32 %v3211_v53, %v2634_v47  ;;  %v4377_v59 = vadd.f32 %v4376_v54, %v3497_v28  ;;  %v3213_v56 = vpop.f32.mrb[107].mxu0  ;;  %v3521_v32 = vpop.f32.mrb[232].mxu1  ;;  %v2647_v54 = vadd.f32 %v6127_v7, %v5828_v14  ;;  %v6129_v14 = vld [vmem:[#allocation51_spill] sm:$0xff] }
 0x347   : > { %v3523_v62 = vpop.f32.mrb[233].mxu1 }
 0x348   : > { %v4380_v46 = vadd.f32 %v4379_v50, %v3500_v17  ;;  %v3596_v35 = vmax.f32 %v4377_v59, 0.0  ;;  %v3524_v12 = vpop.f32.mrb[234].mxu1 }
 0x349   : > { %v3526_v10 = vpop.f32.mrb[235].mxu1 }
 0x34a   : > { %v3597_v33 = vmax.f32 %v4380_v46, 0.0  ;;  %v2650_v46 = vadd.f32 %v6128_v30, %v5832_v3  ;;  %v6130_v3 = vld [vmem:[#allocation52_spill] sm:$0xff] }
 0x34b   : > { %v3216_v45 = vpop.f32.mrb[108].mxu0 }
 0x34c   : > { %v5895_v8 = vpack.c.bf16 %v3597_v33, %v3596_v35  ;;  %v4382_v9 = vadd.f32 %v3216_v45, %v2639_v2  ;;  %v3218_v36 = vpop.f32.mrb[109].mxu0 }
 0x34d   : > { %v3219_v28 = vpop.f32.mrb[110].mxu0 }
 0x34e   : > { %v4385_v55 = vadd.f32 %v3219_v28, %v2642_v37  ;;  %v4383_v17 = vadd.f32 %v4382_v9, %v3505_v41  ;;  %v3221_v23 = vpop.f32.mrb[111].mxu0  ;;  %v3529_v25 = vpop.f32.mrb[236].mxu1  ;;  %v2655_v37 = vadd.f32 %v6129_v14, %v5838_v60 }
 0x34f   : > { %v3531_v47 = vpop.f32.mrb[237].mxu1  ;;  %v2658_v23 = vadd.f32 %v6130_v3, %v5841_v61 }
 0x350   : > { %v4386_v0 = vadd.f32 %v4385_v55, %v3508_v49  ;;  %v3598_v29 = vmax.f32 %v4383_v17, 0.0  ;;  %v3532_v50 = vpop.f32.mrb[238].mxu1 }
 0x351   : > { %v3534_v56 = vpop.f32.mrb[239].mxu1 }
 0x352   : > { %v3599_v53 = vmax.f32 %v4386_v0, 0.0 }
 0x353   : > { %v3224_v59 = vpop.f32.mrb[112].mxu0 }
 0x354   : > { %v5901_v62 = vpack.c.bf16 %v3599_v53, %v3598_v29  ;;  %v4388_v43 = vadd.f32 %v3224_v59, %v2647_v54  ;;  %v3226_v2 = vpop.f32.mrb[113].mxu0  ;;  %v6131_v59 = vld [vmem:[#allocation53_spill] sm:$0xff] }
 0x355   : > { %v3227_v41 = vpop.f32.mrb[114].mxu0  ;;  %v2663_v60 = vadd.f32 %v6131_v59, %v5848_v63  ;;  %v6137_v59 = vld [vmem:[#allocation46_spill] sm:$0xff] }
 0x356   : > { %v4391_v35 = vadd.f32 %v3227_v41, %v2650_v46  ;;  %v4389_v49 = vadd.f32 %v4388_v43, %v3513_v15  ;;  %v3229_v33 = vpop.f32.mrb[115].mxu0  ;;  %v3537_v10 = vpop.f32.mrb[240].mxu1  ;;  %v6132_v43 = vld [vmem:[#allocation55_spill] sm:$0xff] }
 0x357   : > { %v3539_v11 = vpop.f32.mrb[241].mxu1  ;;  %v2666_v2 = vadd.f32 %v6132_v43, %v5852_v19 }
 0x358   : > { %v4392_v45 = vadd.f32 %v4391_v35, %v3516_v18  ;;  %v3600_v9 = vmax.f32 %v4389_v49, 0.0  ;;  %v3540_v28 = vpop.f32.mrb[242].mxu1 }
 0x359   : > { %v3542_v17 = vpop.f32.mrb[243].mxu1 }
 0x35a   : > { %v3601_v36 = vmax.f32 %v4392_v45, 0.0 }
 0x35b   : > { %v3232_v55 = vpop.f32.mrb[116].mxu0 }
 0x35c   : > { %v5907_v0 = vpack.c.bf16 %v3601_v36, %v3600_v9  ;;  %v4394_v47 = vadd.f32 %v3232_v55, %v2655_v37  ;;  %v3234_v7 = vpop.f32.mrb[117].mxu0  ;;  %v6134_v36 = vld [vmem:[#allocation58_spill] sm:$0xff] }
 0x35d   : > { %v3235_v15 = vpop.f32.mrb[118].mxu0  ;;  %v2674_v55 = vadd.f32 %v6134_v36, %v5864_v5 }
 0x35e   : > { %v4397_v54 = vadd.f32 %v3235_v15, %v2658_v23  ;;  %v4395_v18 = vadd.f32 %v4394_v47, %v3521_v32  ;;  %v3237_v29 = vpop.f32.mrb[119].mxu0 }
 0x360   : > { %v4398_v53 = vadd.f32 %v4397_v54, %v3524_v12  ;;  %v3602_v56 = vmax.f32 %v4395_v18, 0.0  ;;  %v6133_v12 = vld [vmem:[#allocation57_spill] sm:$0xff]  ;;  %v6135_v54 = vld [vmem:[#allocation43_spill] sm:$0xff] }
 0x361   : > { %v2671_v14 = vadd.f32 %v6133_v12, %v5861_v52  ;;  %v6142_v12 = vld [vmem:[#allocation14_spill] sm:$0xff] }
 0x362   : > { %v3603_v30 = vmax.f32 %v4398_v53, 0.0 }
 0x363   : > { %v3240_v46 = vpop.f32.mrb[120].mxu0 }
 0x364   : > { %v5913_v41 = vpack.c.bf16 %v3603_v30, %v3602_v56  ;;  %v4400_v61 = vadd.f32 %v3240_v46, %v2663_v60  ;;  %v3242_v35 = vpop.f32.mrb[121].mxu0  ;;  %v6138_v60 = vld [vmem:[#allocation12_spill] sm:$0xff] }
 0x365   : > { %v3243_v49 = vpop.f32.mrb[122].mxu0  ;;  %v2426_v56 = vadd.f32 %v6138_v60, %v6137_v59 }
 0x366   : > { %v4403_v33 = vadd.f32 %v3243_v49, %v2666_v2  ;;  %v4401_v45 = vadd.f32 %v4400_v61, %v3529_v25  ;;  %v3245_v11 = vpop.f32.mrb[123].mxu0  ;;  %v6139_v49 = vld [vmem:[#allocation49_spill] sm:$0xff] }
 0x368   : > { %v4404_v32 = vadd.f32 %v4403_v33, %v3532_v50  ;;  %v3604_v37 = vmax.f32 %v4401_v45, 0.0  ;;  %v6136_v50 = vld [vmem:[#allocation11_spill] sm:$0xff] }
 0x369   : > { %v2423_v18 = vadd.f32 %v6136_v50, %v6135_v54  ;;  %v6145_v54 = vld [vmem:[#allocation56_spill] sm:$0xff] }
 0x36a   : > { %v3605_v63 = vmax.f32 %v4404_v32, 0.0  ;;  %v6141_v32 = vld [vmem:[#allocation50_spill] sm:$0xff]  ;;  %v6146_v50 = vld [vmem:[#allocation16_spill] sm:$0xff] }
 0x36b   : > { %v3248_v9 = vpop.f32.mrb[124].mxu0 }
 0x36c   : > { %v5919_v17 = vpack.c.bf16 %v3605_v63, %v3604_v37  ;;  %v4406_v19 = vadd.f32 %v3248_v9, %v2671_v14  ;;  %v3250_v3 = vpop.f32.mrb[125].mxu0  ;;  %v2434_v14 = vadd.f32 %v6142_v12, %v6141_v32 }
 0x36d   : > { %v3251_v23 = vpop.f32.mrb[126].mxu0 }
 0x36e   : > { %v4409_v47 = vadd.f32 %v3251_v23, %v2674_v55  ;;  %v4407_v7 = vadd.f32 %v4406_v19, %v3537_v10  ;;  %v3253_v15 = vpop.f32.mrb[127].mxu0  ;;  %v6143_v23 = vld [vmem:[#allocation54_spill] sm:$0xff] }
 0x370   : > { %v4410_v25 = vadd.f32 %v4409_v47, %v3540_v28  ;;  %v3606_v29 = vmax.f32 %v4407_v7, 0.0  ;;  %v6140_v28 = vld [vmem:[#allocation13_spill] sm:$0xff]  ;;  %v6144_v47 = vld [vmem:[#allocation15_spill] sm:$0xff] }
 0x371   : > { %v2431_v33 = vadd.f32 %v6140_v28, %v6139_v49  ;;  %v2439_v7 = vadd.f32 %v6144_v47, %v6143_v23 }
 0x372   : > { %v3607_v52 = vmax.f32 %v4410_v25, 0.0 }
 0x373   : > { %v3289_v53 = vpop.f32.mrb[0].mxu0 }
 0x374   : > { %v5925_v30 = vpack.c.bf16 %v3607_v52, %v3606_v29  ;;  %v4226_v5 = vadd.f32 %v3289_v53, %v2423_v18  ;;  %v3291_v46 = vpop.f32.mrb[1].mxu0  ;;  %v2442_v18 = vadd.f32 %v6146_v50, %v6145_v54 }
 0x375   : > { %v3292_v43 = vpop.f32.mrb[2].mxu0 }
 0x376   : > { %v4228_v2 = vadd.f32 %v3292_v43, %v2426_v56  ;;  %v3294_v61 = vpop.f32.mrb[3].mxu0  ;;  %v3544_v35 = vmax.f32 %v4226_v5, 0.0 }
 0x378   : > { %v3545_v10 = vmax.f32 %v4228_v2, 0.0 }
 0x37a   : > { %v3612_v45 = vpack.c.bf16 %v3545_v10, %v3544_v35 }
 0x37b   : > { %v3297_v11 = vpop.f32.mrb[4].mxu0 }
 0x37c   : > { %v4230_v37 = vadd.f32 %v3297_v11, %v2431_v33  ;;  %v3299_v63 = vpop.f32.mrb[5].mxu0  ;;  %4150 = vmatpush3.bf16.msra.mxu1 %v3612_v45 }
 0x37d   : > { %v3300_v9 = vpop.f32.mrb[6].mxu0  ;;  %4151 = vmatprep.subr.bf16.mxu1 %v5762_v48 }
 0x37e   : > { %v4232_v36 = vadd.f32 %v3300_v9, %v2434_v14  ;;  %v3302_v55 = vpop.f32.mrb[7].mxu0  ;;  %v3546_v19 = vmax.f32 %v4230_v37, 0.0 }
 0x380   : > { %v3547_v3 = vmax.f32 %v4232_v36, 0.0 }
 0x382   : > { %v3613_v15 = vpack.c.bf16 %v3547_v3, %v3546_v19 }
 0x383   : > { %v3305_v25 = vpop.f32.mrb[8].mxu0 }
 0x384   : > { %v4234_v29 = vadd.f32 %v3305_v25, %v2439_v7  ;;  %v3307_v52 = vpop.f32.mrb[9].mxu0  ;;  %4152 = vmatpush3.bf16.msra.mxu1 %v3613_v15 }
 0x385   : > { %v3308_v53 = vpop.f32.mrb[10].mxu0  ;;  %4153 = vmatprep.subr.bf16.mxu1 %v5770_v1  ;;  %v4633_v1 = vld [vmem:[%s6031_s3] ss:$16 sps:$4 sm:$0xff]  }
 0x386   : > { %v4236_v59 = vadd.f32 %v3308_v53, %v2442_v18  ;;  %v3310_v48 = vpop.f32.mrb[11].mxu0  ;;  %v3548_v60 = vmax.f32 %v4234_v29, 0.0 }
 0x388   : > { %v3549_v56 = vmax.f32 %v4236_v59, 0.0 }
 0x38a   : > { %v3614_v5 = vpack.c.bf16 %v3549_v56, %v3548_v60 }
 0x38c   : > { %4154 = vmatpush3.bf16.msra.mxu1 %v3614_v5 }
 0x38d   : > { %4155 = vmatprep.subr.bf16.mxu1 %v5782_v21 }
 0x390   : > { %4156 = vmatpush3.bf16.msra.mxu1 %v5721_v38  ;;  %v4638_v38 = vld [vmem:[%s6031_s3 + $0xc] ss:$16 sps:$4 sm:$0xff]  }
 0x391   : > { %4157 = vmatprep.subr.bf16.mxu1 %v5792_v22 }
 0x394   : > { %4158 = vmatpush3.bf16.msra.mxu1 %v5729_v31  ;;  %v4636_v31 = vld [vmem:[%s6031_s3 + $0x8] ss:$16 sps:$4 sm:$0xff]  }
 0x395   : > { %4159 = vmatprep.subr.bf16.mxu1 %v5804_v13 }
 0x398   : > { %4160 = vmatpush3.bf16.msra.mxu1 %v5739_v26 }
 0x399   : > { %4161 = vmatprep.subr.bf16.mxu1 %v5812_v24 }
 0x39c   : > { %4162 = vmatpush3.bf16.msra.mxu1 %v5745_v57 }
 0x39d   : > { %4163 = vmatprep.subr.bf16.mxu1 %v5822_v6  ;;  %v3649_v6 = vpop.permute.xlu0 %3648 }
 0x3a0   : > { %4164 = vmatpush3.bf16.msra.mxu1 %v5752_v16 }
 0x3a1   : > { %4171 = vmatprep.subr.bf16.mxu1 %v5883_v44 }
 0x3a3   : > { %3709 = vmatmul.mubr.bf16.vlgmr.msra.gmra.mrb[244].mxu1 %v4633_v1 }
 0x3a4   : > { %4172 = vmatpush3.bf16.msra.mxu1 %v5830_v20  ;;  %3749 = vmatprep.mubr.bf16.mxu1 %v4638_v38 }
 0x3a5   : > { %4173 = vmatprep.subr.bf16.mxu1 %v5889_v40 }
 0x3a8   : > { %4174 = vmatpush3.bf16.msra.mxu1 %v5836_v39 }
 0x3a9   : > { %4175 = vmatprep.subr.bf16.mxu1 %v5895_v8 }
 0x3ac   : > { %4176 = vmatpush3.bf16.msra.mxu1 %v5844_v34 }
 0x3ad   : > { %4177 = vmatprep.subr.bf16.mxu1 %v5901_v62 }
 0x3b0   : > { %4178 = vmatpush3.bf16.msra.mxu1 %v5850_v51 }
 0x3b1   : > { %4179 = vmatprep.subr.bf16.mxu1 %v5907_v0 }
 0x3b4   : > { %4180 = vmatpush3.bf16.msra.mxu1 %v5856_v58  ;;  %v3654_v58 = vpop.permute.xlu1 %3653 }
 0x3b5   : > { %4181 = vmatprep.subr.bf16.mxu1 %v5913_v41 }
 0x3b8   : > { %4182 = vmatpush3.bf16.msra.mxu1 %v5867_v42 }
 0x3b9   : > { %4183 = vmatprep.subr.bf16.mxu1 %v5919_v17 }
 0x3bc   : > { %4184 = vmatpush3.bf16.msra.mxu1 %v5871_v27 }
 0x3bd   : > { %4185 = vmatprep.subr.bf16.mxu1 %v5925_v30 }
 0x3c0   : > { %4186 = vmatpush3.bf16.msra.mxu1 %v5877_v4 }
 0x3c3   : > { %3750 = vmatmul.mubr.bf16.vlgmr.msra.gmra.mrb[248].mxu1 %v4636_v31 }
 0x476   : > { %v4165_v26 = vpop.f32.mrb[244].mxu1 }
 0x477   : > { %v4166_v57 = vpop.f32.mrb[245].mxu1 }
 0x478   : > { %v4167_v16 = vadd.f32 %v4166_v57, %v4165_v26  ;;  %v4168_v21 = vpop.f32.mrb[246].mxu1 }
 0x479   : > { %v4169_v22 = vpop.f32.mrb[247].mxu1 }
 0x47a   : > { %v4170_v13 = vadd.f32 %v4169_v22, %v4168_v21  ;;  %v3711_v39 = vadd.f32 %v4167_v16, %v3649_v6 }
 0x47c   : > { %v3714_v27 = vadd.f32 %v4170_v13, %v3654_v58 }
 0x496   : > { %v4187_v24 = vpop.f32.mrb[248].mxu1 }
 0x497   : > { %v4188_v20 = vpop.f32.mrb[249].mxu1 }
 0x498   : > { %v4189_v34 = vadd.f32 %v4188_v20, %v4187_v24  ;;  %v4190_v51 = vpop.f32.mrb[250].mxu1 }
 0x499   : > { %v4191_v42 = vpop.f32.mrb[251].mxu1 }
 0x49a   : > { %v3752_v4 = vadd.f32 %v4189_v34, %v3711_v39  ;;  %v4192_v44 = vadd.f32 %v4191_v42, %v4190_v51 }
 0x49c   : > { %3758 = vst [vmem:[%s274_s10] sm:$0xff] %v3752_v4  ;;  %v3755_v40 = vadd.f32 %v4192_v44, %v3714_v27 }
 0x49e   : > { %3759 = vst [vmem:[%s274_s10 + $0x8] sm:$0xff] %v3755_v40 }
 0x49f   : > { %4710 = shalt.err (!%p4707_p5)
}
 0x4a0   : > { %s4711_s28 = scalar_lea.hbm %s5979_s12, 256  ;;  %s4715_s6 = scalar_lea.hbm %s6033_s5, 512 }
 0x4a1   : > { %p4712_p9 = scmp.ne.s32.totalorder %s5979_s12, %s4711_s28  ;;  %p4716_p3 = scmp.lt.u32.totalorder %s5979_s12, %s6033_s5 }
 0x4a2   : > { %p4717_p7 = scmp.lt.u32.totalorder %s4715_s6, %s4711_s28  ;;  %p4719_p4 = scmp.lt.u32.totalorder %s4711_s28, %s5979_s12 }
 0x4a3   : > { %p4713_p1 = pnand %p4712_p9, %p4921_p10 }
 0x4a4   : > { %p4718_p13 = por %p4717_p7, %p4716_p3 }
 0x4a5   : > { %p4714_p2 = pneg %p4713_p1 }
 0x4a6   : > { %p4720_p6 = por %p4719_p4, %p4718_p13 }
 0x4a8   : > { %p4721_p8 = pnand %p4720_p6, %p4714_p2 }
 0x4aa   : > { %4724 = shalt.err (!%p4721_p8)
}
 0x4ab   : > { %s4793_s16 = smov 128   ;;  %s4794_s8 = smov 8  }
 0x4ac   : > { %4557 = dma.vmem_to_hbm [thread:$0]  (%p4921_p10), %s5974_s11, 256, %s5979_s12, %s3761_s24, %s4793_s16, %s4793_s16, %s4794_s8  }
 0x4ad PF: > { %s3790_s21 = sand.u32 1, %s4763_s18   ;;  %p6147_p12 = scmp.ne.s32.totalorder %s6041_s29, 0 }
 0x4ae   : > { %p6148_p11 = scmp.ge.s32.totalorder %s4783_s23, 2  ;;  %s3791_s27 = scalar_lea.sflag [#allocation4], %s3790_s21 }
 0x4b0   : > { %p4568_p0 = pnand %p6148_p11, %p6147_p12 }
 0x4b2   : > { %4758 = dma.done.wait (!%p4568_p0), %s3791_s27, 256  }
 0x4b3   : > { %4760 = vsyncadd (!%p4568_p0), %s3791_s27, 4294967040  ;;  %s22_s23 = sadd.s32 1, %s4783_s23   ;;  %s6149_s18 = smov %s4767_s19 }
 0x4b4   : > { %p19_p5 = scmp.ge.s32.totalorder %s22_s23, 4   ;;  %s6150_s19 = smov %s4771_s20 }
 0x4b5   : > { %s6151_s20 = smov %s4930_s15  ;;  %s6152_s21 = smov %s4779_s22 }
 0x4b6   : > { %s6153_s22 = smov %s6155_s9  ;;  %21 = sbr.rel (!%p19_p5) target bundleno = 7 (0x7), region = 89 }
 0x4bd   :  { %3796 = vsyncpa [#allocation3], 1 }
 0x4be   :  { %3798 = vsyncpa [#allocation3 + $0x1], 1 }
 0x4bf   :  { %3799 = vsyncpa [#allocation6], 1 }
 0x4c0   :  { %3800 = vsyncpa [#allocation4], 1 }
 0x4c1   :  { %3802 = vsyncpa [#allocation4 + $0x1], 1 }

</bundles_post_ra>
